<compile_context>
chip_gen: v7x
topology: tpu7x:2x2x1
jax: 0.10.0
libtpu: 0.0.40
codegen_flags: <defaults>
</compile_context>

<pallas_src>
import functools

import numpy as np
import jax
import jax.numpy as jnp
from jax.experimental import pallas as pl
from jax.experimental.pallas import tpu as pltpu


# ----------------------------------------------------------------------------
# Fused kernel: avgpool(2,2,ceil) -> 3 x (conv3x3 pad=1 + ReLU), per batch n.
# ----------------------------------------------------------------------------
def _down_conv_block_kernel(x_ref, w1_ref, b1_ref, w2_ref, b2_ref, w3_ref,
                            b3_ref, o_ref, buf_ref, *, H, W, Ho, Wo, cin, cp,
                            matmul_dtype):
    # Zero the padded activation buffer; its 1-pixel border stays zero for all
    # three convs (this replaces the wrapper-side jnp.pad of the old version).
    buf_ref[...] = jnp.zeros_like(buf_ref)

    # ---- AvgPool2d(kernel=2, stride=2, padding=0, ceil_mode=True) ----------
    x = x_ref[0].astype(jnp.float32)                       # (H, W, Cin)
    hp, wp = 2 * Ho, 2 * Wo
    if H < hp:  # odd H: ceil-mode extra window row (zero-fill, fixed divisor)
        x = jnp.concatenate(
            [x, jnp.zeros((hp - H, W, cin), jnp.float32)], axis=0)
    if W < wp:  # odd W: ceil-mode extra window column
        x = jnp.concatenate(
            [x, jnp.zeros((hp, wp - W, cin), jnp.float32)], axis=1)
    pooled = x.reshape(Ho, 2, Wo, 2, cin).sum(axis=(1, 3))  # (Ho, Wo, Cin)
    if H < hp or W < wp:
        # PyTorch divides edge windows by the number of *valid* elements.
        rcnt = jnp.where(
            jax.lax.broadcasted_iota(jnp.int32, (Ho, Wo, 1), 0) * 2 + 1 < H,
            2.0, 1.0)
        ccnt = jnp.where(
            jax.lax.broadcasted_iota(jnp.int32, (Ho, Wo, 1), 1) * 2 + 1 < W,
            2.0, 1.0)
        pooled = pooled / (rcnt * ccnt)
    else:
        pooled = pooled * 0.25

    # Lane-pad channels Cin -> Cp and store into the interior of the buffer
    # (full-lane, unmasked store).
    if cin < cp:
        pooled = jnp.concatenate(
            [pooled, jnp.zeros((Ho, Wo, cp - cin), jnp.float32)], axis=-1)
    buf_ref[1:1 + Ho, 1:1 + Wo, :] = pooled

    # ---- conv3x3(pad=1) + bias + ReLU: one MXU matmul per layer (im2col) ---
    def conv_relu(w_ref, b_ref):
        cols = []
        for kh in range(3):
            for kw in range(3):
                cols.append(
                    buf_ref[kh:kh + Ho, kw:kw + Wo, :].reshape(Ho * Wo, cp))
        patches = jnp.concatenate(cols, axis=-1)            # (Ho*Wo, 9*Cp)
        y = jnp.dot(patches.astype(matmul_dtype),
                    w_ref[...].astype(matmul_dtype),
                    preferred_element_type=jnp.float32)     # (Ho*Wo, Cp)
        return jnp.maximum(y + b_ref[...], 0.0)             # bias + ReLU, f32

    y = conv_relu(w1_ref, b1_ref)
    buf_ref[1:1 + Ho, 1:1 + Wo, :] = y.reshape(Ho, Wo, cp)
    y = conv_relu(w2_ref, b2_ref)
    buf_ref[1:1 + Ho, 1:1 + Wo, :] = y.reshape(Ho, Wo, cp)
    y = conv_relu(w3_ref, b3_ref)
    o_ref[...] = y.reshape(1, Ho, Wo, cp).astype(o_ref.dtype)


# ----------------------------------------------------------------------------
# Wrapper
# ----------------------------------------------------------------------------
def _round_up(x, m):
    return ((x + m - 1) // m) * m


def _prep_w(w, cp):
    """(3,3,Cin,Cout) HWIO -> zero-padded (3,3,Cp,Cp) -> im2col (9*Cp, Cp)."""
    kh, kw, ci, co = w.shape
    wp = jnp.zeros((kh, kw, cp, cp), w.dtype).at[:, :, :ci, :co].set(w)
    return wp.reshape(kh * kw * cp, cp)


def _prep_b(b, cp):
    return jnp.zeros((1, cp), b.dtype).at[0, :b.shape[0]].set(b)


def down_conv_block_nhwc(x_nhwc, params, *, lane=128,
                         matmul_dtype=jnp.float32):
    """Fused AvgPool2d(2,2,ceil) -> 3x [conv3x3(pad=1)+ReLU]. NHWC in/out.

    matmul_dtype=jnp.bfloat16 uses bf16 MXU inputs (v6e/v7x); elementwise
    work stays in f32 either way.
    """
    N, H, W, Cin = x_nhwc.shape
    Cout = params["w1"].shape[-1]
    Ho, Wo = -(-H // 2), -(-W // 2)               # ceil_mode output size
    Cp = _round_up(max(Cin, Cout), lane)          # lane-dense channel width

    w1, b1 = _prep_w(params["w1"], Cp), _prep_b(params["b1"], Cp)
    w2, b2 = _prep_w(params["w2"], Cp), _prep_b(params["b2"], Cp)
    w3, b3 = _prep_w(params["w3"], Cp), _prep_b(params["b3"], Cp)

    kernel = functools.partial(
        _down_conv_block_kernel, H=H, W=W, Ho=Ho, Wo=Wo, cin=Cin, cp=Cp,
        matmul_dtype=matmul_dtype)

    itemsize = jnp.dtype(x_nhwc.dtype).itemsize
    flops = N * (3 * 2 * Ho * Wo * (9 * Cp) * Cp + H * W * Cin)
    bytes_accessed = (N * H * W * Cin * itemsize
                      + 3 * (9 * Cp * Cp + Cp) * 4
                      + N * Ho * Wo * Cp * itemsize)

    w_spec = pl.BlockSpec((9 * Cp, Cp), lambda n: (0, 0))
    b_spec = pl.BlockSpec((1, Cp), lambda n: (0, 0))

    out_p = pl.pallas_call(
        kernel,
        out_shape=jax.ShapeDtypeStruct((N, Ho, Wo, Cp), x_nhwc.dtype),
        grid=(N,),
        in_specs=[
            pl.BlockSpec((1, H, W, Cin), lambda n: (n, 0, 0, 0)),
            w_spec, b_spec, w_spec, b_spec, w_spec, b_spec,
        ],
        out_specs=pl.BlockSpec((1, Ho, Wo, Cp), lambda n: (n, 0, 0, 0)),
        scratch_shapes=[pltpu.VMEM((Ho + 2, Wo + 2, Cp), jnp.float32)],
        compiler_params=pltpu.CompilerParams(
            dimension_semantics=("parallel",),
            vmem_limit_bytes=32 * 1024 * 1024),
        cost_estimate=pl.CostEstimate(
            flops=flops, transcendentals=0, bytes_accessed=bytes_accessed),
    )(x_nhwc, w1, b1, w2, b2, w3, b3)

    return out_p[..., :Cout]                      # drop the lane padding


@jax.jit
def down_conv_block(x_nchw, params):
    # NCHW (PyTorch convention) -> NHWC for the TPU kernel and back.
    x = jnp.transpose(x_nchw, (0, 2, 3, 1))
    y = down_conv_block_nhwc(x, params)
    return jnp.transpose(y, (0, 3, 1, 2))


# ----------------------------------------------------------------------------
# Params + pure-JAX reference (for a correctness check)
# ----------------------------------------------------------------------------
def make_params(key, input_dim, output_dim, dtype=jnp.float32):
    ks = jax.random.split(key, 6)
    s1 = 1.0 / np.sqrt(9 * input_dim)
    s2 = 1.0 / np.sqrt(9 * output_dim)
    return {
        "w1": jax.random.normal(ks[0], (3, 3, input_dim, output_dim), dtype) * s1,
        "b1": jax.random.normal(ks[1], (output_dim,), dtype) * 0.1,
        "w2": jax.random.normal(ks[2], (3, 3, output_dim, output_dim), dtype) * s2,
        "b2": jax.random.normal(ks[3], (output_dim,), dtype) * 0.1,
        "w3": jax.random.normal(ks[4], (3, 3, output_dim, output_dim), dtype) * s2,
        "b3": jax.random.normal(ks[5], (output_dim,), dtype) * 0.1,
    }


def down_conv_block_ref(x_nchw, params):
    x = jnp.transpose(x_nchw, (0, 2, 3, 1))       # NHWC
    N, H, W, C = x.shape
    Ho, Wo = -(-H // 2), -(-W // 2)
    xp = jnp.pad(x, ((0, 0), (0, 2 * Ho - H), (0, 2 * Wo - W), (0, 0)))
    s = xp.reshape(N, Ho, 2, Wo, 2, C).sum(axis=(2, 4))
    rc = jnp.where(jnp.arange(Ho) * 2 + 1 < H, 2.0, 1.0)
    cc = jnp.where(jnp.arange(Wo) * 2 + 1 < W, 2.0, 1.0)
    x = s / (rc[None, :, None, None] * cc[None, None, :, None])

    def conv(x, w, b):
        y = jax.lax.conv_general_dilated(
            x, w, window_strides=(1, 1), padding="SAME",
            dimension_numbers=("NHWC", "HWIO", "NHWC"),
            precision=jax.lax.Precision.HIGHEST)
        return jnp.maximum(y + b, 0.0)

    x = conv(x, params["w1"], params["b1"])
    x = conv(x, params["w2"], params["b2"])
    x = conv(x, params["w3"], params["b3"])
    return jnp.transpose(x, (0, 3, 1, 2))


if __name__ == "__main__":
    key = jax.random.PRNGKey(0)
    kx, kp = jax.random.split(key)

    N, Cin, Hin, Win = 2, 4, 16, 16               # NCHW, matches nn.Conv2d
    Cout = 8

    x = jax.random.normal(kx, (N, Cin, Hin, Win), jnp.float32)
    params = make_params(kp, Cin, Cout)

    out = jax.block_until_ready(down_conv_block(x, params))
    ref = jax.block_until_ready(down_conv_block_ref(x, params))

    assert out.shape == (N, Cout, Hin // 2, Win // 2), out.shape
    assert bool(jnp.all(out >= 0.0))              # final ReLU
    np.testing.assert_allclose(np.asarray(out), np.asarray(ref),
                               rtol=2e-2, atol=2e-2)
    print("KERNEL_OK")
</pallas_src>

<mosaic_0001>
module attributes {stable_mosaic.version = 11 : i64} {
  func.func @_down_conv_block_kernel(%arg0: i32, %arg1: memref<1x16x16x4xf32, #tpu.memory_space<vmem>>, %arg2: memref<1152x128xf32, #tpu.memory_space<vmem>>, %arg3: memref<1x128xf32, #tpu.memory_space<vmem>>, %arg4: memref<1152x128xf32, #tpu.memory_space<vmem>>, %arg5: memref<1x128xf32, #tpu.memory_space<vmem>>, %arg6: memref<1152x128xf32, #tpu.memory_space<vmem>>, %arg7: memref<1x128xf32, #tpu.memory_space<vmem>>, %arg8: memref<1x8x8x128xf32, #tpu.memory_space<vmem>>, %arg9: memref<10x10x128xf32, #tpu.memory_space<vmem>>) attributes {dimension_semantics = [#tpu.dimension_semantics<parallel>], iteration_bounds = array<i64: 2>, scalar_prefetch = 0 : i64, scratch_operands = 1 : i64, tpu.core_type = #tpu.core_type<tc>, window_params = [{transform_indices = @transform_0, window_bounds = array<i64: 1, 16, 16, 4>}, {pipeline_mode = #tpu.pipeline_mode<synchronous>, transform_indices = @transform_1, window_bounds = array<i64: 1152, 128>}, {pipeline_mode = #tpu.pipeline_mode<synchronous>, transform_indices = @transform_2, window_bounds = array<i64: 1, 128>}, {pipeline_mode = #tpu.pipeline_mode<synchronous>, transform_indices = @transform_3, window_bounds = array<i64: 1152, 128>}, {pipeline_mode = #tpu.pipeline_mode<synchronous>, transform_indices = @transform_4, window_bounds = array<i64: 1, 128>}, {pipeline_mode = #tpu.pipeline_mode<synchronous>, transform_indices = @transform_5, window_bounds = array<i64: 1152, 128>}, {pipeline_mode = #tpu.pipeline_mode<synchronous>, transform_indices = @transform_6, window_bounds = array<i64: 1, 128>}, {transform_indices = @transform_7, window_bounds = array<i64: 1, 8, 8, 128>}]} {
    %cst = arith.constant 0.000000e+00 : f32
    %0 = vector.broadcast %cst : f32 to vector<10x10x128xf32>
    %c0 = arith.constant 0 : index
    %c0_0 = arith.constant 0 : index
    %c0_1 = arith.constant 0 : index
    %1 = vector.load %arg9[%c0, %c0_0, %c0_1] : memref<10x10x128xf32, #tpu.memory_space<vmem>>, vector<10x10x128xf32>
    tpu.vector_store %arg9[%c0, %c0_0, %c0_1], %0 {strides = array<i32>} : memref<10x10x128xf32, #tpu.memory_space<vmem>>, vector<10x10x128xf32>,
    %c0_2 = arith.constant 0 : index
    %c0_3 = arith.constant 0 : index
    %c0_4 = arith.constant 0 : index
    %c0_5 = arith.constant 0 : index
    %2 = vector.load %arg1[%c0_2, %c0_3, %c0_4, %c0_5] : memref<1x16x16x4xf32, #tpu.memory_space<vmem>>, vector<1x16x16x4xf32>
    %3 = vector.shape_cast %2 : vector<1x16x16x4xf32> to vector<16x16x4xf32>
    %4 = vector.shape_cast %3 : vector<16x16x4xf32> to vector<8x2x8x2x4xf32>
    %cst_6 = arith.constant dense<0.000000e+00> : vector<8x8x4xf32>
    %5 = vector.multi_reduction <add>, %4, %cst_6 [1, 3] : vector<8x2x8x2x4xf32> to vector<8x8x4xf32>
    %cst_7 = arith.constant 2.500000e-01 : f32
    %6 = vector.broadcast %cst_7 : f32 to vector<8x8x4xf32>
    %7 = arith.mulf %5, %6 : vector<8x8x4xf32>
    %cst_8 = arith.constant 0.000000e+00 : f32
    %8 = vector.broadcast %cst_8 : f32 to vector<8x8x124xf32>
    %9 = tpu.concatenate %7, %8 in 2 : vector<8x8x4xf32>, vector<8x8x124xf32> -> vector<8x8x128xf32>
    %c1 = arith.constant 1 : index
    %c1_9 = arith.constant 1 : index
    %c0_10 = arith.constant 0 : index
    %10 = vector.load %arg9[%c1, %c1_9, %c0_10] : memref<10x10x128xf32, #tpu.memory_space<vmem>>, vector<8x8x128xf32>
    tpu.vector_store %arg9[%c1, %c1_9, %c0_10], %9 {strides = array<i32>} : memref<10x10x128xf32, #tpu.memory_space<vmem>>, vector<8x8x128xf32>,
    %c0_11 = arith.constant 0 : index
    %c0_12 = arith.constant 0 : index
    %c0_13 = arith.constant 0 : index
    %11 = vector.load %arg9[%c0_11, %c0_12, %c0_13] : memref<10x10x128xf32, #tpu.memory_space<vmem>>, vector<8x8x128xf32>
    %12 = vector.shape_cast %11 : vector<8x8x128xf32> to vector<64x128xf32>
    %c0_14 = arith.constant 0 : index
    %c1_15 = arith.constant 1 : index
    %c0_16 = arith.constant 0 : index
    %13 = vector.load %arg9[%c0_14, %c1_15, %c0_16] : memref<10x10x128xf32, #tpu.memory_space<vmem>>, vector<8x8x128xf32>
    %14 = vector.shape_cast %13 : vector<8x8x128xf32> to vector<64x128xf32>
    %c0_17 = arith.constant 0 : index
    %c2 = arith.constant 2 : index
    %c0_18 = arith.constant 0 : index
    %15 = vector.load %arg9[%c0_17, %c2, %c0_18] : memref<10x10x128xf32, #tpu.memory_space<vmem>>, vector<8x8x128xf32>
    %16 = vector.shape_cast %15 : vector<8x8x128xf32> to vector<64x128xf32>
    %c1_19 = arith.constant 1 : index
    %c0_20 = arith.constant 0 : index
    %c0_21 = arith.constant 0 : index
    %17 = vector.load %arg9[%c1_19, %c0_20, %c0_21] : memref<10x10x128xf32, #tpu.memory_space<vmem>>, vector<8x8x128xf32>
    %18 = vector.shape_cast %17 : vector<8x8x128xf32> to vector<64x128xf32>
    %c1_22 = arith.constant 1 : index
    %c1_23 = arith.constant 1 : index
    %c0_24 = arith.constant 0 : index
    %19 = vector.load %arg9[%c1_22, %c1_23, %c0_24] : memref<10x10x128xf32, #tpu.memory_space<vmem>>, vector<8x8x128xf32>
    %20 = vector.shape_cast %19 : vector<8x8x128xf32> to vector<64x128xf32>
    %c1_25 = arith.constant 1 : index
    %c2_26 = arith.constant 2 : index
    %c0_27 = arith.constant 0 : index
    %21 = vector.load %arg9[%c1_25, %c2_26, %c0_27] : memref<10x10x128xf32, #tpu.memory_space<vmem>>, vector<8x8x128xf32>
    %22 = vector.shape_cast %21 : vector<8x8x128xf32> to vector<64x128xf32>
    %c2_28 = arith.constant 2 : index
    %c0_29 = arith.constant 0 : index
    %c0_30 = arith.constant 0 : index
    %23 = vector.load %arg9[%c2_28, %c0_29, %c0_30] : memref<10x10x128xf32, #tpu.memory_space<vmem>>, vector<8x8x128xf32>
    %24 = vector.shape_cast %23 : vector<8x8x128xf32> to vector<64x128xf32>
    %c2_31 = arith.constant 2 : index
    %c1_32 = arith.constant 1 : index
    %c0_33 = arith.constant 0 : index
    %25 = vector.load %arg9[%c2_31, %c1_32, %c0_33] : memref<10x10x128xf32, #tpu.memory_space<vmem>>, vector<8x8x128xf32>
    %26 = vector.shape_cast %25 : vector<8x8x128xf32> to vector<64x128xf32>
    %c2_34 = arith.constant 2 : index
    %c2_35 = arith.constant 2 : index
    %c0_36 = arith.constant 0 : index
    %27 = vector.load %arg9[%c2_34, %c2_35, %c0_36] : memref<10x10x128xf32, #tpu.memory_space<vmem>>, vector<8x8x128xf32>
    %28 = vector.shape_cast %27 : vector<8x8x128xf32> to vector<64x128xf32>
    %29 = tpu.concatenate %12, %14, %16, %18, %20, %22, %24, %26, %28 in 1 : vector<64x128xf32>, vector<64x128xf32>, vector<64x128xf32>, vector<64x128xf32>, vector<64x128xf32>, vector<64x128xf32>, vector<64x128xf32>, vector<64x128xf32>, vector<64x128xf32> -> vector<64x1152xf32>
    %c0_37 = arith.constant 0 : index
    %c0_38 = arith.constant 0 : index
    %30 = vector.load %arg2[%c0_37, %c0_38] : memref<1152x128xf32, #tpu.memory_space<vmem>>, vector<1152x128xf32>
    %cst_39 = arith.constant dense<0.000000e+00> : vector<64x128xf32>
    %31 = tpu.matmul %29, %30, %cst_39 {dimension_numbers = #tpu.dot_dimension_numbers<[1], [0], [0], [1], [0, 0, 1, 1], [], []>} : vector<64x1152xf32>, vector<1152x128xf32>, vector<64x128xf32> -> vector<64x128xf32>
    %c0_40 = arith.constant 0 : index
    %c0_41 = arith.constant 0 : index
    %32 = vector.load %arg3[%c0_40, %c0_41] : memref<1x128xf32, #tpu.memory_space<vmem>>, vector<1x128xf32>
    %33 = vector.broadcast %32 : vector<1x128xf32> to vector<64x128xf32>
    %34 = arith.addf %31, %33 : vector<64x128xf32>
    %cst_42 = arith.constant 0.000000e+00 : f32
    %35 = vector.broadcast %cst_42 : f32 to vector<64x128xf32>
    %36 = arith.maximumf %34, %35 : vector<64x128xf32>
    %37 = vector.shape_cast %36 : vector<64x128xf32> to vector<8x8x128xf32>
    %c1_43 = arith.constant 1 : index
    %c1_44 = arith.constant 1 : index
    %c0_45 = arith.constant 0 : index
    %38 = vector.load %arg9[%c1_43, %c1_44, %c0_45] : memref<10x10x128xf32, #tpu.memory_space<vmem>>, vector<8x8x128xf32>
    tpu.vector_store %arg9[%c1_43, %c1_44, %c0_45], %37 {strides = array<i32>} : memref<10x10x128xf32, #tpu.memory_space<vmem>>, vector<8x8x128xf32>,
    %c0_46 = arith.constant 0 : index
    %c0_47 = arith.constant 0 : index
    %c0_48 = arith.constant 0 : index
    %39 = vector.load %arg9[%c0_46, %c0_47, %c0_48] : memref<10x10x128xf32, #tpu.memory_space<vmem>>, vector<8x8x128xf32>
    %40 = vector.shape_cast %39 : vector<8x8x128xf32> to vector<64x128xf32>
    %c0_49 = arith.constant 0 : index
    %c1_50 = arith.constant 1 : index
    %c0_51 = arith.constant 0 : index
    %41 = vector.load %arg9[%c0_49, %c1_50, %c0_51] : memref<10x10x128xf32, #tpu.memory_space<vmem>>, vector<8x8x128xf32>
    %42 = vector.shape_cast %41 : vector<8x8x128xf32> to vector<64x128xf32>
    %c0_52 = arith.constant 0 : index
    %c2_53 = arith.constant 2 : index
    %c0_54 = arith.constant 0 : index
    %43 = vector.load %arg9[%c0_52, %c2_53, %c0_54] : memref<10x10x128xf32, #tpu.memory_space<vmem>>, vector<8x8x128xf32>
    %44 = vector.shape_cast %43 : vector<8x8x128xf32> to vector<64x128xf32>
    %c1_55 = arith.constant 1 : index
    %c0_56 = arith.constant 0 : index
    %c0_57 = arith.constant 0 : index
    %45 = vector.load %arg9[%c1_55, %c0_56, %c0_57] : memref<10x10x128xf32, #tpu.memory_space<vmem>>, vector<8x8x128xf32>
    %46 = vector.shape_cast %45 : vector<8x8x128xf32> to vector<64x128xf32>
    %c1_58 = arith.constant 1 : index
    %c1_59 = arith.constant 1 : index
    %c0_60 = arith.constant 0 : index
    %47 = vector.load %arg9[%c1_58, %c1_59, %c0_60] : memref<10x10x128xf32, #tpu.memory_space<vmem>>, vector<8x8x128xf32>
    %48 = vector.shape_cast %47 : vector<8x8x128xf32> to vector<64x128xf32>
    %c1_61 = arith.constant 1 : index
    %c2_62 = arith.constant 2 : index
    %c0_63 = arith.constant 0 : index
    %49 = vector.load %arg9[%c1_61, %c2_62, %c0_63] : memref<10x10x128xf32, #tpu.memory_space<vmem>>, vector<8x8x128xf32>
    %50 = vector.shape_cast %49 : vector<8x8x128xf32> to vector<64x128xf32>
    %c2_64 = arith.constant 2 : index
    %c0_65 = arith.constant 0 : index
    %c0_66 = arith.constant 0 : index
    %51 = vector.load %arg9[%c2_64, %c0_65, %c0_66] : memref<10x10x128xf32, #tpu.memory_space<vmem>>, vector<8x8x128xf32>
    %52 = vector.shape_cast %51 : vector<8x8x128xf32> to vector<64x128xf32>
    %c2_67 = arith.constant 2 : index
    %c1_68 = arith.constant 1 : index
    %c0_69 = arith.constant 0 : index
    %53 = vector.load %arg9[%c2_67, %c1_68, %c0_69] : memref<10x10x128xf32, #tpu.memory_space<vmem>>, vector<8x8x128xf32>
    %54 = vector.shape_cast %53 : vector<8x8x128xf32> to vector<64x128xf32>
    %c2_70 = arith.constant 2 : index
    %c2_71 = arith.constant 2 : index
    %c0_72 = arith.constant 0 : index
    %55 = vector.load %arg9[%c2_70, %c2_71, %c0_72] : memref<10x10x128xf32, #tpu.memory_space<vmem>>, vector<8x8x128xf32>
    %56 = vector.shape_cast %55 : vector<8x8x128xf32> to vector<64x128xf32>
    %57 = tpu.concatenate %40, %42, %44, %46, %48, %50, %52, %54, %56 in 1 : vector<64x128xf32>, vector<64x128xf32>, vector<64x128xf32>, vector<64x128xf32>, vector<64x128xf32>, vector<64x128xf32>, vector<64x128xf32>, vector<64x128xf32>, vector<64x128xf32> -> vector<64x1152xf32>
    %c0_73 = arith.constant 0 : index
    %c0_74 = arith.constant 0 : index
    %58 = vector.load %arg4[%c0_73, %c0_74] : memref<1152x128xf32, #tpu.memory_space<vmem>>, vector<1152x128xf32>
    %cst_75 = arith.constant dense<0.000000e+00> : vector<64x128xf32>
    %59 = tpu.matmul %57, %58, %cst_75 {dimension_numbers = #tpu.dot_dimension_numbers<[1], [0], [0], [1], [0, 0, 1, 1], [], []>} : vector<64x1152xf32>, vector<1152x128xf32>, vector<64x128xf32> -> vector<64x128xf32>
    %c0_76 = arith.constant 0 : index
    %c0_77 = arith.constant 0 : index
    %60 = vector.load %arg5[%c0_76, %c0_77] : memref<1x128xf32, #tpu.memory_space<vmem>>, vector<1x128xf32>
    %61 = vector.broadcast %60 : vector<1x128xf32> to vector<64x128xf32>
    %62 = arith.addf %59, %61 : vector<64x128xf32>
    %cst_78 = arith.constant 0.000000e+00 : f32
    %63 = vector.broadcast %cst_78 : f32 to vector<64x128xf32>
    %64 = arith.maximumf %62, %63 : vector<64x128xf32>
    %65 = vector.shape_cast %64 : vector<64x128xf32> to vector<8x8x128xf32>
    %c1_79 = arith.constant 1 : index
    %c1_80 = arith.constant 1 : index
    %c0_81 = arith.constant 0 : index
    %66 = vector.load %arg9[%c1_79, %c1_80, %c0_81] : memref<10x10x128xf32, #tpu.memory_space<vmem>>, vector<8x8x128xf32>
    tpu.vector_store %arg9[%c1_79, %c1_80, %c0_81], %65 {strides = array<i32>} : memref<10x10x128xf32, #tpu.memory_space<vmem>>, vector<8x8x128xf32>,
    %c0_82 = arith.constant 0 : index
    %c0_83 = arith.constant 0 : index
    %c0_84 = arith.constant 0 : index
    %67 = vector.load %arg9[%c0_82, %c0_83, %c0_84] : memref<10x10x128xf32, #tpu.memory_space<vmem>>, vector<8x8x128xf32>
    %68 = vector.shape_cast %67 : vector<8x8x128xf32> to vector<64x128xf32>
    %c0_85 = arith.constant 0 : index
    %c1_86 = arith.constant 1 : index
    %c0_87 = arith.constant 0 : index
    %69 = vector.load %arg9[%c0_85, %c1_86, %c0_87] : memref<10x10x128xf32, #tpu.memory_space<vmem>>, vector<8x8x128xf32>
    %70 = vector.shape_cast %69 : vector<8x8x128xf32> to vector<64x128xf32>
    %c0_88 = arith.constant 0 : index
    %c2_89 = arith.constant 2 : index
    %c0_90 = arith.constant 0 : index
    %71 = vector.load %arg9[%c0_88, %c2_89, %c0_90] : memref<10x10x128xf32, #tpu.memory_space<vmem>>, vector<8x8x128xf32>
    %72 = vector.shape_cast %71 : vector<8x8x128xf32> to vector<64x128xf32>
    %c1_91 = arith.constant 1 : index
    %c0_92 = arith.constant 0 : index
    %c0_93 = arith.constant 0 : index
    %73 = vector.load %arg9[%c1_91, %c0_92, %c0_93] : memref<10x10x128xf32, #tpu.memory_space<vmem>>, vector<8x8x128xf32>
    %74 = vector.shape_cast %73 : vector<8x8x128xf32> to vector<64x128xf32>
    %c1_94 = arith.constant 1 : index
    %c1_95 = arith.constant 1 : index
    %c0_96 = arith.constant 0 : index
    %75 = vector.load %arg9[%c1_94, %c1_95, %c0_96] : memref<10x10x128xf32, #tpu.memory_space<vmem>>, vector<8x8x128xf32>
    %76 = vector.shape_cast %75 : vector<8x8x128xf32> to vector<64x128xf32>
    %c1_97 = arith.constant 1 : index
    %c2_98 = arith.constant 2 : index
    %c0_99 = arith.constant 0 : index
    %77 = vector.load %arg9[%c1_97, %c2_98, %c0_99] : memref<10x10x128xf32, #tpu.memory_space<vmem>>, vector<8x8x128xf32>
    %78 = vector.shape_cast %77 : vector<8x8x128xf32> to vector<64x128xf32>
    %c2_100 = arith.constant 2 : index
    %c0_101 = arith.constant 0 : index
    %c0_102 = arith.constant 0 : index
    %79 = vector.load %arg9[%c2_100, %c0_101, %c0_102] : memref<10x10x128xf32, #tpu.memory_space<vmem>>, vector<8x8x128xf32>
    %80 = vector.shape_cast %79 : vector<8x8x128xf32> to vector<64x128xf32>
    %c2_103 = arith.constant 2 : index
    %c1_104 = arith.constant 1 : index
    %c0_105 = arith.constant 0 : index
    %81 = vector.load %arg9[%c2_103, %c1_104, %c0_105] : memref<10x10x128xf32, #tpu.memory_space<vmem>>, vector<8x8x128xf32>
    %82 = vector.shape_cast %81 : vector<8x8x128xf32> to vector<64x128xf32>
    %c2_106 = arith.constant 2 : index
    %c2_107 = arith.constant 2 : index
    %c0_108 = arith.constant 0 : index
    %83 = vector.load %arg9[%c2_106, %c2_107, %c0_108] : memref<10x10x128xf32, #tpu.memory_space<vmem>>, vector<8x8x128xf32>
    %84 = vector.shape_cast %83 : vector<8x8x128xf32> to vector<64x128xf32>
    %85 = tpu.concatenate %68, %70, %72, %74, %76, %78, %80, %82, %84 in 1 : vector<64x128xf32>, vector<64x128xf32>, vector<64x128xf32>, vector<64x128xf32>, vector<64x128xf32>, vector<64x128xf32>, vector<64x128xf32>, vector<64x128xf32>, vector<64x128xf32> -> vector<64x1152xf32>
    %c0_109 = arith.constant 0 : index
    %c0_110 = arith.constant 0 : index
    %86 = vector.load %arg6[%c0_109, %c0_110] : memref<1152x128xf32, #tpu.memory_space<vmem>>, vector<1152x128xf32>
    %cst_111 = arith.constant dense<0.000000e+00> : vector<64x128xf32>
    %87 = tpu.matmul %85, %86, %cst_111 {dimension_numbers = #tpu.dot_dimension_numbers<[1], [0], [0], [1], [0, 0, 1, 1], [], []>} : vector<64x1152xf32>, vector<1152x128xf32>, vector<64x128xf32> -> vector<64x128xf32>
    %c0_112 = arith.constant 0 : index
    %c0_113 = arith.constant 0 : index
    %88 = vector.load %arg7[%c0_112, %c0_113] : memref<1x128xf32, #tpu.memory_space<vmem>>, vector<1x128xf32>
    %89 = vector.broadcast %88 : vector<1x128xf32> to vector<64x128xf32>
    %90 = arith.addf %87, %89 : vector<64x128xf32>
    %cst_114 = arith.constant 0.000000e+00 : f32
    %91 = vector.broadcast %cst_114 : f32 to vector<64x128xf32>
    %92 = arith.maximumf %90, %91 : vector<64x128xf32>
    %93 = vector.shape_cast %92 : vector<64x128xf32> to vector<1x8x8x128xf32>
    %c0_115 = arith.constant 0 : index
    %c0_116 = arith.constant 0 : index
    %c0_117 = arith.constant 0 : index
    %c0_118 = arith.constant 0 : index
    %94 = vector.load %arg8[%c0_115, %c0_116, %c0_117, %c0_118] : memref<1x8x8x128xf32, #tpu.memory_space<vmem>>, vector<1x8x8x128xf32>
    tpu.vector_store %arg8[%c0_115, %c0_116, %c0_117, %c0_118], %93 {strides = array<i32>} : memref<1x8x8x128xf32, #tpu.memory_space<vmem>>, vector<1x8x8x128xf32>,
    return
  }
  func.func @transform_0(%arg0: i32) -> (i32, i32, i32, i32) {
    %c0_i32 = arith.constant 0 : i32
    %c0_i32_0 = arith.constant 0 : i32
    %c0_i32_1 = arith.constant 0 : i32
    %c0_i32_2 = arith.constant 0 : i32
    return %arg0, %c0_i32, %c0_i32_0, %c0_i32_1 : i32, i32, i32, i32
  }
  func.func @transform_1(%arg0: i32) -> (i32, i32) {
    %c0_i32 = arith.constant 0 : i32
    %c0_i32_0 = arith.constant 0 : i32
    %c0_i32_1 = arith.constant 0 : i32
    return %c0_i32, %c0_i32_0 : i32, i32
  }
  func.func @transform_2(%arg0: i32) -> (i32, i32) {
    %c0_i32 = arith.constant 0 : i32
    %c0_i32_0 = arith.constant 0 : i32
    %c0_i32_1 = arith.constant 0 : i32
    return %c0_i32, %c0_i32_0 : i32, i32
  }
  func.func @transform_3(%arg0: i32) -> (i32, i32) {
    %c0_i32 = arith.constant 0 : i32
    %c0_i32_0 = arith.constant 0 : i32
    %c0_i32_1 = arith.constant 0 : i32
    return %c0_i32, %c0_i32_0 : i32, i32
  }
  func.func @transform_4(%arg0: i32) -> (i32, i32) {
    %c0_i32 = arith.constant 0 : i32
    %c0_i32_0 = arith.constant 0 : i32
    %c0_i32_1 = arith.constant 0 : i32
    return %c0_i32, %c0_i32_0 : i32, i32
  }
  func.func @transform_5(%arg0: i32) -> (i32, i32) {
    %c0_i32 = arith.constant 0 : i32
    %c0_i32_0 = arith.constant 0 : i32
    %c0_i32_1 = arith.constant 0 : i32
    return %c0_i32, %c0_i32_0 : i32, i32
  }
  func.func @transform_6(%arg0: i32) -> (i32, i32) {
    %c0_i32 = arith.constant 0 : i32
    %c0_i32_0 = arith.constant 0 : i32
    %c0_i32_1 = arith.constant 0 : i32
    return %c0_i32, %c0_i32_0 : i32, i32
  }
  func.func @transform_7(%arg0: i32) -> (i32, i32, i32, i32) {
    %c0_i32 = arith.constant 0 : i32
    %c0_i32_0 = arith.constant 0 : i32
    %c0_i32_1 = arith.constant 0 : i32
    %c0_i32_2 = arith.constant 0 : i32
    return %arg0, %c0_i32, %c0_i32_0, %c0_i32_1 : i32, i32, i32, i32
  }
}

</mosaic_0001>

<bundles_post_ra>
// kernel: down_conv_block.1
= control target key start
LH: loop header
LB: loop body
LE: loop exit
PB: predicated region body
PF: predicated region fallthrough
CT: control target
= control target key end

     0   :  { %s5675_s24 = smov 0   ;;  %s7761_s0 = inlined_call_operand.vmem [shape: f32[2,16,16,4], index: 0, kind: input, shape index: {}]   ;;  %s7762_s1 = inlined_call_operand.vmem [shape: f32[1152,128], index: 1, kind: input, shape index: {}]   ;;  %s7763_s2 = inlined_call_operand.vmem [shape: f32[1,128], index: 2, kind: input, shape index: {}]   ;;  %s7764_s3 = inlined_call_operand.vmem [shape: f32[1152,128], index: 3, kind: input, shape index: {}]   ;;  %s7765_s4 = inlined_call_operand.vmem [shape: f32[1,128], index: 4, kind: input, shape index: {}]   ;;  %s7766_s5 = inlined_call_operand.vmem [shape: f32[1152,128], index: 5, kind: input, shape index: {}]   ;;  %s7767_s6 = inlined_call_operand.vmem [shape: f32[1,128], index: 6, kind: input, shape index: {}]   ;;  %s7768_s7 = inlined_call_operand.vmem [shape: f32[2,8,8,128], index: 7, kind: output, shape index: {}]  }
   0x1 LB: > { %s4177_s25 = sadd.s32 4294967295, %s5631_s24   ;;  %p4181_p0 = scmp.ge.s32.totalorder %s5631_s24, 1  ;;  %s5631_s24 = sphi %s5675_s24, %s17_s24  }
   0x2   : > { %p237_p1 = scmp.lt.s32.totalorder %s5631_s24, 3 }
   0x4   : > { %p238_p2 = pnand %p4181_p0, %p237_p1 }
   0x5   : > { %v1918_v0 = vld [vmem:[%s7762_s1 + $0x80] sm:$0xff] (!%p238_p2)  ;;  %v1919_v1 = vld [vmem:[%s7762_s1 + $0x88] sm:$0xff] (!%p238_p2)  ;;  %v1920_v5 = vld [vmem:[%s7762_s1 + $0x90] sm:$0xff] (!%p238_p2)  ;;  %v5633_v7 = vmov (!%p238_p2), 0.0   ;;  %p5789_p3 = scmp.lt.s32.totalorder (!%p238_p2), %s4177_s25, 1  ;;  %v367_v53 = vlaneseq (!%p238_p2)  ;;  %vm1035_vm0 = vcmask (!%p238_p2), 25600  }
   0x6   : > { %241 = sbr.rel (%p238_p2) target bundleno = 1079 (0x437), region = 48  ;;  %v1902_v2 = vld [vmem:[%s7762_s1] sm:$0xff] (!%p238_p2)  ;;  %v5069_v3 = vpack.c.bf16 (!%p238_p2), %v1919_v1, %v1918_v0  ;;  %v1903_v4 = vld [vmem:[%s7762_s1 + $0x8] sm:$0xff] (!%p238_p2)  ;;  %v1921_v6 = vld [vmem:[%s7762_s1 + $0x98] sm:$0xff] (!%p238_p2)  ;;  %279 = vst [vmem:[#allocation2] sm:$0xff] (!%p238_p2), %v5633_v7  ;;  %vm1740_vm1 = vcmask (!%p238_p2), 1041409  }
   0x7   : > { %280 = vst [vmem:[#allocation2 + $0x8] sm:$0x3] (!%p238_p2), %v5633_v7  ;;  %281 = vst [vmem:[#allocation2 + $0x10] sm:$0xff] (!%p238_p2), %v5633_v7  ;;  %v5071_v8 = vpack.c.bf16 (!%p238_p2), %v1903_v4, %v1902_v2  ;;  %v5073_v9 = vpack.c.bf16 (!%p238_p2), %v1921_v6, %v1920_v5  ;;  %v1904_v10 = vld [vmem:[%s7762_s1 + $0x10] sm:$0xff] (!%p238_p2)  ;;  %v1905_v11 = vld [vmem:[%s7762_s1 + $0x18] sm:$0xff] (!%p238_p2)  ;;  %vm1742_vm2 = vcmask (!%p238_p2), 1042434  }
   0x8   : > { %282 = vst [vmem:[#allocation2 + $0x18] sm:$0x3] (!%p238_p2), %v5633_v7  ;;  %283 = vst [vmem:[#allocation2 + $0x20] sm:$0xff] (!%p238_p2), %v5633_v7  ;;  %v1950_v12 = vld [vmem:[%s7762_s1 + $0x180] sm:$0xff] (!%p238_p2)  ;;  %5070 = vmatprep.subr.bf16.mxu0 (!%p238_p2), %v5069_v3  ;;  %v1951_v13 = vld [vmem:[%s7762_s1 + $0x188] sm:$0xff] (!%p238_p2)  ;;  %v5075_v16 = vpack.c.bf16 (!%p238_p2), %v1905_v11, %v1904_v10  ;;  %vm1744_vm3 = vcmask (!%p238_p2), 1043459  }
   0x9   : > { %284 = vst [vmem:[#allocation2 + $0x28] sm:$0x3] (!%p238_p2), %v5633_v7  ;;  %285 = vst [vmem:[#allocation2 + $0x30] sm:$0xff] (!%p238_p2), %v5633_v7  ;;  %v1934_v14 = vld [vmem:[%s7762_s1 + $0x100] sm:$0xff] (!%p238_p2)  ;;  %v1935_v15 = vld [vmem:[%s7762_s1 + $0x108] sm:$0xff] (!%p238_p2)  ;;  %5072 = vmatpush3.bf16.msra.mxu0 (!%p238_p2), %v5071_v8  ;;  %v5101_v17 = vpack.c.bf16 (!%p238_p2), %v1951_v13, %v1950_v12  ;;  %v368_v12 = vshrl.u32 (!%p238_p2), %v367_v53, 7 }
   0xa   : > { %286 = vst [vmem:[#allocation2 + $0x38] sm:$0x3] (!%p238_p2), %v5633_v7  ;;  %287 = vst [vmem:[#allocation2 + $0x40] sm:$0xff] (!%p238_p2), %v5633_v7  ;;  %v5103_v18 = vpack.c.bf16 (!%p238_p2), %v1935_v15, %v1934_v14  ;;  %v1922_v19 = vld [vmem:[%s7762_s1 + $0xa0] sm:$0xff] (!%p238_p2)  ;;  %v1923_v20 = vld [vmem:[%s7762_s1 + $0xa8] sm:$0xff] (!%p238_p2)  ;;  %5074 = vmatprep.subr.bf16.mxu0 (!%p238_p2), %v5073_v9  ;;  %vm1746_vm4 = vcmask (!%p238_p2), 1044484  }
   0xb   : > { %288 = vst [vmem:[#allocation2 + $0x48] sm:$0x3] (!%p238_p2), %v5633_v7  ;;  %289 = vst [vmem:[#allocation2 + $0x50] sm:$0xff] (!%p238_p2), %v5633_v7  ;;  %v1906_v21 = vld [vmem:[%s7762_s1 + $0x20] sm:$0xff] (!%p238_p2)  ;;  %v5077_v22 = vpack.c.bf16 (!%p238_p2), %v1923_v20, %v1922_v19  ;;  %v1907_v23 = vld [vmem:[%s7762_s1 + $0x28] sm:$0xff] (!%p238_p2)  ;;  %5102 = vmatprep.subr.bf16.mxu1 (!%p238_p2), %v5101_v17  ;;  %vm1748_vm5 = vcmask (!%p238_p2), 1045509  }
   0xc   : > { %290 = vst [vmem:[#allocation2 + $0x58] sm:$0x3] (!%p238_p2), %v5633_v7  ;;  %291 = vst [vmem:[#allocation2 + $0x60] sm:$0xff] (!%p238_p2), %v5633_v7  ;;  %v1952_v24 = vld [vmem:[%s7762_s1 + $0x190] sm:$0xff] (!%p238_p2)  ;;  %v1953_v25 = vld [vmem:[%s7762_s1 + $0x198] sm:$0xff] (!%p238_p2)  ;;  %5104 = vmatpush3.bf16.msra.mxu1 (!%p238_p2), %v5103_v18  ;;  %v5079_v32 = vpack.c.bf16 (!%p238_p2), %v1907_v23, %v1906_v21  ;;  %vm1750_vm6 = vcmask (!%p238_p2), 1046534  }
   0xd   : > { %292 = vst [vmem:[#allocation2 + $0x68] sm:$0x3] %v5633_v7  ;;  %293 = vst [vmem:[#allocation2 + $0x70] sm:$0xff] %v5633_v7  ;;  %v5105_v26 = vpack.c.bf16 %v1953_v25, %v1952_v24  ;;  %v1936_v27 = vld [vmem:[%s7762_s1 + $0x110] sm:$0xff]  ;;  %v1937_v28 = vld [vmem:[%s7762_s1 + $0x118] sm:$0xff]  ;;  %5076 = vmatpush3.bf16.msra.mxu0 %v5075_v16  ;;  %s7771_s25 = smov (!%p5789_p3, %s4177_s25), 1 }
   0xe   : > { %294 = vst [vmem:[#allocation2 + $0x78] sm:$0x3] %v5633_v7  ;;  %295 = vst [vmem:[#allocation2 + $0x80] sm:$0xff] %v5633_v7  ;;  %v1924_v29 = vld [vmem:[%s7762_s1 + $0xb0] sm:$0xff]  ;;  %v5107_v30 = vpack.c.bf16 %v1937_v28, %v1936_v27  ;;  %v1925_v31 = vld [vmem:[%s7762_s1 + $0xb8] sm:$0xff]  ;;  %5078 = vmatprep.subr.bf16.mxu0 %v5077_v22  ;;  %s4191_s30 = sshll.u32 %s7771_s25, 8 }
   0xf   : > { %296 = vst [vmem:[#allocation2 + $0x88] sm:$0x3] %v5633_v7  ;;  %297 = vst [vmem:[#allocation2 + $0x90] sm:$0xff] %v5633_v7  ;;  %5106 = vmatprep.subr.bf16.mxu1 %v5105_v26  ;;  %v1954_v33 = vld [vmem:[%s7762_s1 + $0x1a0] sm:$0xff]  ;;  %v1955_v34 = vld [vmem:[%s7762_s1 + $0x1a8] sm:$0xff]  ;;  %v5081_v36 = vpack.c.bf16 %v1925_v31, %v1924_v29  ;;  %s5930_s28 = scalar_lea.vmem %s7761_s0, %s4191_s30  ;;  %vm1752_vm7 = vcmask 1047559  }
  0x10   : > { %298 = vst [vmem:[#allocation2 + $0x98] sm:$0x3] %v5633_v7  ;;  %v1938_v35 = vld [vmem:[%s7762_s1 + $0x120] sm:$0xff]  ;;  %v1908_v37 = vld [vmem:[%s7762_s1 + $0x30] sm:$0xff]  ;;  %v1909_v38 = vld [vmem:[%s7762_s1 + $0x38] sm:$0xff]  ;;  %v5109_v39 = vpack.c.bf16 %v1955_v34, %v1954_v33  ;;  %5108 = vmatpush3.bf16.msra.mxu1 %v5107_v30  ;;  %vm1811_vm8 = vcmask 31744  }
  0x11   : > { %v1939_v40 = vld [vmem:[%s7762_s1 + $0x128] sm:$0xff]  ;;  %v1926_v41 = vld [vmem:[%s7762_s1 + $0xc0] sm:$0xff]  ;;  %v1956_v43 = vld [vmem:[%s7762_s1 + $0x1b0] sm:$0xff]  ;;  %5080 = vmatpush3.bf16.msra.mxu0 %v5079_v32  ;;  %v5083_v46 = vpack.c.bf16 %v1909_v38, %v1908_v37  ;;  %v5634_v51 = vmov 1983009808   ;;  %s4192_s23 = sshll.u32 %s7771_s25, 6 }
  0x12   : > { %v1927_v42 = vld [vmem:[%s7762_s1 + $0xc8] sm:$0xff]  ;;  %v5111_v44 = vpack.c.bf16 %v1939_v40, %v1938_v35  ;;  %v1957_v45 = vld [vmem:[%s7762_s1 + $0x1b8] sm:$0xff]  ;;  %5110 = vmatprep.subr.bf16.mxu1 %v5109_v39  ;;  %v1910_v47 = vld [vmem:[%s7762_s1 + $0x40] sm:$0xff]  ;;  %v365_v52 = vunpack.c.l.s4 %v5634_v51  ;;  %5082 = vmatprep.subr.bf16.mxu0 %v5081_v36  ;;  %s278_s17 = scalar_lea.vmem %s7768_s7, %s4192_s23 }
  0x13   : > { %v5113_v48 = vpack.c.bf16 %v1957_v45, %v1956_v43  ;;  %v1940_v49 = vld [vmem:[%s7762_s1 + $0x130] sm:$0xff]  ;;  %v1941_v50 = vld [vmem:[%s7762_s1 + $0x138] sm:$0xff]  ;;  %v5085_v54 = vpack.c.bf16 %v1927_v42, %v1926_v41  ;;  %v1911_v55 = vld [vmem:[%s7762_s1 + $0x48] sm:$0xff] }
  0x14   : > { %v1958_v56 = vld [vmem:[%s7762_s1 + $0x1c0] sm:$0xff]  ;;  %v1959_v57 = vld [vmem:[%s7762_s1 + $0x1c8] sm:$0xff]  ;;  %v1928_v58 = vld [vmem:[%s7762_s1 + $0xd0] sm:$0xff]  ;;  %5112 = vmatpush3.bf16.msra.mxu1 %v5111_v44  ;;  %v5115_v60 = vpack.c.bf16 %v1941_v50, %v1940_v49  ;;  %v5087_v1 = vpack.c.bf16 %v1911_v55, %v1910_v47  ;;  %v366_v11 = vunpack.c.0.s8 %v365_v52 }
  0x15   : > { %v1929_v59 = vld [vmem:[%s7762_s1 + $0xd8] sm:$0xff]  ;;  %v5838_v61 = vld [vmem:[%s7762_s1 + $0x50] sm:$0xff]  ;;  %v1942_v63 = vld [vmem:[%s7762_s1 + $0x140] sm:$0xff]  ;;  %5084 = vmatpush3.bf16.msra.mxu0 %v5083_v46  ;;  %5114 = vmatprep.subr.bf16.mxu1 %v5113_v48  ;;  %v5117_v2 = vpack.c.bf16 %v1959_v57, %v1958_v56 }
  0x16   : > { %v1913_v62 = vld [vmem:[%s7762_s1 + $0x58] sm:$0xff]  ;;  %v1943_v0 = vld [vmem:[%s7762_s1 + $0x148] sm:$0xff]  ;;  %v1930_v3 = vld [vmem:[%s7762_s1 + $0xe0] sm:$0xff]  ;;  %5086 = vmatprep.subr.bf16.mxu0 %v5085_v54  ;;  %v5089_v13 = vpack.c.bf16 %v1929_v59, %v1928_v58  ;;  %v5932_v29 = vsub.s32 %v366_v11, %v368_v12 }
  0x17   : > { %v1931_v4 = vld [vmem:[%s7762_s1 + $0xe8] sm:$0xff]  ;;  %v5858_v5 = vld [vmem:[%s7762_s1 + $0x60] sm:$0xff]  ;;  %v1960_v8 = vld [vmem:[%s7762_s1 + $0x1d0] sm:$0xff]  ;;  %v5119_v20 = vpack.c.bf16 %v1943_v0, %v1942_v63  ;;  %v5091_v24 = vpack.c.bf16 %v1913_v62, %v5838_v61 }
  0x18   : > { %v5863_v6 = vld [vmem:[%s7762_s1 + $0x68] sm:$0xff]  ;;  %v1961_v9 = vld [vmem:[%s7762_s1 + $0x1d8] sm:$0xff]  ;;  %v5874_v10 = vld [vmem:[%s7762_s1 + $0x150] sm:$0xff]  ;;  %5116 = vmatpush3.bf16.msra.mxu1 %v5115_v60  ;;  %v5093_v30 = vpack.c.bf16 %v1931_v4, %v1930_v3 }
  0x19   : > { %v1945_v14 = vld [vmem:[%s7762_s1 + $0x158] sm:$0xff]  ;;  %v5882_v15 = vld [vmem:[%s7762_s1 + $0xf0] sm:$0xff]  ;;  %v1962_v19 = vld [vmem:[%s7762_s1 + $0x1e0] sm:$0xff]  ;;  %5088 = vmatpush3.bf16.msra.mxu0 %v5087_v1  ;;  %5118 = vmatprep.subr.bf16.mxu1 %v5117_v2  ;;  %v5121_v25 = vpack.c.bf16 %v1961_v9, %v1960_v8  ;;  %v5095_v31 = vpack.c.bf16 %v5863_v6, %v5858_v5 }
  0x1a   : > { %v5887_v16 = vld [vmem:[%s7762_s1 + $0xf8] sm:$0xff]  ;;  %v5893_v17 = vld [vmem:[%s7762_s1 + $0x70] sm:$0xff]  ;;  %v1963_v21 = vld [vmem:[%s7762_s1 + $0x1e8] sm:$0xff]  ;;  %5090 = vmatprep.subr.bf16.mxu0 %v5089_v13  ;;  %v5123_v32 = vpack.c.bf16 %v1945_v14, %v5874_v10 }
  0x1b   : > { %v5898_v18 = vld [vmem:[%s7762_s1 + $0x78] sm:$0xff]  ;;  %v5909_v22 = vld [vmem:[%s7762_s1 + $0x160] sm:$0xff]  ;;  %v5914_v23 = vld [vmem:[%s7762_s1 + $0x168] sm:$0xff]  ;;  %v5097_v36 = vpack.c.bf16 %v5887_v16, %v5882_v15  ;;  %v5125_v38 = vpack.c.bf16 %v1963_v21, %v1962_v19 }
  0x1c   : > { %v1837_v26 = vld [vmem:[#allocation2 + $0x1] sm:$0xff]  ;;  %v1964_v33 = vld [vmem:[%s7762_s1 + $0x1f0] sm:$0xff]  ;;  %v1965_v34 = vld [vmem:[%s7762_s1 + $0x1f8] sm:$0xff]  ;;  %v5099_v37 = vpack.c.bf16 %v5898_v18, %v5893_v17  ;;  %v5127_v39 = vpack.c.bf16 %v5914_v23, %v5909_v22  ;;  %5120 = vmatpush3.bf16.msra.mxu1 %v5119_v20 }
  0x1d   : > { %v5920_v27 = vld [vmem:[%s7762_s1 + $0x280] sm:$0xff]  ;;  %v5925_v28 = vld [vmem:[%s7762_s1 + $0x288] sm:$0xff]  ;;  %2117 = vmatprep.mubr.f32.mxu0 %v1837_v26  ;;  %v5962_v41 = vld [vmem:[%s7762_s1 + $0x170] sm:$0xff]  ;;  %v5129_v44 = vpack.c.bf16 %v1965_v34, %v1964_v33  ;;  %5092 = vmatpush3.bf16.msra.mxu0 %v5091_v24 }
  0x1e   : > { %v5946_v35 = vld [vmem:[%s7762_s1 + $0x200] sm:$0xff]  ;;  %v5957_v40 = vld [vmem:[%s7762_s1 + $0x208] sm:$0xff]  ;;  %v5967_v42 = vld [vmem:[%s7762_s1 + $0x178] sm:$0xff]  ;;  %v5133_v43 = vpack.c.bf16 %v5925_v28, %v5920_v27  ;;  %5122 = vmatprep.subr.bf16.mxu1 %v5121_v25  ;;  %5094 = vmatprep.subr.bf16.mxu0 %v5093_v30 }
  0x1f   : > { %v5135_v45 = vpack.c.bf16 %v5957_v40, %v5946_v35  ;;  %v5131_v46 = vpack.c.bf16 %v5967_v42, %v5962_v41  ;;  %v299_v47 = vld [vmem:[%s5930_s28] sm:$0xff]  ;;  %v300_v48 = vld [vmem:[%s5930_s28 + $0x8] sm:$0xff]  ;;  %v301_v49 = vld [vmem:[%s5930_s28 + $0x10] sm:$0xff] }
  0x20   : > { %v302_v50 = vld [vmem:[%s5930_s28 + $0x18] sm:$0xff]  ;;  %v363_v51 = vcombine.high %v299_v47, %v299_v47  ;;  %v370_v52 = vrot.slane %v299_v47, %v5932_v29  ;;  %v380_v53 = vcombine.high %v300_v48, %v300_v48  ;;  %v387_v54 = vrot.slane %v300_v48, %v5932_v29  ;;  %5124 = vmatpush3.bf16.msra.mxu1 %v5123_v32 }
  0x21   : > { %v397_v55 = vcombine.high %v301_v49, %v301_v49  ;;  %v404_v56 = vrot.slane %v301_v49, %v5932_v29  ;;  %v414_v57 = vcombine.high %v302_v50, %v302_v50  ;;  %v421_v61 = vrot.slane %v302_v50, %v5932_v29  ;;  %5096 = vmatpush3.bf16.msra.mxu0 %v5095_v31 }
  0x22   : > { %v377_v58 = vrot.slane %v363_v51, %v5932_v29  ;;  %v378_v59 = vcombine.high %v370_v52, %v370_v52  ;;  %v394_v60 = vrot.slane %v380_v53, %v5932_v29  ;;  %v395_v62 = vcombine.high %v387_v54, %v387_v54  ;;  %5126 = vmatprep.subr.bf16.mxu1 %v5125_v38 }
  0x23   : > { %v411_v63 = vrot.slane %v397_v55, %v5932_v29  ;;  %v412_v0 = vcombine.high %v404_v56, %v404_v56  ;;  %v428_v1 = vrot.slane %v414_v57, %v5932_v29  ;;  %v429_v4 = vcombine.high %v421_v61, %v421_v61  ;;  %5098 = vmatprep.subr.bf16.mxu0 %v5097_v36 }
  0x24   : > { %v379_v2 = vcombine.high %v377_v58, %v377_v58  ;;  %v396_v3 = vcombine.high %v394_v60, %v394_v60  ;;  %v1036_v5 = vsel %vm1035_vm0, %v370_v52, 0.0  ;;  %v1037_v9 = vsel %vm1035_vm0, %v404_v56, 0.0  ;;  %5128 = vmatpush3.bf16.msra.mxu1 %v5127_v39 }
  0x25   : > { %v413_v6 = vcombine.high %v411_v63, %v411_v63  ;;  %v430_v8 = vcombine.high %v428_v1, %v428_v1  ;;  %v1045_v10 = vsel %vm1035_vm0, %v378_v59, 0.0  ;;  %v1038_v11 = vadd.f32 %v1037_v9, %v1036_v5  ;;  %5100 = vmatpush3.bf16.msra.mxu0 %v5099_v37  ;;  %5130 = vmatprep.subr.bf16.mxu1 %v5129_v44 }
  0x26   : > { %v1046_v12 = vsel %vm1035_vm0, %v412_v0, 0.0  ;;  %v1054_v13 = vsel %vm1035_vm0, %v377_v58, 0.0  ;;  %v1055_v14 = vsel %vm1035_vm0, %v411_v63, 0.0  ;;  %v1063_v17 = vsel %vm1035_vm0, %v379_v2, 0.0  ;;  %5134 = vmatprep.subr.bf16.mxu0 %v5133_v43 }
  0x27   : > { %v1047_v15 = vadd.f32 %v1046_v12, %v1045_v10  ;;  %v1056_v16 = vadd.f32 %v1055_v14, %v1054_v13  ;;  %v1064_v18 = vsel %vm1035_vm0, %v413_v6, 0.0  ;;  %v1039_v19 = vrot.slane %v1038_v11, 4  ;;  %v1968_v10 = vld [vmem:[%s7762_s1 + $0x210] sm:$0xff] }
  0x28   : > { %v1065_v20 = vadd.f32 %v1064_v18, %v1063_v17  ;;  %v1072_v21 = vsel %vm1035_vm0, %v387_v54, 0.0  ;;  %v1073_v22 = vsel %vm1035_vm0, %v421_v61, 0.0  ;;  %v1081_v26 = vsel %vm1035_vm0, %v395_v62, 0.0  ;;  %2118 = vmatmul.mubr.f32.vlgmr.msra.gmra.mrb[0].mxu0 %v5633_v7  ;;  %5132 = vmatpush3.bf16.msra.mxu1 %v5131_v46  ;;  %v2015_v17 = vld [vmem:[%s7762_s1 + $0x388] sm:$0xff] }
  0x29   : > { %v1048_v23 = vrot.slane %v1047_v15, 4  ;;  %v1057_v24 = vrot.slane %v1056_v16, 4  ;;  %v1074_v25 = vadd.f32 %v1073_v22, %v1072_v21  ;;  %v1040_v27 = vadd.f32 %v1039_v19, %v1038_v11  ;;  %5136 = vmatpush3.bf16.msra.mxu0 %v5135_v45  ;;  %v1969_v11 = vld [vmem:[%s7762_s1 + $0x218] sm:$0xff]  ;;  %v6028_v22 = vld [vmem:[%s7762_s1 + $0x300] sm:$0xff] }
  0x2a   : > { %v1066_v28 = vrot.slane %v1065_v20, 4  ;;  %v1082_v30 = vsel %vm1035_vm0, %v429_v4, 0.0  ;;  %v1090_v31 = vsel %vm1035_vm0, %v394_v60, 0.0  ;;  %v1091_v39 = vsel %vm1035_vm0, %v428_v1, 0.0  ;;  %v1985_v4 = vld [vmem:[%s7762_s1 + $0x298] sm:$0xff] }
  0x2b   : > { %v1049_v32 = vadd.f32 %v1048_v23, %v1047_v15  ;;  %v1058_v33 = vadd.f32 %v1057_v24, %v1056_v16  ;;  %v1075_v34 = vrot.slane %v1074_v25, 4  ;;  %v1083_v36 = vadd.f32 %v1082_v30, %v1081_v26  ;;  %v2014_v16 = vld [vmem:[%s7762_s1 + $0x380] sm:$0xff]  ;;  %v6033_v23 = vld [vmem:[%s7762_s1 + $0x308] sm:$0xff] }
  0x2c   : > { %v1041_v37 = vrot.slane %v1040_v27, 2  ;;  %v1067_v38 = vadd.f32 %v1066_v28, %v1065_v20  ;;  %v1099_v41 = vsel %vm1035_vm0, %v396_v3, 0.0  ;;  %v1092_v48 = vadd.f32 %v1091_v39, %v1090_v31  ;;  %v1984_v3 = vld [vmem:[%s7762_s1 + $0x290] sm:$0xff]  ;;  %v303_v24 = vld [vmem:[%s5930_s28 + $0x20] sm:$0xff] }
  0x2d   : > { %v1050_v42 = vrot.slane %v1049_v32, 2  ;;  %v1059_v43 = vrot.slane %v1058_v33, 2  ;;  %v1076_v44 = vadd.f32 %v1075_v34, %v1074_v25  ;;  %v1084_v7 = vrot.slane %v1083_v36, 4  ;;  %v304_v34 = vld [vmem:[%s5930_s28 + $0x28] sm:$0xff]  ;;  %v305_v39 = vld [vmem:[%s5930_s28 + $0x30] sm:$0xff] }
  0x2e   : > { %v1042_v46 = vadd.f32 %v1041_v37, %v1040_v27  ;;  %v1068_v47 = vrot.slane %v1067_v38, 2  ;;  %v1100_v49 = vsel %vm1035_vm0, %v430_v8, 0.0  ;;  %v1093_v53 = vrot.slane %v1092_v48, 4 }
  0x2f   : > { %v1051_v35 = vadd.f32 %v1050_v42, %v1049_v32  ;;  %v1060_v40 = vadd.f32 %v1059_v43, %v1058_v33  ;;  %v1077_v45 = vrot.slane %v1076_v44, 2  ;;  %v1085_v50 = vadd.f32 %v1084_v7, %v1083_v36 }
  0x30   : > { %v1043_v51 = vrot.slane %v1042_v46, 1  ;;  %v1069_v52 = vadd.f32 %v1068_v47, %v1067_v38  ;;  %v1101_v54 = vadd.f32 %v1100_v49, %v1099_v41  ;;  %v1094_v61 = vadd.f32 %v1093_v53, %v1092_v48  ;;  %v306_v47 = vld [vmem:[%s5930_s28 + $0x38] sm:$0xff] }
  0x31   : > { %v1052_v55 = vrot.slane %v1051_v35, 1  ;;  %v1061_v56 = vrot.slane %v1060_v40, 1  ;;  %v1078_v57 = vadd.f32 %v1077_v45, %v1076_v44  ;;  %v1086_v58 = vrot.slane %v1085_v50, 2 }
  0x32   : > { %v1044_v59 = vadd.f32 %v1043_v51, %v1042_v46  ;;  %v1070_v60 = vrot.slane %v1069_v52, 1  ;;  %v1102_v62 = vrot.slane %v1101_v54, 4  ;;  %v1095_v6 = vrot.slane %v1094_v61, 2 }
  0x33   : > { %v1053_v63 = vadd.f32 %v1052_v55, %v1051_v35  ;;  %v1062_v0 = vadd.f32 %v1061_v56, %v1060_v40  ;;  %v1079_v1 = vrot.slane %v1078_v57, 1  ;;  %v1087_v2 = vadd.f32 %v1086_v58, %v1085_v50 }
  0x34   : > { %v1071_v5 = vadd.f32 %v1070_v60, %v1069_v52  ;;  %v1103_v8 = vadd.f32 %v1102_v62, %v1101_v54  ;;  %v1612_v9 = vmul.f32 0.25, %v1044_v59  ;;  %v1096_v18 = vadd.f32 %v1095_v6, %v1094_v61 }
  0x35   : > { %v1080_v12 = vadd.f32 %v1079_v1, %v1078_v57  ;;  %v1088_v13 = vrot.slane %v1087_v2, 1  ;;  %v1613_v14 = vmul.f32 0.25, %v1053_v63  ;;  %v1614_v15 = vmul.f32 0.25, %v1062_v0 }
  0x36   : > { %v1104_v19 = vrot.slane %v1103_v8, 2  ;;  %v1615_v20 = vmul.f32 0.25, %v1071_v5  ;;  %v5137_v21 = vpack.c.bf16 %v1985_v4, %v1984_v3  ;;  %v5139_v28 = vpack.c.bf16 %v1969_v11, %v1968_v10 }
  0x37   : > { %v1089_v25 = vadd.f32 %v1088_v13, %v1087_v2  ;;  %v1616_v26 = vmul.f32 0.25, %v1080_v12  ;;  %v1741_v27 = vsel %vm1740_vm1, %v1613_v14, %v1612_v9  ;;  %v1097_v30 = vrot.slane %v1096_v18, 1 }
  0x38   : > { %v1105_v31 = vadd.f32 %v1104_v19, %v1103_v8  ;;  %v1743_v32 = vsel %vm1742_vm2, %v1614_v15, %v1741_v27  ;;  %5138 = vmatprep.subr.bf16.mxu0 %v5137_v21  ;;  %v5165_v33 = vpack.c.bf16 %v2015_v17, %v2014_v16  ;;  %v5167_v38 = vpack.c.bf16 %v6033_v23, %v6028_v22  ;;  %v1987_v22 = vld [vmem:[%s7762_s1 + $0x2a8] sm:$0xff] }
  0x39   : > { %v1617_v36 = vmul.f32 0.25, %v1089_v25  ;;  %v1745_v37 = vsel %vm1744_vm3, %v1615_v20, %v1743_v32  ;;  %5140 = vmatpush3.bf16.msra.mxu0 %v5139_v28  ;;  %v431_v41 = vcombine.high %v303_v24, %v303_v24  ;;  %v1098_v42 = vadd.f32 %v1097_v30, %v1096_v18 }
  0x3a   : > { %v1106_v43 = vrot.slane %v1105_v31, 1  ;;  %v1747_v44 = vsel %vm1746_vm4, %v1616_v26, %v1745_v37  ;;  %5166 = vmatprep.subr.bf16.mxu1 %v5165_v33  ;;  %v438_v7 = vrot.slane %v303_v24, %v5932_v29  ;;  %v448_v49 = vcombine.high %v304_v34, %v304_v34  ;;  %v1845_v37 = vld [vmem:[#allocation2 + $0x2] sm:$0xff] }
  0x3b   : > { %v1749_v46 = vsel %vm1748_vm5, %v1617_v36, %v1747_v44  ;;  %v445_v48 = vrot.slane %v431_v41, %v5932_v29  ;;  %v455_v35 = vrot.slane %v304_v34, %v5932_v29  ;;  %v1618_v45 = vmul.f32 0.25, %v1098_v42 }
  0x3c   : > { %v1107_v40 = vadd.f32 %v1106_v43, %v1105_v31  ;;  %v446_v50 = vcombine.high %v438_v7, %v438_v7  ;;  %v465_v51 = vcombine.high %v305_v39, %v305_v39  ;;  %v462_v53 = vrot.slane %v448_v49, %v5932_v29 }
  0x3d   : > { %v447_v52 = vcombine.high %v445_v48, %v445_v48  ;;  %v463_v54 = vcombine.high %v455_v35, %v455_v35  ;;  %v472_v55 = vrot.slane %v305_v39, %v5932_v29  ;;  %v1751_v57 = vsel %vm1750_vm6, %v1618_v45, %v1749_v46 }
  0x3e   : > { %v1619_v56 = vmul.f32 0.25, %v1107_v40  ;;  %v479_v58 = vrot.slane %v465_v51, %v5932_v29  ;;  %v482_v59 = vcombine.high %v306_v47, %v306_v47  ;;  %v464_v60 = vcombine.high %v462_v53, %v462_v53 }
  0x3f   : > { %v480_v61 = vcombine.high %v472_v55, %v472_v55  ;;  %v489_v62 = vrot.slane %v306_v47, %v5932_v29  ;;  %v1108_v63 = vsel %vm1035_vm0, %v438_v7, 0.0  ;;  %v1109_v3 = vsel %vm1035_vm0, %v472_v55, 0.0 }
  0x40   : > { %v1753_v0 = vsel %vm1752_vm7, %v1619_v56, %v1751_v57  ;;  %v481_v1 = vcombine.high %v479_v58, %v479_v58  ;;  %v496_v2 = vrot.slane %v482_v59, %v5932_v29  ;;  %v1110_v6 = vadd.f32 %v1109_v3, %v1108_v63 }
  0x41   : > { %v1812_v4 = vsel %vm1811_vm8, %v1753_v0, 0.0  ;;  %v497_v5 = vcombine.high %v489_v62, %v489_v62  ;;  %v1117_v8 = vsel %vm1035_vm0, %v446_v50, 0.0  ;;  %5610 = vmatprep.mubr.msk.f32.mxu0 %vm1811_vm8, %v1753_v0  ;;  %v1118_v10 = vsel %vm1035_vm0, %v480_v61, 0.0 }
  0x42   : > { %1821 = vst [vmem:[#allocation2 + $0x11] sm:$0xff] %v1812_v4  ;;  %v498_v9 = vcombine.high %v496_v2, %v496_v2  ;;  %v1126_v11 = vsel %vm1035_vm0, %v445_v48, 0.0  ;;  %v1127_v12 = vsel %vm1035_vm0, %v479_v58, 0.0  ;;  %v1111_v13 = vrot.slane %v1110_v6, 4 }
  0x43   : > { %v1119_v14 = vadd.f32 %v1118_v10, %v1117_v8  ;;  %v1128_v15 = vadd.f32 %v1127_v12, %v1126_v11  ;;  %v1135_v16 = vsel %vm1035_vm0, %v447_v52, 0.0  ;;  %v1136_v17 = vsel %vm1035_vm0, %v481_v1, 0.0  ;;  %v1971_v11 = vld [vmem:[%s7762_s1 + $0x228] sm:$0xff]  ;;  %v2016_v12 = vld [vmem:[%s7762_s1 + $0x390] sm:$0xff] }
  0x44   : > { %v1144_v18 = vsel %vm1035_vm0, %v455_v35, 0.0  ;;  %v1145_v19 = vsel %vm1035_vm0, %v489_v62, 0.0  ;;  %v1153_v20 = vsel %vm1035_vm0, %v463_v54, 0.0  ;;  %v1112_v21 = vadd.f32 %v1111_v13, %v1110_v6  ;;  %v2017_v13 = vld [vmem:[%s7762_s1 + $0x398] sm:$0xff] }
  0x45   : > { %v1120_v24 = vrot.slane %v1119_v14, 4  ;;  %v1129_v25 = vrot.slane %v1128_v15, 4  ;;  %v1137_v26 = vadd.f32 %v1136_v17, %v1135_v16  ;;  %v1146_v27 = vadd.f32 %v1145_v19, %v1144_v18 }
  0x46   : > { %v1154_v28 = vsel %vm1035_vm0, %v497_v5, 0.0  ;;  %v1162_v30 = vsel %vm1035_vm0, %v462_v53, 0.0  ;;  %v1163_v31 = vsel %vm1035_vm0, %v496_v2, 0.0  ;;  %v1113_v32 = vrot.slane %v1112_v21, 2  ;;  %v1986_v2 = vld [vmem:[%s7762_s1 + $0x2a0] sm:$0xff] }
  0x47   : > { %v1121_v33 = vadd.f32 %v1120_v24, %v1119_v14  ;;  %v1130_v34 = vadd.f32 %v1129_v25, %v1128_v15  ;;  %v1138_v36 = vrot.slane %v1137_v26, 4  ;;  %v1147_v39 = vrot.slane %v1146_v27, 4  ;;  %v1970_v5 = vld [vmem:[%s7762_s1 + $0x220] sm:$0xff]  ;;  %v2000_v24 = vld [vmem:[%s7762_s1 + $0x310] sm:$0xff]  ;;  %v2001_v25 = vld [vmem:[%s7762_s1 + $0x318] sm:$0xff] }
  0x48   : > { %v1155_v41 = vadd.f32 %v1154_v28, %v1153_v20  ;;  %v1164_v42 = vadd.f32 %v1163_v31, %v1162_v30  ;;  %v1171_v43 = vsel %vm1035_vm0, %v464_v60, 0.0  ;;  %v1114_v7 = vadd.f32 %v1113_v32, %v1112_v21 }
  0x49   : > { %v1853_v44 = vld [vmem:[#allocation2 + $0x10] sm:$0xff]  ;;  %v1122_v46 = vrot.slane %v1121_v33, 2  ;;  %v1131_v47 = vrot.slane %v1130_v34, 2  ;;  %v1139_v48 = vadd.f32 %v1138_v36, %v1137_v26  ;;  %v1148_v49 = vadd.f32 %v1147_v39, %v1146_v27  ;;  %v307_v26 = vld [vmem:[%s5930_s28 + $0x40] sm:$0xff] }
  0x4a   : > { %2222 = vmatprep.mubr.f32.mxu1 %v1853_v44  ;;  %2123 = vmatmul.mubr.f32.gmra.mrb[2].mxu0 %v1853_v44  ;;  %v1156_v35 = vrot.slane %v1155_v41, 4  ;;  %v1165_v40 = vrot.slane %v1164_v42, 4  ;;  %v1172_v45 = vsel %vm1035_vm0, %v498_v9, 0.0  ;;  %v1115_v50 = vrot.slane %v1114_v7, 1 }
  0x4b   : > { %2223 = vmatmul.mubr.f32.vlgmr.msra.gmra.mrb[0].mxu1 %v1845_v37  ;;  %v1123_v51 = vadd.f32 %v1122_v46, %v1121_v33  ;;  %v1132_v52 = vadd.f32 %v1131_v47, %v1130_v34  ;;  %v1140_v53 = vrot.slane %v1139_v48, 2  ;;  %v1149_v54 = vrot.slane %v1148_v49, 2  ;;  %v308_v37 = vld [vmem:[%s5930_s28 + $0x48] sm:$0xff] }
  0x4c   : > { %5168 = vmatpush3.bf16.msra.mxu1 %v5167_v38  ;;  %v1157_v55 = vadd.f32 %v1156_v35, %v1155_v41  ;;  %v1166_v56 = vadd.f32 %v1165_v40, %v1164_v42  ;;  %v1173_v57 = vadd.f32 %v1172_v45, %v1171_v43  ;;  %v1116_v58 = vadd.f32 %v1115_v50, %v1114_v7  ;;  %v309_v42 = vld [vmem:[%s5930_s28 + $0x50] sm:$0xff] }
  0x4d   : > { %v1124_v59 = vrot.slane %v1123_v51, 1  ;;  %v1133_v60 = vrot.slane %v1132_v52, 1  ;;  %v1141_v61 = vadd.f32 %v1140_v53, %v1139_v48  ;;  %v1150_v62 = vadd.f32 %v1149_v54, %v1148_v49 }
  0x4e   : > { %v1158_v63 = vrot.slane %v1157_v55, 2  ;;  %v1167_v0 = vrot.slane %v1166_v56, 2  ;;  %v1174_v1 = vrot.slane %v1173_v57, 4  ;;  %v1620_v4 = vmul.f32 0.25, %v1116_v58 }
  0x4f   : > { %v1125_v23 = vadd.f32 %v1124_v59, %v1123_v51  ;;  %v1134_v38 = vadd.f32 %v1133_v60, %v1132_v52  ;;  %v1142_v3 = vrot.slane %v1141_v61, 1  ;;  %v1151_v6 = vrot.slane %v1150_v62, 1  ;;  %v310_v51 = vld [vmem:[%s5930_s28 + $0x58] sm:$0xff] }
  0x50   : > { %v1159_v8 = vadd.f32 %v1158_v63, %v1157_v55  ;;  %v1168_v9 = vadd.f32 %v1167_v0, %v1166_v56  ;;  %v1175_v10 = vadd.f32 %v1174_v1, %v1173_v57  ;;  %v5141_v17 = vpack.c.bf16 %v1987_v22, %v1986_v2 }
  0x51   : > { %v1143_v14 = vadd.f32 %v1142_v3, %v1141_v61  ;;  %v1621_v15 = vmul.f32 0.25, %v1125_v23  ;;  %v1622_v16 = vmul.f32 0.25, %v1134_v38  ;;  %v1152_v18 = vadd.f32 %v1151_v6, %v1150_v62 }
  0x52   : > { %v1160_v19 = vrot.slane %v1159_v8, 1  ;;  %v1169_v20 = vrot.slane %v1168_v9, 1  ;;  %v1176_v21 = vrot.slane %v1175_v10, 2  ;;  %5142 = vmatprep.subr.bf16.mxu0 %v5141_v17  ;;  %v5143_v30 = vpack.c.bf16 %v1971_v11, %v1970_v5 }
  0x53   : > { %v1623_v27 = vmul.f32 0.25, %v1143_v14  ;;  %v1754_v28 = vsel %vm1740_vm1, %v1621_v15, %v1620_v4  ;;  %v5169_v31 = vpack.c.bf16 %v2017_v13, %v2016_v12  ;;  %v1624_v36 = vmul.f32 0.25, %v1152_v18 }
  0x54   : > { %v1161_v32 = vadd.f32 %v1160_v19, %v1159_v8  ;;  %v1170_v33 = vadd.f32 %v1169_v20, %v1168_v9  ;;  %v1177_v34 = vadd.f32 %v1176_v21, %v1175_v10  ;;  %v1755_v39 = vsel %vm1742_vm2, %v1622_v16, %v1754_v28  ;;  %5144 = vmatpush3.bf16.msra.mxu0 %v5143_v30 }
  0x55   : > { %5170 = vmatprep.subr.bf16.mxu1 %v5169_v31  ;;  %v5171_v41 = vpack.c.bf16 %v2001_v25, %v2000_v24  ;;  %v499_v43 = vcombine.high %v307_v26, %v307_v26  ;;  %v1756_v47 = vsel %vm1744_vm3, %v1623_v27, %v1755_v39  ;;  %v506_v49 = vrot.slane %v307_v26, %v5932_v29 }
  0x56   : > { %v1178_v44 = vrot.slane %v1177_v34, 1  ;;  %v1625_v7 = vmul.f32 0.25, %v1161_v32  ;;  %v1626_v46 = vmul.f32 0.25, %v1170_v33  ;;  %v1757_v48 = vsel %vm1746_vm4, %v1624_v36, %v1756_v47  ;;  %v1846_v36 = vld [vmem:[#allocation2 + $0x12] sm:$0xff] }
  0x57   : > { %5172 = vmatpush3.bf16.msra.mxu1 %v5171_v41  ;;  %v513_v35 = vrot.slane %v499_v43, %v5932_v29  ;;  %v516_v40 = vcombine.high %v308_v37, %v308_v37  ;;  %v523_v52 = vrot.slane %v308_v37, %v5932_v29  ;;  %v533_v53 = vcombine.high %v309_v42, %v309_v42 }
  0x58   : > { %v1179_v45 = vadd.f32 %v1178_v44, %v1177_v34  ;;  %v1758_v50 = vsel %vm1748_vm5, %v1625_v7, %v1757_v48  ;;  %v514_v55 = vcombine.high %v506_v49, %v506_v49  ;;  %v540_v60 = vrot.slane %v309_v42, %v5932_v29 }
  0x59   : > { %v1759_v54 = vsel %vm1750_vm6, %v1626_v46, %v1758_v50  ;;  %v515_v56 = vcombine.high %v513_v35, %v513_v35  ;;  %v530_v57 = vrot.slane %v516_v40, %v5932_v29  ;;  %v531_v59 = vcombine.high %v523_v52, %v523_v52 }
  0x5a   : > { %v1627_v58 = vmul.f32 0.25, %v1179_v45  ;;  %v547_v61 = vrot.slane %v533_v53, %v5932_v29  ;;  %v550_v63 = vcombine.high %v310_v51, %v310_v51  ;;  %v557_v0 = vrot.slane %v310_v51, %v5932_v29 }
  0x5b   : > { %v532_v62 = vcombine.high %v530_v57, %v530_v57  ;;  %v1180_v1 = vsel %vm1035_vm0, %v506_v49, 0.0  ;;  %v548_v22 = vcombine.high %v540_v60, %v540_v60  ;;  %v1181_v38 = vsel %vm1035_vm0, %v540_v60, 0.0 }
  0x5c   : > { %v1760_v2 = vsel %vm1752_vm7, %v1627_v58, %v1759_v54  ;;  %v549_v23 = vcombine.high %v547_v61, %v547_v61  ;;  %v564_v4 = vrot.slane %v550_v63, %v5932_v29  ;;  %v565_v5 = vcombine.high %v557_v0, %v557_v0 }
  0x5d   : > { %v1813_v3 = vsel %vm1811_vm8, %v1760_v2, 0.0  ;;  %v1182_v6 = vadd.f32 %v1181_v38, %v1180_v1  ;;  %5611 = vmatprep.mubr.msk.f32.mxu0 %vm1811_vm8, %v1760_v2  ;;  %v1189_v8 = vsel %vm1035_vm0, %v514_v55, 0.0  ;;  %v1190_v9 = vsel %vm1035_vm0, %v548_v22, 0.0  ;;  %v1988_v1 = vld [vmem:[%s7762_s1 + $0x2b0] sm:$0xff]  ;;  %v1989_v2 = vld [vmem:[%s7762_s1 + $0x2b8] sm:$0xff] }
  0x5e   : > { %1822 = vst [vmem:[#allocation2 + $0x21] sm:$0xff] %v1813_v3  ;;  %v1198_v10 = vsel %vm1035_vm0, %v513_v35, 0.0  ;;  %v1199_v11 = vsel %vm1035_vm0, %v547_v61, 0.0  ;;  %v566_v12 = vcombine.high %v564_v4, %v564_v4  ;;  %v1191_v14 = vadd.f32 %v1190_v9, %v1189_v8 }
  0x5f   : > { %v1183_v13 = vrot.slane %v1182_v6, 4  ;;  %v1200_v15 = vadd.f32 %v1199_v11, %v1198_v10  ;;  %v1207_v16 = vsel %vm1035_vm0, %v515_v56, 0.0  ;;  %v1208_v17 = vsel %vm1035_vm0, %v549_v23, 0.0  ;;  %v1973_v10 = vld [vmem:[%s7762_s1 + $0x238] sm:$0xff]  ;;  %v2018_v11 = vld [vmem:[%s7762_s1 + $0x3a0] sm:$0xff] }
  0x60   : > { %v1216_v18 = vsel %vm1035_vm0, %v523_v52, 0.0  ;;  %v1217_v19 = vsel %vm1035_vm0, %v557_v0, 0.0  ;;  %v1192_v21 = vrot.slane %v1191_v14, 4  ;;  %v1209_v25 = vadd.f32 %v1208_v17, %v1207_v16 }
  0x61   : > { %v1184_v20 = vadd.f32 %v1183_v13, %v1182_v6  ;;  %v1201_v24 = vrot.slane %v1200_v15, 4  ;;  %v1218_v26 = vadd.f32 %v1217_v19, %v1216_v18  ;;  %v1225_v27 = vsel %vm1035_vm0, %v531_v59, 0.0 }
  0x62   : > { %v1226_v28 = vsel %vm1035_vm0, %v565_v5, 0.0  ;;  %v1234_v30 = vsel %vm1035_vm0, %v530_v57, 0.0  ;;  %v1193_v32 = vadd.f32 %v1192_v21, %v1191_v14  ;;  %v1210_v34 = vrot.slane %v1209_v25, 4  ;;  %v2002_v21 = vld [vmem:[%s7762_s1 + $0x320] sm:$0xff] }
  0x63   : > { %v1185_v31 = vrot.slane %v1184_v20, 2  ;;  %v1202_v33 = vadd.f32 %v1201_v24, %v1200_v15  ;;  %v1219_v37 = vrot.slane %v1218_v26, 4  ;;  %v1227_v39 = vadd.f32 %v1226_v28, %v1225_v27  ;;  %v2003_v24 = vld [vmem:[%s7762_s1 + $0x328] sm:$0xff] }
  0x64   : > { %v1235_v41 = vsel %vm1035_vm0, %v564_v4, 0.0  ;;  %v1243_v42 = vsel %vm1035_vm0, %v532_v62, 0.0  ;;  %v1194_v7 = vrot.slane %v1193_v32, 2  ;;  %v1211_v47 = vadd.f32 %v1210_v34, %v1209_v25  ;;  %v1972_v4 = vld [vmem:[%s7762_s1 + $0x230] sm:$0xff]  ;;  %v311_v25 = vld [vmem:[%s5930_s28 + $0x60] sm:$0xff] }
  0x65   : > { %v1854_v43 = vld [vmem:[#allocation2 + $0x20] sm:$0xff]  ;;  %v1186_v44 = vadd.f32 %v1185_v31, %v1184_v20  ;;  %v1203_v46 = vrot.slane %v1202_v33, 2  ;;  %v1220_v48 = vadd.f32 %v1219_v37, %v1218_v26  ;;  %v1228_v49 = vrot.slane %v1227_v39, 4 }
  0x66   : > { %2227 = vmatprep.mubr.f32.mxu1 %v1854_v43  ;;  %2128 = vmatmul.mubr.f32.gmra.mrb[4].mxu0 %v1854_v43  ;;  %v1236_v35 = vadd.f32 %v1235_v41, %v1234_v30  ;;  %v1244_v40 = vsel %vm1035_vm0, %v566_v12, 0.0  ;;  %v1195_v50 = vadd.f32 %v1194_v7, %v1193_v32  ;;  %v1212_v52 = vrot.slane %v1211_v47, 2  ;;  %v2019_v12 = vld [vmem:[%s7762_s1 + $0x3a8] sm:$0xff] }
  0x67   : > { %2228 = vmatmul.mubr.f32.gmra.mrb[2].mxu1 %v1846_v36  ;;  %v1187_v45 = vrot.slane %v1186_v44, 1  ;;  %v1204_v51 = vadd.f32 %v1203_v46, %v1202_v33  ;;  %v1221_v53 = vrot.slane %v1220_v48, 2  ;;  %v1229_v54 = vadd.f32 %v1228_v49, %v1227_v39  ;;  %v312_v36 = vld [vmem:[%s5930_s28 + $0x68] sm:$0xff]  ;;  %v313_v46 = vld [vmem:[%s5930_s28 + $0x70] sm:$0xff] }
  0x68   : > { %v1237_v55 = vrot.slane %v1236_v35, 4  ;;  %v1245_v56 = vadd.f32 %v1244_v40, %v1243_v42  ;;  %v1196_v58 = vrot.slane %v1195_v50, 1  ;;  %v1213_v60 = vadd.f32 %v1212_v52, %v1211_v47 }
  0x69   : > { %v1188_v57 = vadd.f32 %v1187_v45, %v1186_v44  ;;  %v1205_v59 = vrot.slane %v1204_v51, 1  ;;  %v1222_v61 = vadd.f32 %v1221_v53, %v1220_v48  ;;  %v1230_v62 = vrot.slane %v1229_v54, 2 }
  0x6a   : > { %v1238_v63 = vadd.f32 %v1237_v55, %v1236_v35  ;;  %v1246_v0 = vrot.slane %v1245_v56, 4  ;;  %v1197_v22 = vadd.f32 %v1196_v58, %v1195_v50  ;;  %v1214_v38 = vrot.slane %v1213_v60, 1 }
  0x6b   : > { %v1206_v23 = vadd.f32 %v1205_v59, %v1204_v51  ;;  %v1628_v3 = vmul.f32 0.25, %v1188_v57  ;;  %v1223_v5 = vrot.slane %v1222_v61, 1  ;;  %v1231_v6 = vadd.f32 %v1230_v62, %v1229_v54  ;;  %v314_v51 = vld [vmem:[%s5930_s28 + $0x78] sm:$0xff] }
  0x6c   : > { %v1239_v8 = vrot.slane %v1238_v63, 2  ;;  %v1247_v9 = vadd.f32 %v1246_v0, %v1245_v56  ;;  %v1215_v13 = vadd.f32 %v1214_v38, %v1213_v60  ;;  %v1629_v14 = vmul.f32 0.25, %v1197_v22 }
  0x6d   : > { %v1630_v15 = vmul.f32 0.25, %v1206_v23  ;;  %v5145_v16 = vpack.c.bf16 %v1989_v2, %v1988_v1  ;;  %v1224_v17 = vadd.f32 %v1223_v5, %v1222_v61  ;;  %v1232_v18 = vrot.slane %v1231_v6, 1 }
  0x6e   : > { %v1240_v19 = vadd.f32 %v1239_v8, %v1238_v63  ;;  %v1248_v20 = vrot.slane %v1247_v9, 2  ;;  %v1631_v26 = vmul.f32 0.25, %v1215_v13  ;;  %v1761_v27 = vsel %vm1740_vm1, %v1629_v14, %v1628_v3 }
  0x6f   : > { %5146 = vmatprep.subr.bf16.mxu0 %v5145_v16  ;;  %v5147_v28 = vpack.c.bf16 %v1973_v10, %v1972_v4  ;;  %v5173_v30 = vpack.c.bf16 %v2019_v12, %v2018_v11  ;;  %v1233_v31 = vadd.f32 %v1232_v18, %v1231_v6  ;;  %v1632_v34 = vmul.f32 0.25, %v1224_v17 }
  0x70   : > { %v1241_v32 = vrot.slane %v1240_v19, 1  ;;  %v1249_v33 = vadd.f32 %v1248_v20, %v1247_v9  ;;  %v1762_v37 = vsel %vm1742_vm2, %v1630_v15, %v1761_v27  ;;  %v5175_v39 = vpack.c.bf16 %v2003_v24, %v2002_v21 }
  0x71   : > { %5148 = vmatpush3.bf16.msra.mxu0 %v5147_v28  ;;  %5174 = vmatprep.subr.bf16.mxu1 %v5173_v30  ;;  %v567_v41 = vcombine.high %v311_v25, %v311_v25  ;;  %v1633_v44 = vmul.f32 0.25, %v1233_v31  ;;  %v1763_v7 = vsel %vm1744_vm3, %v1631_v26, %v1762_v37  ;;  %v574_v48 = vrot.slane %v311_v25, %v5932_v29 }
  0x72   : > { %v1242_v42 = vadd.f32 %v1241_v32, %v1240_v19  ;;  %v1250_v43 = vrot.slane %v1249_v33, 1  ;;  %v1764_v47 = vsel %vm1746_vm4, %v1632_v34, %v1763_v7  ;;  %5176 = vmatpush3.bf16.msra.mxu1 %v5175_v39  ;;  %v584_v35 = vcombine.high %v312_v36, %v312_v36  ;;  %v1847_v34 = vld [vmem:[#allocation2 + $0x22] sm:$0xff] }
  0x73   : > { %v581_v49 = vrot.slane %v567_v41, %v5932_v29  ;;  %v1765_v50 = vsel %vm1748_vm5, %v1633_v44, %v1764_v47  ;;  %v591_v52 = vrot.slane %v312_v36, %v5932_v29  ;;  %v582_v53 = vcombine.high %v574_v48, %v574_v48 }
  0x74   : > { %v1251_v40 = vadd.f32 %v1250_v43, %v1249_v33  ;;  %v1634_v45 = vmul.f32 0.25, %v1242_v42  ;;  %v598_v55 = vrot.slane %v584_v35, %v5932_v29  ;;  %v601_v56 = vcombine.high %v313_v46, %v313_v46 }
  0x75   : > { %v583_v54 = vcombine.high %v581_v49, %v581_v49  ;;  %v599_v59 = vcombine.high %v591_v52, %v591_v52  ;;  %v608_v60 = vrot.slane %v313_v46, %v5932_v29  ;;  %v618_v63 = vcombine.high %v314_v51, %v314_v51 }
  0x76   : > { %v1635_v57 = vmul.f32 0.25, %v1251_v40  ;;  %v1766_v58 = vsel %vm1750_vm6, %v1634_v45, %v1765_v50  ;;  %v600_v61 = vcombine.high %v598_v55, %v598_v55  ;;  %v615_v62 = vrot.slane %v601_v56, %v5932_v29 }
  0x77   : > { %v625_v0 = vrot.slane %v314_v51, %v5932_v29  ;;  %v616_v2 = vcombine.high %v608_v60, %v608_v60  ;;  %v1252_v22 = vsel %vm1035_vm0, %v574_v48, 0.0  ;;  %v1253_v23 = vsel %vm1035_vm0, %v608_v60, 0.0 }
  0x78   : > { %v1767_v1 = vsel %vm1752_vm7, %v1635_v57, %v1766_v58  ;;  %v617_v3 = vcombine.high %v615_v62, %v615_v62  ;;  %v632_v4 = vrot.slane %v618_v63, %v5932_v29  ;;  %v1254_v6 = vadd.f32 %v1253_v23, %v1252_v22  ;;  %v1990_v23 = vld [vmem:[%s7762_s1 + $0x2c0] sm:$0xff] }
  0x79   : > { %v1814_v38 = vsel %vm1811_vm8, %v1767_v1, 0.0  ;;  %v633_v5 = vcombine.high %v625_v0, %v625_v0  ;;  %5612 = vmatprep.mubr.msk.f32.mxu0 %vm1811_vm8, %v1767_v1  ;;  %v1261_v8 = vsel %vm1035_vm0, %v582_v53, 0.0  ;;  %v1262_v9 = vsel %vm1035_vm0, %v616_v2, 0.0 }
  0x7a   : > { %1823 = vst [vmem:[#allocation2 + $0x31] sm:$0xff] %v1814_v38  ;;  %v1270_v10 = vsel %vm1035_vm0, %v581_v49, 0.0  ;;  %v634_v11 = vcombine.high %v632_v4, %v632_v4  ;;  %v1263_v12 = vadd.f32 %v1262_v9, %v1261_v8  ;;  %v1271_v13 = vsel %vm1035_vm0, %v615_v62, 0.0  ;;  %v1991_v38 = vld [vmem:[%s7762_s1 + $0x2c8] sm:$0xff] }
  0x7b   : > { %v1279_v14 = vsel %vm1035_vm0, %v583_v54, 0.0  ;;  %v1255_v15 = vrot.slane %v1254_v6, 4  ;;  %v1272_v16 = vadd.f32 %v1271_v13, %v1270_v10  ;;  %v1280_v17 = vsel %vm1035_vm0, %v617_v3, 0.0  ;;  %v1975_v13 = vld [vmem:[%s7762_s1 + $0x248] sm:$0xff] }
  0x7c   : > { %v1288_v18 = vsel %vm1035_vm0, %v591_v52, 0.0  ;;  %v1264_v19 = vrot.slane %v1263_v12, 4  ;;  %v1281_v20 = vadd.f32 %v1280_v17, %v1279_v14  ;;  %v1289_v21 = vsel %vm1035_vm0, %v625_v0, 0.0 }
  0x7d   : > { %v1297_v24 = vsel %vm1035_vm0, %v599_v59, 0.0  ;;  %v1256_v25 = vadd.f32 %v1255_v15, %v1254_v6  ;;  %v1273_v26 = vrot.slane %v1272_v16, 4  ;;  %v1290_v27 = vadd.f32 %v1289_v21, %v1288_v18  ;;  %v2020_v18 = vld [vmem:[%s7762_s1 + $0x3b0] sm:$0xff] }
  0x7e   : > { %v1298_v28 = vsel %vm1035_vm0, %v633_v5, 0.0  ;;  %v1265_v30 = vadd.f32 %v1264_v19, %v1263_v12  ;;  %v1282_v31 = vrot.slane %v1281_v20, 4  ;;  %v1306_v33 = vsel %vm1035_vm0, %v598_v55, 0.0  ;;  %v1974_v12 = vld [vmem:[%s7762_s1 + $0x240] sm:$0xff]  ;;  %v2021_v19 = vld [vmem:[%s7762_s1 + $0x3b8] sm:$0xff] }
  0x7f   : > { %v1299_v32 = vadd.f32 %v1298_v28, %v1297_v24  ;;  %v1257_v36 = vrot.slane %v1256_v25, 2  ;;  %v1274_v37 = vadd.f32 %v1273_v26, %v1272_v16  ;;  %v1291_v39 = vrot.slane %v1290_v27, 4  ;;  %v2004_v26 = vld [vmem:[%s7762_s1 + $0x330] sm:$0xff]  ;;  %v315_v28 = vld [vmem:[%s5930_s28 + $0x80] sm:$0xff] }
  0x80   : > { %v1307_v41 = vsel %vm1035_vm0, %v632_v4, 0.0  ;;  %v1266_v43 = vrot.slane %v1265_v30, 2  ;;  %v1283_v44 = vadd.f32 %v1282_v31, %v1281_v20  ;;  %v1315_v35 = vsel %vm1035_vm0, %v600_v61, 0.0 }
  0x81   : > { %v1855_v42 = vld [vmem:[#allocation2 + $0x30] sm:$0xff]  ;;  %v1300_v7 = vrot.slane %v1299_v32, 4  ;;  %v1308_v46 = vadd.f32 %v1307_v41, %v1306_v33  ;;  %v1258_v47 = vadd.f32 %v1257_v36, %v1256_v25  ;;  %v1275_v48 = vrot.slane %v1274_v37, 2 }
  0x82   : > { %2232 = vmatprep.mubr.f32.mxu1 %v1855_v42  ;;  %2133 = vmatmul.mubr.f32.gmra.mrb[6].mxu0 %v1855_v42  ;;  %v1292_v49 = vadd.f32 %v1291_v39, %v1290_v27  ;;  %v1267_v40 = vadd.f32 %v1266_v43, %v1265_v30  ;;  %v1284_v45 = vrot.slane %v1283_v44, 2  ;;  %v1316_v55 = vsel %vm1035_vm0, %v634_v11, 0.0  ;;  %v2005_v27 = vld [vmem:[%s7762_s1 + $0x338] sm:$0xff]  ;;  %v317_v42 = vld [vmem:[%s5930_s28 + $0x90] sm:$0xff] }
  0x83   : > { %2233 = vmatmul.mubr.f32.gmra.mrb[4].mxu1 %v1847_v34  ;;  %v1301_v50 = vadd.f32 %v1300_v7, %v1299_v32  ;;  %v1309_v51 = vrot.slane %v1308_v46, 4  ;;  %v1259_v52 = vrot.slane %v1258_v47, 1  ;;  %v1276_v53 = vadd.f32 %v1275_v48, %v1274_v37  ;;  %v316_v34 = vld [vmem:[%s5930_s28 + $0x88] sm:$0xff] }
  0x84   : > { %v1293_v54 = vrot.slane %v1292_v49, 2  ;;  %v1268_v56 = vrot.slane %v1267_v40, 1  ;;  %v1285_v57 = vadd.f32 %v1284_v45, %v1283_v44  ;;  %v1317_v0 = vadd.f32 %v1316_v55, %v1315_v35  ;;  %v318_v45 = vld [vmem:[%s5930_s28 + $0x98] sm:$0xff] }
  0x85   : > { %v1302_v58 = vrot.slane %v1301_v50, 2  ;;  %v1310_v59 = vadd.f32 %v1309_v51, %v1308_v46  ;;  %v1260_v60 = vadd.f32 %v1259_v52, %v1258_v47  ;;  %v1277_v62 = vrot.slane %v1276_v53, 1 }
  0x86   : > { %v1294_v63 = vadd.f32 %v1293_v54, %v1292_v49  ;;  %v1269_v1 = vadd.f32 %v1268_v56, %v1267_v40  ;;  %v1286_v61 = vrot.slane %v1285_v57, 1  ;;  %v1318_v5 = vrot.slane %v1317_v0, 4 }
  0x87   : > { %v1303_v2 = vadd.f32 %v1302_v58, %v1301_v50  ;;  %v1311_v22 = vrot.slane %v1310_v59, 2  ;;  %v1278_v3 = vadd.f32 %v1277_v62, %v1276_v53  ;;  %v1636_v6 = vmul.f32 0.25, %v1260_v60 }
  0x88   : > { %v1295_v4 = vrot.slane %v1294_v63, 1  ;;  %v1287_v8 = vadd.f32 %v1286_v61, %v1285_v57  ;;  %v1637_v11 = vmul.f32 0.25, %v1269_v1  ;;  %v1319_v15 = vadd.f32 %v1318_v5, %v1317_v0 }
  0x89   : > { %v1304_v9 = vrot.slane %v1303_v2, 1  ;;  %v1312_v10 = vadd.f32 %v1311_v22, %v1310_v59  ;;  %v1638_v16 = vmul.f32 0.25, %v1278_v3  ;;  %v5149_v17 = vpack.c.bf16 %v1991_v38, %v1990_v23 }
  0x8a   : > { %v1296_v14 = vadd.f32 %v1295_v4, %v1294_v63  ;;  %v1639_v24 = vmul.f32 0.25, %v1287_v8  ;;  %v1768_v25 = vsel %vm1740_vm1, %v1637_v11, %v1636_v6  ;;  %v1320_v30 = vrot.slane %v1319_v15, 2 }
  0x8b   : > { %v1305_v20 = vadd.f32 %v1304_v9, %v1303_v2  ;;  %v1313_v21 = vrot.slane %v1312_v10, 1  ;;  %v1769_v32 = vsel %vm1742_vm2, %v1638_v16, %v1768_v25  ;;  %5150 = vmatprep.subr.bf16.mxu0 %v5149_v17  ;;  %v5151_v33 = vpack.c.bf16 %v1975_v13, %v1974_v12 }
  0x8c   : > { %v1640_v31 = vmul.f32 0.25, %v1296_v14  ;;  %v1770_v39 = vsel %vm1744_vm3, %v1639_v24, %v1769_v32  ;;  %v5177_v41 = vpack.c.bf16 %v2021_v19, %v2020_v18  ;;  %v1321_v43 = vadd.f32 %v1320_v30, %v1319_v15 }
  0x8d   : > { %v1314_v36 = vadd.f32 %v1313_v21, %v1312_v10  ;;  %v1641_v37 = vmul.f32 0.25, %v1305_v20  ;;  %5152 = vmatpush3.bf16.msra.mxu0 %v5151_v33  ;;  %v5179_v7 = vpack.c.bf16 %v2005_v27, %v2004_v26  ;;  %v635_v46 = vcombine.high %v315_v28, %v315_v28 }
  0x8e   : > { %v1771_v44 = vsel %vm1746_vm4, %v1640_v31, %v1770_v39  ;;  %5178 = vmatprep.subr.bf16.mxu1 %v5177_v41  ;;  %v642_v49 = vrot.slane %v315_v28, %v5932_v29  ;;  %v652_v35 = vcombine.high %v316_v34, %v316_v34  ;;  %v1322_v40 = vrot.slane %v1321_v43, 1 }
  0x8f   : > { %v1642_v47 = vmul.f32 0.25, %v1314_v36  ;;  %v1772_v48 = vsel %vm1748_vm5, %v1641_v37, %v1771_v44  ;;  %5180 = vmatpush3.bf16.msra.mxu1 %v5179_v7  ;;  %v649_v50 = vrot.slane %v635_v46, %v5932_v29  ;;  %v659_v51 = vrot.slane %v316_v34, %v5932_v29  ;;  %v1848_v7 = vld [vmem:[#allocation2 + $0x32] sm:$0xff] }
  0x90   : > { %v669_v52 = vcombine.high %v317_v42, %v317_v42  ;;  %v650_v54 = vcombine.high %v642_v49, %v642_v49  ;;  %v666_v55 = vrot.slane %v652_v35, %v5932_v29  ;;  %v676_v56 = vrot.slane %v317_v42, %v5932_v29 }
  0x91   : > { %v1773_v53 = vsel %vm1750_vm6, %v1642_v47, %v1772_v48  ;;  %v1323_v57 = vadd.f32 %v1322_v40, %v1321_v43  ;;  %v651_v58 = vcombine.high %v649_v50, %v649_v50  ;;  %v667_v59 = vcombine.high %v659_v51, %v659_v51 }
  0x92   : > { %v683_v60 = vrot.slane %v669_v52, %v5932_v29  ;;  %v668_v62 = vcombine.high %v666_v55, %v666_v55  ;;  %v684_v63 = vcombine.high %v676_v56, %v676_v56  ;;  %v686_v0 = vcombine.high %v318_v45, %v318_v45 }
  0x93   : > { %v693_v1 = vrot.slane %v318_v45, %v5932_v29  ;;  %v1643_v61 = vmul.f32 0.25, %v1323_v57  ;;  %v1324_v22 = vsel %vm1035_vm0, %v642_v49, 0.0  ;;  %v1325_v23 = vsel %vm1035_vm0, %v676_v56, 0.0 }
  0x94   : > { %v685_v2 = vcombine.high %v683_v60, %v683_v60  ;;  %v700_v38 = vrot.slane %v686_v0, %v5932_v29  ;;  %v1326_v4 = vadd.f32 %v1325_v23, %v1324_v22  ;;  %v1333_v5 = vsel %vm1035_vm0, %v650_v54, 0.0 }
  0x95   : > { %v701_v3 = vcombine.high %v693_v1, %v693_v1  ;;  %v1774_v6 = vsel %vm1752_vm7, %v1643_v61, %v1773_v53  ;;  %v1334_v8 = vsel %vm1035_vm0, %v684_v63, 0.0  ;;  %v1342_v9 = vsel %vm1035_vm0, %v649_v50, 0.0  ;;  %v1993_v61 = vld [vmem:[%s7762_s1 + $0x2d8] sm:$0xff] }
  0x96   : > { %v1343_v10 = vsel %vm1035_vm0, %v683_v60, 0.0  ;;  %v1815_v11 = vsel %vm1811_vm8, %v1774_v6, 0.0  ;;  %v702_v12 = vcombine.high %v700_v38, %v700_v38  ;;  %v1327_v13 = vrot.slane %v1326_v4, 4  ;;  %5613 = vmatprep.mubr.msk.f32.mxu0 %vm1811_vm8, %v1774_v6 }
  0x97   : > { %v1335_v14 = vadd.f32 %v1334_v8, %v1333_v5  ;;  %1824 = vst [vmem:[#allocation2 + $0x41] sm:$0xff] %v1815_v11  ;;  %v1344_v15 = vadd.f32 %v1343_v10, %v1342_v9  ;;  %v1351_v16 = vsel %vm1035_vm0, %v651_v58, 0.0  ;;  %v1352_v17 = vsel %vm1035_vm0, %v685_v2, 0.0  ;;  %v1976_v8 = vld [vmem:[%s7762_s1 + $0x250] sm:$0xff]  ;;  %v1977_v9 = vld [vmem:[%s7762_s1 + $0x258] sm:$0xff] }
  0x98   : > { %v1360_v18 = vsel %vm1035_vm0, %v659_v51, 0.0  ;;  %v1328_v19 = vadd.f32 %v1327_v13, %v1326_v4  ;;  %v1353_v21 = vadd.f32 %v1352_v17, %v1351_v16  ;;  %v1361_v24 = vsel %vm1035_vm0, %v693_v1, 0.0  ;;  %v1992_v1 = vld [vmem:[%s7762_s1 + $0x2d0] sm:$0xff] }
  0x99   : > { %v1336_v20 = vrot.slane %v1335_v14, 4  ;;  %v1345_v25 = vrot.slane %v1344_v15, 4  ;;  %v1362_v26 = vadd.f32 %v1361_v24, %v1360_v18  ;;  %v1369_v27 = vsel %vm1035_vm0, %v667_v59, 0.0 }
  0x9a   : > { %v1370_v28 = vsel %vm1035_vm0, %v701_v3, 0.0  ;;  %v1329_v30 = vrot.slane %v1328_v19, 2  ;;  %v1354_v32 = vrot.slane %v1353_v21, 4  ;;  %v1378_v37 = vsel %vm1035_vm0, %v666_v55, 0.0 }
  0x9b   : > { %v1337_v31 = vadd.f32 %v1336_v20, %v1335_v14  ;;  %v1371_v33 = vadd.f32 %v1370_v28, %v1369_v27  ;;  %v1346_v34 = vadd.f32 %v1345_v25, %v1344_v15  ;;  %v1363_v36 = vrot.slane %v1362_v26, 4  ;;  %v2022_v14 = vld [vmem:[%s7762_s1 + $0x3c0] sm:$0xff] }
  0x9c   : > { %v1379_v39 = vsel %vm1035_vm0, %v700_v38, 0.0  ;;  %v1330_v41 = vadd.f32 %v1329_v30, %v1328_v19  ;;  %v1355_v43 = vadd.f32 %v1354_v32, %v1353_v21  ;;  %v1387_v49 = vsel %vm1035_vm0, %v668_v62, 0.0  ;;  %v2023_v19 = vld [vmem:[%s7762_s1 + $0x3c8] sm:$0xff]  ;;  %v2006_v20 = vld [vmem:[%s7762_s1 + $0x340] sm:$0xff] }
  0x9d   : > { %v1338_v42 = vrot.slane %v1337_v31, 2  ;;  %v1372_v44 = vrot.slane %v1371_v33, 4  ;;  %v1347_v46 = vrot.slane %v1346_v34, 2  ;;  %v1364_v47 = vadd.f32 %v1363_v36, %v1362_v26  ;;  %v2007_v21 = vld [vmem:[%s7762_s1 + $0x348] sm:$0xff]  ;;  %v319_v28 = vld [vmem:[%s5930_s28 + $0xa0] sm:$0xff] }
  0x9e   : > { %v1380_v48 = vadd.f32 %v1379_v39, %v1378_v37  ;;  %v1856_v35 = vld [vmem:[#allocation2 + $0x40] sm:$0xff]  ;;  %v1331_v40 = vrot.slane %v1330_v41, 1  ;;  %v1356_v50 = vrot.slane %v1355_v43, 2  ;;  %v1388_v55 = vsel %vm1035_vm0, %v702_v12, 0.0 }
  0x9f   : > { %v1339_v45 = vadd.f32 %v1338_v42, %v1337_v31  ;;  %v1373_v51 = vadd.f32 %v1372_v44, %v1371_v33  ;;  %2237 = vmatprep.mubr.f32.mxu1 %v1856_v35  ;;  %2138 = vmatmul.mubr.f32.gmra.mrb[8].mxu0 %v1856_v35  ;;  %v1348_v52 = vadd.f32 %v1347_v46, %v1346_v34  ;;  %v1365_v53 = vrot.slane %v1364_v47, 2  ;;  %v320_v34 = vld [vmem:[%s5930_s28 + $0xa8] sm:$0xff]  ;;  %v321_v42 = vld [vmem:[%s5930_s28 + $0xb0] sm:$0xff] }
  0xa0   : > { %v1381_v54 = vrot.slane %v1380_v48, 4  ;;  %2238 = vmatmul.mubr.f32.gmra.mrb[6].mxu1 %v1848_v7  ;;  %v1332_v56 = vadd.f32 %v1331_v40, %v1330_v41  ;;  %v1357_v58 = vadd.f32 %v1356_v50, %v1355_v43  ;;  %v1389_v0 = vadd.f32 %v1388_v55, %v1387_v49  ;;  %v322_v50 = vld [vmem:[%s5930_s28 + $0xb8] sm:$0xff] }
  0xa1   : > { %v1340_v57 = vrot.slane %v1339_v45, 1  ;;  %v1374_v59 = vrot.slane %v1373_v51, 2  ;;  %v1349_v60 = vrot.slane %v1348_v52, 1  ;;  %v1366_v63 = vadd.f32 %v1365_v53, %v1364_v47 }
  0xa2   : > { %v1382_v62 = vadd.f32 %v1381_v54, %v1380_v48  ;;  %v1358_v22 = vrot.slane %v1357_v58, 1  ;;  %v1644_v38 = vmul.f32 0.25, %v1332_v56  ;;  %v1390_v6 = vrot.slane %v1389_v0, 4 }
  0xa3   : > { %v1341_v2 = vadd.f32 %v1340_v57, %v1339_v45  ;;  %v1375_v23 = vadd.f32 %v1374_v59, %v1373_v51  ;;  %v1350_v3 = vadd.f32 %v1349_v60, %v1348_v52  ;;  %v1367_v4 = vrot.slane %v1366_v63, 1 }
  0xa4   : > { %v1383_v5 = vrot.slane %v1382_v62, 2  ;;  %v1359_v10 = vadd.f32 %v1358_v22, %v1357_v58  ;;  %v5153_v13 = vpack.c.bf16 %v1993_v61, %v1992_v1  ;;  %v1391_v17 = vadd.f32 %v1390_v6, %v1389_v0 }
  0xa5   : > { %v1376_v11 = vrot.slane %v1375_v23, 1  ;;  %v1645_v12 = vmul.f32 0.25, %v1341_v2  ;;  %v1368_v15 = vadd.f32 %v1367_v4, %v1366_v63  ;;  %v1646_v18 = vmul.f32 0.25, %v1350_v3 }
  0xa6   : > { %v1384_v16 = vadd.f32 %v1383_v5, %v1382_v62  ;;  %v1647_v25 = vmul.f32 0.25, %v1359_v10  ;;  %5154 = vmatprep.subr.bf16.mxu0 %v5153_v13  ;;  %v5155_v27 = vpack.c.bf16 %v1977_v9, %v1976_v8  ;;  %v1392_v31 = vrot.slane %v1391_v17, 2 }
  0xa7   : > { %v1377_v24 = vadd.f32 %v1376_v11, %v1375_v23  ;;  %v1775_v26 = vsel %vm1740_vm1, %v1645_v12, %v1644_v38  ;;  %v1648_v32 = vmul.f32 0.25, %v1368_v15  ;;  %v5181_v39 = vpack.c.bf16 %v2023_v19, %v2022_v14 }
  0xa8   : > { %v1385_v30 = vrot.slane %v1384_v16, 1  ;;  %v1776_v33 = vsel %vm1742_vm2, %v1646_v18, %v1775_v26  ;;  %5156 = vmatpush3.bf16.msra.mxu0 %v5155_v27  ;;  %v5183_v41 = vpack.c.bf16 %v2007_v21, %v2006_v20  ;;  %v1393_v44 = vadd.f32 %v1392_v31, %v1391_v17 }
  0xa9   : > { %v1649_v36 = vmul.f32 0.25, %v1377_v24  ;;  %v1777_v37 = vsel %vm1744_vm3, %v1647_v25, %v1776_v33  ;;  %v703_v46 = vcombine.high %v319_v28, %v319_v28  ;;  %5182 = vmatprep.subr.bf16.mxu1 %v5181_v39  ;;  %v710_v48 = vrot.slane %v319_v28, %v5932_v29 }
  0xaa   : > { %v1386_v43 = vadd.f32 %v1385_v30, %v1384_v16  ;;  %v1778_v7 = vsel %vm1746_vm4, %v1648_v32, %v1777_v37  ;;  %v720_v49 = vcombine.high %v320_v34, %v320_v34  ;;  %v727_v35 = vrot.slane %v320_v34, %v5932_v29  ;;  %5184 = vmatpush3.bf16.msra.mxu1 %v5183_v41 }
  0xab   : > { %v1779_v47 = vsel %vm1748_vm5, %v1649_v36, %v1778_v7  ;;  %v1394_v40 = vrot.slane %v1393_v44, 1  ;;  %v717_v51 = vrot.slane %v703_v46, %v5932_v29  ;;  %v737_v52 = vcombine.high %v321_v42, %v321_v42  ;;  %v6323_v7 = vld [vmem:[#allocation2 + $0x42] sm:$0xff] }
  0xac   : > { %v1650_v45 = vmul.f32 0.25, %v1386_v43  ;;  %v718_v53 = vcombine.high %v710_v48, %v710_v48  ;;  %v734_v54 = vrot.slane %v720_v49, %v5932_v29  ;;  %v735_v55 = vcombine.high %v727_v35, %v727_v35 }
  0xad   : > { %v744_v56 = vrot.slane %v321_v42, %v5932_v29  ;;  %v1395_v57 = vadd.f32 %v1394_v40, %v1393_v44  ;;  %v719_v59 = vcombine.high %v717_v51, %v717_v51  ;;  %v751_v60 = vrot.slane %v737_v52, %v5932_v29 }
  0xae   : > { %v1780_v58 = vsel %vm1750_vm6, %v1650_v45, %v1779_v47  ;;  %v736_v63 = vcombine.high %v734_v54, %v734_v54  ;;  %v754_v0 = vcombine.high %v322_v50, %v322_v50  ;;  %v761_v1 = vrot.slane %v322_v50, %v5932_v29 }
  0xaf   : > { %v752_v62 = vcombine.high %v744_v56, %v744_v56  ;;  %v1651_v61 = vmul.f32 0.25, %v1395_v57  ;;  %v753_v2 = vcombine.high %v751_v60, %v751_v60  ;;  %v1396_v22 = vsel %vm1035_vm0, %v710_v48, 0.0 }
  0xb0   : > { %v1397_v23 = vsel %vm1035_vm0, %v744_v56, 0.0  ;;  %v768_v38 = vrot.slane %v754_v0, %v5932_v29  ;;  %v769_v3 = vcombine.high %v761_v1, %v761_v1  ;;  %v1405_v5 = vsel %vm1035_vm0, %v718_v53, 0.0 }
  0xb1   : > { %v1398_v4 = vadd.f32 %v1397_v23, %v1396_v22  ;;  %v6306_v6 = vsel %vm1752_vm7, %v1651_v61, %v1780_v58  ;;  %v1406_v8 = vsel %vm1035_vm0, %v752_v62, 0.0  ;;  %v1414_v9 = vsel %vm1035_vm0, %v717_v51, 0.0  ;;  %v1995_v61 = vld [vmem:[%s7762_s1 + $0x2e8] sm:$0xff] }
  0xb2   : > { %v1415_v10 = vsel %vm1035_vm0, %v751_v60, 0.0  ;;  %v1816_v11 = vsel %vm1811_vm8, %v6306_v6, 0.0  ;;  %v770_v12 = vcombine.high %v768_v38, %v768_v38  ;;  %v1407_v14 = vadd.f32 %v1406_v8, %v1405_v5  ;;  %5614 = vmatprep.mubr.msk.f32.mxu0 %vm1811_vm8, %v6306_v6 }
  0xb3   : > { %v1399_v13 = vrot.slane %v1398_v4, 4  ;;  %1825 = vst [vmem:[#allocation2 + $0x51] sm:$0xff] %v1816_v11  ;;  %v1416_v15 = vadd.f32 %v1415_v10, %v1414_v9  ;;  %v1423_v16 = vsel %vm1035_vm0, %v719_v59, 0.0  ;;  %v1424_v17 = vsel %vm1035_vm0, %v753_v2, 0.0  ;;  %v1978_v9 = vld [vmem:[%s7762_s1 + $0x260] sm:$0xff]  ;;  %v1979_v10 = vld [vmem:[%s7762_s1 + $0x268] sm:$0xff] }
  0xb4   : > { %v1432_v18 = vsel %vm1035_vm0, %v727_v35, 0.0  ;;  %v1408_v20 = vrot.slane %v1407_v14, 4  ;;  %v1425_v21 = vadd.f32 %v1424_v17, %v1423_v16  ;;  %v1433_v24 = vsel %vm1035_vm0, %v761_v1, 0.0  ;;  %v1994_v1 = vld [vmem:[%s7762_s1 + $0x2e0] sm:$0xff] }
  0xb5   : > { %v1400_v19 = vadd.f32 %v1399_v13, %v1398_v4  ;;  %v1417_v25 = vrot.slane %v1416_v15, 4  ;;  %v1434_v26 = vadd.f32 %v1433_v24, %v1432_v18  ;;  %v1441_v27 = vsel %vm1035_vm0, %v735_v55, 0.0  ;;  %v2009_v24 = vld [vmem:[%s7762_s1 + $0x358] sm:$0xff] }
  0xb6   : > { %v1442_v28 = vsel %vm1035_vm0, %v769_v3, 0.0  ;;  %v1409_v31 = vadd.f32 %v1408_v20, %v1407_v14  ;;  %v1426_v32 = vrot.slane %v1425_v21, 4  ;;  %v1450_v37 = vsel %vm1035_vm0, %v734_v54, 0.0  ;;  %v2025_v20 = vld [vmem:[%s7762_s1 + $0x3d8] sm:$0xff] }
  0xb7   : > { %v1401_v30 = vrot.slane %v1400_v19, 2  ;;  %v1443_v33 = vadd.f32 %v1442_v28, %v1441_v27  ;;  %v1418_v34 = vadd.f32 %v1417_v25, %v1416_v15  ;;  %v1435_v36 = vrot.slane %v1434_v26, 4  ;;  %v2024_v15 = vld [vmem:[%s7762_s1 + $0x3d0] sm:$0xff] }
  0xb8   : > { %v1451_v39 = vsel %vm1035_vm0, %v768_v38, 0.0  ;;  %v1410_v42 = vrot.slane %v1409_v31, 2  ;;  %v1427_v43 = vadd.f32 %v1426_v32, %v1425_v21  ;;  %v1459_v49 = vsel %vm1035_vm0, %v736_v63, 0.0  ;;  %v2008_v21 = vld [vmem:[%s7762_s1 + $0x350] sm:$0xff] }
  0xb9   : > { %v1402_v41 = vadd.f32 %v1401_v30, %v1400_v19  ;;  %v1444_v44 = vrot.slane %v1443_v33, 4  ;;  %v1419_v46 = vrot.slane %v1418_v34, 2  ;;  %v1436_v47 = vadd.f32 %v1435_v36, %v1434_v26  ;;  %v323_v30 = vld [vmem:[%s5930_s28 + $0xc0] sm:$0xff]  ;;  %v324_v36 = vld [vmem:[%s5930_s28 + $0xc8] sm:$0xff] }
  0xba   : > { %v1452_v48 = vadd.f32 %v1451_v39, %v1450_v37  ;;  %v6326_v35 = vld [vmem:[#allocation2 + $0x50] sm:$0xff]  ;;  %v1411_v45 = vadd.f32 %v1410_v42, %v1409_v31  ;;  %v1428_v50 = vrot.slane %v1427_v43, 2  ;;  %v1460_v55 = vsel %vm1035_vm0, %v770_v12, 0.0 }
  0xbb   : > { %v1403_v40 = vrot.slane %v1402_v41, 1  ;;  %v1445_v51 = vadd.f32 %v1444_v44, %v1443_v33  ;;  %2242 = vmatprep.mubr.f32.mxu1 %v6326_v35  ;;  %2143 = vmatmul.mubr.f32.gmra.mrb[10].mxu0 %v6326_v35  ;;  %v1420_v52 = vadd.f32 %v1419_v46, %v1418_v34  ;;  %v1437_v53 = vrot.slane %v1436_v47, 2 }
  0xbc   : > { %v1453_v54 = vrot.slane %v1452_v48, 4  ;;  %2243 = vmatmul.mubr.f32.gmra.mrb[8].mxu1 %v6323_v7  ;;  %v1412_v57 = vrot.slane %v1411_v45, 1  ;;  %v1429_v58 = vadd.f32 %v1428_v50, %v1427_v43  ;;  %v1461_v0 = vadd.f32 %v1460_v55, %v1459_v49  ;;  %v325_v43 = vld [vmem:[%s5930_s28 + $0xd0] sm:$0xff] }
  0xbd   : > { %v1404_v56 = vadd.f32 %v1403_v40, %v1402_v41  ;;  %v1446_v59 = vrot.slane %v1445_v51, 2  ;;  %v1421_v60 = vrot.slane %v1420_v52, 1  ;;  %v1438_v63 = vadd.f32 %v1437_v53, %v1436_v47  ;;  %v326_v53 = vld [vmem:[%s5930_s28 + $0xd8] sm:$0xff] }
  0xbe   : > { %v1454_v62 = vadd.f32 %v1453_v54, %v1452_v48  ;;  %v1413_v2 = vadd.f32 %v1412_v57, %v1411_v45  ;;  %v1430_v22 = vrot.slane %v1429_v58, 1  ;;  %v1462_v8 = vrot.slane %v1461_v0, 4 }
  0xbf   : > { %v1447_v23 = vadd.f32 %v1446_v59, %v1445_v51  ;;  %v1652_v38 = vmul.f32 0.25, %v1404_v56  ;;  %v1422_v3 = vadd.f32 %v1421_v60, %v1420_v52  ;;  %v1439_v4 = vrot.slane %v1438_v63, 1 }
  0xc0   : > { %v1455_v5 = vrot.slane %v1454_v62, 2  ;;  %v1431_v11 = vadd.f32 %v1430_v22, %v1429_v58  ;;  %v1653_v13 = vmul.f32 0.25, %v1413_v2  ;;  %v5157_v14 = vpack.c.bf16 %v1995_v61, %v1994_v1 }
  0xc1   : > { %v1448_v12 = vrot.slane %v1447_v23, 1  ;;  %v1440_v16 = vadd.f32 %v1439_v4, %v1438_v63  ;;  %v1463_v18 = vadd.f32 %v1462_v8, %v1461_v0  ;;  %v1654_v19 = vmul.f32 0.25, %v1422_v3 }
  0xc2   : > { %v1456_v17 = vadd.f32 %v1455_v5, %v1454_v62  ;;  %v1655_v26 = vmul.f32 0.25, %v1431_v11  ;;  %v1782_v27 = vsel %vm1740_vm1, %v1653_v13, %v1652_v38  ;;  %5158 = vmatprep.subr.bf16.mxu0 %v5157_v14  ;;  %v5159_v28 = vpack.c.bf16 %v1979_v10, %v1978_v9 }
  0xc3   : > { %v1449_v25 = vadd.f32 %v1448_v12, %v1447_v23  ;;  %v1464_v32 = vrot.slane %v1463_v18, 2  ;;  %v1656_v33 = vmul.f32 0.25, %v1440_v16  ;;  %v1783_v34 = vsel %vm1742_vm2, %v1654_v19, %v1782_v27 }
  0xc4   : > { %v1457_v31 = vrot.slane %v1456_v17, 1  ;;  %v1784_v39 = vsel %vm1744_vm3, %v1655_v26, %v1783_v34  ;;  %5160 = vmatpush3.bf16.msra.mxu0 %v5159_v28  ;;  %v5185_v41 = vpack.c.bf16 %v2025_v20, %v2024_v15  ;;  %v5187_v42 = vpack.c.bf16 %v2009_v24, %v2008_v21 }
  0xc5   : > { %v1657_v37 = vmul.f32 0.25, %v1449_v25  ;;  %v1465_v46 = vadd.f32 %v1464_v32, %v1463_v18  ;;  %v1785_v47 = vsel %vm1746_vm4, %v1656_v33, %v1784_v39  ;;  %v771_v48 = vcombine.high %v323_v30, %v323_v30 }
  0xc6   : > { %v1458_v44 = vadd.f32 %v1457_v31, %v1456_v17  ;;  %5186 = vmatprep.subr.bf16.mxu1 %v5185_v41  ;;  %v778_v40 = vrot.slane %v323_v30, %v5932_v29  ;;  %v788_v45 = vcombine.high %v324_v36, %v324_v36  ;;  %v795_v50 = vrot.slane %v324_v36, %v5932_v29 }
  0xc7   : > { %v1786_v49 = vsel %vm1748_vm5, %v1657_v37, %v1785_v47  ;;  %v1466_v51 = vrot.slane %v1465_v46, 1  ;;  %5188 = vmatpush3.bf16.msra.mxu1 %v5187_v42  ;;  %v785_v54 = vrot.slane %v771_v48, %v5932_v29  ;;  %v805_v55 = vcombine.high %v325_v43, %v325_v43 }
  0xc8   : > { %v1658_v52 = vmul.f32 0.25, %v1458_v44  ;;  %v786_v56 = vcombine.high %v778_v40, %v778_v40  ;;  %v802_v57 = vrot.slane %v788_v45, %v5932_v29  ;;  %v803_v58 = vcombine.high %v795_v50, %v795_v50 }
  0xc9   : > { %v812_v59 = vrot.slane %v325_v43, %v5932_v29  ;;  %v1467_v60 = vadd.f32 %v1466_v51, %v1465_v46  ;;  %v787_v62 = vcombine.high %v785_v54, %v785_v54  ;;  %v819_v0 = vrot.slane %v805_v55, %v5932_v29 }
  0xca   : > { %v1787_v63 = vsel %vm1750_vm6, %v1658_v52, %v1786_v49  ;;  %v804_v1 = vcombine.high %v802_v57, %v802_v57  ;;  %v822_v2 = vcombine.high %v326_v53, %v326_v53  ;;  %v829_v22 = vrot.slane %v326_v53, %v5932_v29 }
  0xcb   : > { %v820_v61 = vcombine.high %v812_v59, %v812_v59  ;;  %v1659_v23 = vmul.f32 0.25, %v1467_v60  ;;  %v821_v38 = vcombine.high %v819_v0, %v819_v0  ;;  %v1468_v3 = vsel %vm1035_vm0, %v778_v40, 0.0  ;;  %v6395_v40 = vld [vmem:[#allocation2 + $0x52] sm:$0xff] }
  0xcc   : > { %v1469_v4 = vsel %vm1035_vm0, %v812_v59, 0.0  ;;  %v836_v5 = vrot.slane %v822_v2, %v5932_v29  ;;  %v837_v8 = vcombine.high %v829_v22, %v829_v22  ;;  %v1477_v10 = vsel %vm1035_vm0, %v786_v56, 0.0 }
  0xcd   : > { %v1470_v9 = vadd.f32 %v1469_v4, %v1468_v3  ;;  %v6378_v11 = vsel %vm1752_vm7, %v1659_v23, %v1787_v63  ;;  %v1478_v12 = vsel %vm1035_vm0, %v820_v61, 0.0  ;;  %v1486_v13 = vsel %vm1035_vm0, %v785_v54, 0.0  ;;  %v1996_v3 = vld [vmem:[%s7762_s1 + $0x2f0] sm:$0xff]  ;;  %v1997_v4 = vld [vmem:[%s7762_s1 + $0x2f8] sm:$0xff] }
  0xce   : > { %v1487_v14 = vsel %vm1035_vm0, %v819_v0, 0.0  ;;  %v1817_v15 = vsel %vm1811_vm8, %v6378_v11, 0.0  ;;  %v838_v16 = vcombine.high %v836_v5, %v836_v5  ;;  %v1479_v18 = vadd.f32 %v1478_v12, %v1477_v10  ;;  %5615 = vmatprep.mubr.msk.f32.mxu0 %vm1811_vm8, %v6378_v11 }
  0xcf   : > { %v1471_v17 = vrot.slane %v1470_v9, 4  ;;  %1826 = vst [vmem:[#allocation2 + $0x61] sm:$0xff] %v1817_v15  ;;  %v1488_v19 = vadd.f32 %v1487_v14, %v1486_v13  ;;  %v1495_v20 = vsel %vm1035_vm0, %v787_v62, 0.0  ;;  %v1496_v21 = vsel %vm1035_vm0, %v821_v38, 0.0 }
  0xd0   : > { %v1504_v24 = vsel %vm1035_vm0, %v795_v50, 0.0  ;;  %v1480_v26 = vrot.slane %v1479_v18, 4  ;;  %v1497_v27 = vadd.f32 %v1496_v21, %v1495_v20  ;;  %v1505_v28 = vsel %vm1035_vm0, %v829_v22, 0.0 }
  0xd1   : > { %v1472_v25 = vadd.f32 %v1471_v17, %v1470_v9  ;;  %v1489_v30 = vrot.slane %v1488_v19, 4  ;;  %v1506_v31 = vadd.f32 %v1505_v28, %v1504_v24  ;;  %v1513_v32 = vsel %vm1035_vm0, %v803_v58, 0.0  ;;  %v1981_v17 = vld [vmem:[%s7762_s1 + $0x278] sm:$0xff]  ;;  %v2026_v24 = vld [vmem:[%s7762_s1 + $0x3e0] sm:$0xff] }
  0xd2   : > { %v1514_v33 = vsel %vm1035_vm0, %v837_v8, 0.0  ;;  %v1481_v36 = vadd.f32 %v1480_v26, %v1479_v18  ;;  %v1498_v37 = vrot.slane %v1497_v27, 4  ;;  %v1522_v43 = vsel %vm1035_vm0, %v802_v57, 0.0 }
  0xd3   : > { %v1473_v34 = vrot.slane %v1472_v25, 2  ;;  %v1515_v39 = vadd.f32 %v1514_v33, %v1513_v32  ;;  %v1490_v41 = vadd.f32 %v1489_v30, %v1488_v19  ;;  %v1507_v42 = vrot.slane %v1506_v31, 4  ;;  %v2027_v30 = vld [vmem:[%s7762_s1 + $0x3e8] sm:$0xff] }
  0xd4   : > { %v1523_v44 = vsel %vm1035_vm0, %v836_v5, 0.0  ;;  %v1482_v47 = vrot.slane %v1481_v36, 2  ;;  %v1499_v48 = vadd.f32 %v1498_v37, %v1497_v27  ;;  %v1531_v52 = vsel %vm1035_vm0, %v804_v1, 0.0  ;;  %v2011_v32 = vld [vmem:[%s7762_s1 + $0x368] sm:$0xff] }
  0xd5   : > { %v1474_v46 = vadd.f32 %v1473_v34, %v1472_v25  ;;  %v1516_v49 = vrot.slane %v1515_v39, 4  ;;  %v1491_v45 = vrot.slane %v1490_v41, 2  ;;  %v1508_v50 = vadd.f32 %v1507_v42, %v1506_v31  ;;  %v2010_v31 = vld [vmem:[%s7762_s1 + $0x360] sm:$0xff] }
  0xd6   : > { %v1524_v51 = vadd.f32 %v1523_v44, %v1522_v43  ;;  %v6398_v53 = vld [vmem:[#allocation2 + $0x60] sm:$0xff]  ;;  %v1483_v55 = vadd.f32 %v1482_v47, %v1481_v36  ;;  %v1500_v56 = vrot.slane %v1499_v48, 2  ;;  %v1532_v63 = vsel %vm1035_vm0, %v838_v16, 0.0  ;;  %v1980_v16 = vld [vmem:[%s7762_s1 + $0x270] sm:$0xff] }
  0xd7   : > { %v1475_v54 = vrot.slane %v1474_v46, 1  ;;  %v1517_v58 = vadd.f32 %v1516_v49, %v1515_v39  ;;  %2247 = vmatprep.mubr.f32.mxu1 %v6398_v53  ;;  %2148 = vmatmul.mubr.f32.gmra.mrb[12].mxu0 %v6398_v53  ;;  %v1492_v57 = vadd.f32 %v1491_v45, %v1490_v41  ;;  %v1509_v59 = vrot.slane %v1508_v50, 2  ;;  %v327_v39 = vld [vmem:[%s5930_s28 + $0xe0] sm:$0xff] }
  0xd8   : > { %v1525_v60 = vrot.slane %v1524_v51, 4  ;;  %2248 = vmatmul.mubr.f32.gmra.mrb[10].mxu1 %v6395_v40  ;;  %v1484_v0 = vrot.slane %v1483_v55, 1  ;;  %v1501_v1 = vadd.f32 %v1500_v56, %v1499_v48  ;;  %v1533_v38 = vadd.f32 %v1532_v63, %v1531_v52 }
  0xd9   : > { %v1476_v62 = vadd.f32 %v1475_v54, %v1474_v46  ;;  %v1518_v61 = vrot.slane %v1517_v58, 2  ;;  %v1493_v2 = vrot.slane %v1492_v57, 1  ;;  %v1510_v22 = vadd.f32 %v1509_v59, %v1508_v50  ;;  %v328_v46 = vld [vmem:[%s5930_s28 + $0xe8] sm:$0xff]  ;;  %v329_v50 = vld [vmem:[%s5930_s28 + $0xf0] sm:$0xff] }
  0xda   : > { %v1526_v23 = vadd.f32 %v1525_v60, %v1524_v51  ;;  %v1485_v5 = vadd.f32 %v1484_v0, %v1483_v55  ;;  %v1502_v8 = vrot.slane %v1501_v1, 1  ;;  %v1534_v15 = vrot.slane %v1533_v38, 4 }
  0xdb   : > { %v1519_v9 = vadd.f32 %v1518_v61, %v1517_v58  ;;  %v1660_v10 = vmul.f32 0.25, %v1476_v62  ;;  %v1494_v12 = vadd.f32 %v1493_v2, %v1492_v57  ;;  %v1511_v13 = vrot.slane %v1510_v22, 1  ;;  %v330_v62 = vld [vmem:[%s5930_s28 + $0xf8] sm:$0xff] }
  0xdc   : > { %v1527_v14 = vrot.slane %v1526_v23, 2  ;;  %v1503_v18 = vadd.f32 %v1502_v8, %v1501_v1  ;;  %v1661_v20 = vmul.f32 0.25, %v1485_v5  ;;  %v5161_v21 = vpack.c.bf16 %v1997_v4, %v1996_v3 }
  0xdd   : > { %v1520_v19 = vrot.slane %v1519_v9, 1  ;;  %v1512_v25 = vadd.f32 %v1511_v13, %v1510_v22  ;;  %v1535_v27 = vadd.f32 %v1534_v15, %v1533_v38  ;;  %v1662_v28 = vmul.f32 0.25, %v1494_v12 }
  0xde   : > { %v1528_v26 = vadd.f32 %v1527_v14, %v1526_v23  ;;  %v1663_v34 = vmul.f32 0.25, %v1503_v18  ;;  %v1789_v36 = vsel %vm1740_vm1, %v1661_v20, %v1660_v10  ;;  %5162 = vmatprep.subr.bf16.mxu0 %v5161_v21  ;;  %v5163_v37 = vpack.c.bf16 %v1981_v17, %v1980_v16 }
  0xdf   : > { %v1521_v33 = vadd.f32 %v1520_v19, %v1519_v9  ;;  %v1536_v42 = vrot.slane %v1535_v27, 2  ;;  %v1664_v43 = vmul.f32 0.25, %v1512_v25  ;;  %v1790_v44 = vsel %vm1742_vm2, %v1662_v28, %v1789_v36 }
  0xe0   : > { %v1529_v41 = vrot.slane %v1528_v26, 1  ;;  %v1791_v48 = vsel %vm1744_vm3, %v1663_v34, %v1790_v44  ;;  %5164 = vmatpush3.bf16.msra.mxu0 %v5163_v37  ;;  %v5189_v49 = vpack.c.bf16 %v2027_v30, %v2026_v24  ;;  %v5191_v45 = vpack.c.bf16 %v2011_v32, %v2010_v31 }
  0xe1   : > { %v1665_v47 = vmul.f32 0.25, %v1521_v33  ;;  %v1537_v52 = vadd.f32 %v1536_v42, %v1535_v27  ;;  %v1792_v54 = vsel %vm1746_vm4, %v1664_v43, %v1791_v48  ;;  %v839_v55 = vcombine.high %v327_v39, %v327_v39 }
  0xe2   : > { %v1530_v51 = vadd.f32 %v1529_v41, %v1528_v26  ;;  %5190 = vmatprep.subr.bf16.mxu1 %v5189_v49  ;;  %v846_v58 = vrot.slane %v327_v39, %v5932_v29  ;;  %v856_v57 = vcombine.high %v328_v46, %v328_v46  ;;  %v863_v59 = vrot.slane %v328_v46, %v5932_v29 }
  0xe3   : > { %v1793_v56 = vsel %vm1748_vm5, %v1665_v47, %v1792_v54  ;;  %v1538_v60 = vrot.slane %v1537_v52, 1  ;;  %5192 = vmatpush3.bf16.msra.mxu1 %v5191_v45  ;;  %v853_v0 = vrot.slane %v839_v55, %v5932_v29  ;;  %v873_v1 = vcombine.high %v329_v50, %v329_v50 }
  0xe4   : > { %v1666_v63 = vmul.f32 0.25, %v1530_v51  ;;  %v854_v61 = vcombine.high %v846_v58, %v846_v58  ;;  %v870_v2 = vrot.slane %v856_v57, %v5932_v29  ;;  %v871_v22 = vcombine.high %v863_v59, %v863_v59 }
  0xe5   : > { %v880_v23 = vrot.slane %v329_v50, %v5932_v29  ;;  %v1539_v38 = vadd.f32 %v1538_v60, %v1537_v52  ;;  %v855_v4 = vcombine.high %v853_v0, %v853_v0  ;;  %v887_v5 = vrot.slane %v873_v1, %v5932_v29  ;;  %v1869_v1 = vld [vmem:[#allocation2 + $0x12] sm:$0xff] }
  0xe6   : > { %v1794_v3 = vsel %vm1750_vm6, %v1666_v63, %v1793_v56  ;;  %v872_v8 = vcombine.high %v870_v2, %v870_v2  ;;  %v890_v10 = vcombine.high %v330_v62, %v330_v62  ;;  %v897_v12 = vrot.slane %v330_v62, %v5932_v29 }
  0xe7   : > { %v888_v9 = vcombine.high %v880_v23, %v880_v23  ;;  %v1667_v13 = vmul.f32 0.25, %v1539_v38  ;;  %v889_v14 = vcombine.high %v887_v5, %v887_v5  ;;  %v1540_v15 = vsel %vm1035_vm0, %v846_v58, 0.0 }
  0xe8   : > { %v1541_v16 = vsel %vm1035_vm0, %v880_v23, 0.0  ;;  %v904_v17 = vrot.slane %v890_v10, %v5932_v29  ;;  %v905_v18 = vcombine.high %v897_v12, %v897_v12  ;;  %v1549_v20 = vsel %vm1035_vm0, %v854_v61, 0.0 }
  0xe9   : > { %v1542_v19 = vadd.f32 %v1541_v16, %v1540_v15  ;;  %v6450_v21 = vsel %vm1752_vm7, %v1667_v13, %v1794_v3  ;;  %v1550_v24 = vsel %vm1035_vm0, %v888_v9, 0.0  ;;  %v1558_v25 = vsel %vm1035_vm0, %v853_v0, 0.0 }
  0xea   : > { %v1559_v26 = vsel %vm1035_vm0, %v887_v5, 0.0  ;;  %v1818_v27 = vsel %vm1811_vm8, %v6450_v21, 0.0  ;;  %v906_v28 = vcombine.high %v904_v17, %v904_v17  ;;  %v1551_v31 = vadd.f32 %v1550_v24, %v1549_v20  ;;  %5616 = vmatprep.mubr.msk.f32.mxu0 %vm1811_vm8, %v6450_v21  ;;  %v2031_v20 = vld [vmem:[%s7762_s1 + $0x408] sm:$0xff] }
  0xeb   : > { %v1543_v30 = vrot.slane %v1542_v19, 4  ;;  %1827 = vst [vmem:[#allocation2 + $0x71] sm:$0xff] %v1818_v27  ;;  %v1560_v29 = vadd.f32 %v1559_v26, %v1558_v25  ;;  %v1567_v32 = vsel %vm1035_vm0, %v855_v4, 0.0  ;;  %v1568_v33 = vsel %vm1035_vm0, %v889_v14, 0.0  ;;  %v1861_v14 = vld [vmem:[#allocation2 + $0x11] sm:$0xff]  ;;  %v6482_v24 = vld [vmem:[#allocation2 + $0x22] sm:$0xff] }
  0xec   : > { %v1576_v34 = vsel %vm1035_vm0, %v863_v59, 0.0  ;;  %v1552_v37 = vrot.slane %v1551_v31, 4  ;;  %v1569_v39 = vadd.f32 %v1568_v33, %v1567_v32  ;;  %v1577_v41 = vsel %vm1035_vm0, %v897_v12, 0.0  ;;  %v6467_v59 = vld [vmem:[#allocation2 + $0x62] sm:$0xff]  ;;  %v2028_v33 = vld [vmem:[%s7762_s1 + $0x3f0] sm:$0xff] }
  0xed   : > { %v1544_v36 = vadd.f32 %v1543_v30, %v1542_v19  ;;  %v1561_v42 = vrot.slane %v1560_v29, 4  ;;  %v1578_v43 = vadd.f32 %v1577_v41, %v1576_v34  ;;  %v1585_v44 = vsel %vm1035_vm0, %v871_v22, 0.0  ;;  %v2030_v19 = vld [vmem:[%s7762_s1 + $0x400] sm:$0xff]  ;;  %v2029_v34 = vld [vmem:[%s7762_s1 + $0x3f8] sm:$0xff] }
  0xee   : > { %v1586_v46 = vsel %vm1035_vm0, %v905_v18, 0.0  ;;  %v1553_v48 = vadd.f32 %v1552_v37, %v1551_v31  ;;  %v1570_v49 = vrot.slane %v1569_v39, 4  ;;  %v1594_v52 = vsel %vm1035_vm0, %v870_v2, 0.0 }
  0xef   : > { %v1545_v47 = vrot.slane %v1544_v36, 2  ;;  %v1587_v45 = vadd.f32 %v1586_v46, %v1585_v44  ;;  %v1562_v50 = vadd.f32 %v1561_v42, %v1560_v29  ;;  %v1579_v51 = vrot.slane %v1578_v43, 4  ;;  %v2012_v42 = vld [vmem:[%s7762_s1 + $0x370] sm:$0xff] }
  0xf0   : > { %v1595_v54 = vsel %vm1035_vm0, %v904_v17, 0.0  ;;  %v1554_v56 = vrot.slane %v1553_v48, 2  ;;  %v1571_v58 = vadd.f32 %v1570_v49, %v1569_v39  ;;  %v1603_v0 = vsel %vm1035_vm0, %v872_v8, 0.0  ;;  %v6497_v49 = vld [vmem:[#allocation2 + $0x21] sm:$0xff] }
  0xf1   : > { %v1546_v55 = vadd.f32 %v1545_v47, %v1544_v36  ;;  %v1588_v57 = vrot.slane %v1587_v45, 4  ;;  %v1563_v60 = vrot.slane %v1562_v50, 2  ;;  %v1580_v63 = vadd.f32 %v1579_v51, %v1578_v43  ;;  %v2013_v43 = vld [vmem:[%s7762_s1 + $0x378] sm:$0xff] }
  0xf2   : > { %v1596_v62 = vadd.f32 %v1595_v54, %v1594_v52  ;;  %v6470_v61 = vld [vmem:[#allocation2 + $0x70] sm:$0xff]  ;;  %v1555_v23 = vadd.f32 %v1554_v56, %v1553_v48  ;;  %v1572_v38 = vrot.slane %v1571_v58, 2  ;;  %v1604_v9 = vsel %vm1035_vm0, %v906_v28, 0.0 }
  0xf3   : > { %v1547_v22 = vrot.slane %v1546_v55, 1  ;;  %v1589_v2 = vadd.f32 %v1588_v57, %v1587_v45  ;;  %2252 = vmatprep.mubr.f32.mxu1 %v6470_v61  ;;  %2153 = vmatmul.mubr.f32.gmra.mrb[14].mxu0 %v6470_v61  ;;  %v1564_v3 = vadd.f32 %v1563_v60, %v1562_v50  ;;  %v1581_v4 = vrot.slane %v1580_v63, 2  ;;  %v2032_v45 = vld [vmem:[%s7762_s1 + $0x410] sm:$0xff]  ;;  %v2033_v50 = vld [vmem:[%s7762_s1 + $0x418] sm:$0xff]  ;;  %v2035_v57 = vld [vmem:[%s7762_s1 + $0x428] sm:$0xff] }
  0xf4   : > { %v1597_v5 = vrot.slane %v1596_v62, 4  ;;  %2253 = vmatmul.mubr.f32.gmra.mrb[12].mxu1 %v6467_v59  ;;  %v1556_v8 = vrot.slane %v1555_v23, 1  ;;  %v1573_v12 = vadd.f32 %v1572_v38, %v1571_v58  ;;  %2327 = vmatprep.mubr.f32.mxu0 %v1869_v1  ;;  %v1605_v18 = vadd.f32 %v1604_v9, %v1603_v0  ;;  %v6506_v56 = vld [vmem:[#allocation2 + $0x32] sm:$0xff]  ;;  %v2034_v58 = vld [vmem:[%s7762_s1 + $0x420] sm:$0xff] }
  0xf5   : > { %v1548_v10 = vadd.f32 %v1547_v22, %v1546_v55  ;;  %v1590_v13 = vrot.slane %v1589_v2, 2  ;;  %v1565_v15 = vrot.slane %v1564_v3, 1  ;;  %v1582_v16 = vadd.f32 %v1581_v4, %v1580_v63 }
  0xf6   : > { %v1598_v17 = vadd.f32 %v1597_v5, %v1596_v62  ;;  %v1557_v25 = vadd.f32 %v1556_v8, %v1555_v23  ;;  %v1574_v26 = vrot.slane %v1573_v12, 1  ;;  %v1606_v32 = vrot.slane %v1605_v18, 4  ;;  %v1887_v5 = vld [vmem:[#allocation2 + $0x31] sm:$0xff] }
  0xf7   : > { %v1591_v27 = vadd.f32 %v1590_v13, %v1589_v2  ;;  %v1668_v28 = vmul.f32 0.25, %v1548_v10  ;;  %v1566_v30 = vadd.f32 %v1565_v15, %v1564_v3  ;;  %v1583_v31 = vrot.slane %v1582_v16, 1  ;;  %2328 = vmatmul.mubr.f32.vlgmr.msra.gmra.mrb[16].mxu0 %v1861_v14  ;;  %v2036_v10 = vld [vmem:[%s7762_s1 + $0x430] sm:$0xff]  ;;  %v2037_v8 = vld [vmem:[%s7762_s1 + $0x438] sm:$0xff] }
  0xf8   : > { %v1599_v29 = vrot.slane %v1598_v17, 2  ;;  %v1575_v36 = vadd.f32 %v1574_v26, %v1573_v12  ;;  %v1669_v39 = vmul.f32 0.25, %v1557_v25  ;;  %v5197_v41 = vpack.c.bf16 %v2031_v20, %v2030_v19  ;;  %2332 = vmatprep.mubr.f32.mxu0 %v6482_v24  ;;  %v1888_v20 = vld [vmem:[#allocation2 + $0x41] sm:$0xff] }
  0xf9   : > { %v1592_v37 = vrot.slane %v1591_v27, 1  ;;  %v1584_v44 = vadd.f32 %v1583_v31, %v1582_v16  ;;  %v1607_v47 = vadd.f32 %v1606_v32, %v1605_v18  ;;  %v1670_v48 = vmul.f32 0.25, %v1566_v30  ;;  %v2038_v25 = vld [vmem:[%s7762_s1 + $0x440] sm:$0xff]  ;;  %v2039_v26 = vld [vmem:[%s7762_s1 + $0x448] sm:$0xff] }
  0xfa   : > { %v1600_v46 = vadd.f32 %v1599_v29, %v1598_v17  ;;  %v1671_v52 = vmul.f32 0.25, %v1575_v36  ;;  %v1796_v54 = vsel %vm1740_vm1, %v1669_v39, %v1668_v28  ;;  %5198 = vmatprep.subr.bf16.mxu0 %v5197_v41  ;;  %v5193_v55 = vpack.c.bf16 %v2029_v34, %v2028_v33  ;;  %v2041_v29 = vld [vmem:[%s7762_s1 + $0x458] sm:$0xff]  ;;  %v2042_v34 = vld [vmem:[%s7762_s1 + $0x460] sm:$0xff]  ;;  %v2043_v36 = vld [vmem:[%s7762_s1 + $0x468] sm:$0xff] }
  0xfb   : > { %v1593_v51 = vadd.f32 %v1592_v37, %v1591_v27  ;;  %v1608_v63 = vrot.slane %v1607_v47, 2  ;;  %v1672_v62 = vmul.f32 0.25, %v1584_v44  ;;  %v1797_v0 = vsel %vm1742_vm2, %v1670_v48, %v1796_v54  ;;  %5200 = vmatpush3.bf16.msra.mxu0 %v5197_v41  ;;  %v4225_v12 = vpop.f32.mrb[0].mxu0  ;;  %v1852_v37 = vld [vmem:[#allocation2 + $0x72] sm:$0xff] }
  0xfc   : > { %v1601_v60 = vrot.slane %v1600_v46, 1  ;;  %v1798_v22 = vsel %vm1744_vm3, %v1671_v52, %v1797_v0  ;;  %5194 = vmatprep.subr.bf16.mxu1 %v5193_v55  ;;  %v5195_v23 = vpack.c.bf16 %v2013_v43, %v2012_v42  ;;  %v5201_v38 = vpack.c.bf16 %v2033_v50, %v2032_v45  ;;  %2333 = vmatmul.mubr.f32.gmra.mrb[18].mxu0 %v6497_v49  ;;  %v4226_v13 = vpop.f32.mrb[1].mxu0  ;;  %v2044_v41 = vld [vmem:[%s7762_s1 + $0x470] sm:$0xff]  ;;  %v2045_v42 = vld [vmem:[%s7762_s1 + $0x478] sm:$0xff]  ;;  %v1896_v45 = vld [vmem:[#allocation2 + $0x42] sm:$0xff] }
  0xfd   : > { %v1673_v1 = vmul.f32 0.25, %v1593_v51  ;;  %v1609_v3 = vadd.f32 %v1608_v63, %v1607_v47  ;;  %v1799_v4 = vsel %vm1746_vm4, %v1672_v62, %v1798_v22  ;;  %2337 = vmatprep.mubr.f32.mxu0 %v6506_v56  ;;  %v5205_v9 = vpack.c.bf16 %v2035_v57, %v2034_v58  ;;  %v1878_v47 = vld [vmem:[#allocation2 + $0x20] sm:$0xff]  ;;  %v1879_v48 = vld [vmem:[#allocation2 + $0x30] sm:$0xff] }
  0xfe   : > { %v1602_v2 = vadd.f32 %v1601_v60, %v1600_v46  ;;  %5196 = vmatpush3.bf16.msra.mxu1 %v5195_v23  ;;  %5202 = vmatprep.subr.bf16.mxu0 %v5201_v38  ;;  %v5209_v17 = vpack.c.bf16 %v2037_v8, %v2036_v10  ;;  %v6526_v18 = vadd.f32 %v4226_v13, %v4225_v12  ;;  %v6575_v50 = vld [vmem:[%s7763_s2] ss:$0 sm:$0xff]  ;;  %v2667_v12 = vld [vmem:[%s7764_s3 + $0x8] sm:$0xff] }
  0xff   : > { %v1610_v14 = vrot.slane %v1609_v3, 1  ;;  %v1800_v16 = vsel %vm1748_vm5, %v1673_v1, %v1799_v4  ;;  %5204 = vmatpush3.bf16.msra.mxu0 %v5201_v38  ;;  %v5213_v30 = vpack.c.bf16 %v2039_v26, %v2038_v25  ;;  %v5221_v39 = vpack.c.bf16 %v2043_v36, %v2042_v34  ;;  %v2666_v8 = vld [vmem:[%s7764_s3] sm:$0xff]  ;;  %v2687_v25 = vld [vmem:[%s7764_s3 + $0xa8] sm:$0xff]  ;;  %v2688_v36 = vld [vmem:[%s7764_s3 + $0xb0] sm:$0xff] }
 0x100   : > { %v1674_v15 = vmul.f32 0.25, %v1602_v2  ;;  %5206 = vmatprep.subr.bf16.mxu0 %v5205_v9  ;;  %2338 = vmatmul.mubr.f32.gmra.mrb[20].mxu0 %v1887_v5  ;;  %v5225_v46 = vpack.c.bf16 %v2045_v42, %v2044_v41  ;;  %v5231_v13 = vpack.c.bf16 %v2667_v12, %v2666_v8  ;;  %v2672_v41 = vld [vmem:[%s7764_s3 + $0x30] sm:$0xff]  ;;  %v2673_v42 = vld [vmem:[%s7764_s3 + $0x38] sm:$0xff] }
 0x101   : > { %v1611_v19 = vadd.f32 %v1610_v14, %v1609_v3  ;;  %2342 = vmatprep.mubr.f32.mxu0 %v6323_v7  ;;  %v2040_v7 = vld [vmem:[%s7762_s1 + $0x450] sm:$0xff]  ;;  %v2721_v8 = vld [vmem:[%s7764_s3 + $0x1b8] sm:$0xff] }
 0x102   : > { %v1801_v27 = vsel %vm1750_vm6, %v1674_v15, %v1800_v16  ;;  %v5217_v33 = vpack.c.bf16 %v2041_v29, %v2040_v7  ;;  %v2684_v14 = vld [vmem:[%s7764_s3 + $0x90] sm:$0xff]  ;;  %v2685_v15 = vld [vmem:[%s7764_s3 + $0x98] sm:$0xff] }
 0x103   : > { %v1675_v28 = vmul.f32 0.25, %v1611_v19  ;;  %5208 = vmatpush3.bf16.msra.mxu0 %v5205_v9  ;;  %v2683_v9 = vld [vmem:[%s7764_s3 + $0x88] sm:$0xff]  ;;  %v5233_v16 = vpack.c.bf16 %v2685_v15, %v2684_v14  ;;  %v2704_v14 = vld [vmem:[%s7764_s3 + $0x130] sm:$0xff]  ;;  %v2705_v15 = vld [vmem:[%s7764_s3 + $0x138] sm:$0xff] }
 0x104   : > { %5210 = vmatprep.subr.bf16.mxu0 %v5209_v17  ;;  %2343 = vmatmul.mubr.f32.gmra.mrb[22].mxu0 %v1888_v20 }
 0x105   : > { %v6537_v31 = vsel %vm1752_vm7, %v1675_v28, %v1801_v27  ;;  %2347 = vmatprep.mubr.f32.mxu0 %v6395_v40  ;;  %v2670_v27 = vld [vmem:[%s7764_s3 + $0x20] sm:$0xff]  ;;  %v2671_v28 = vld [vmem:[%s7764_s3 + $0x28] sm:$0xff] }
 0x106   : > { %v1819_v32 = vsel %vm1811_vm8, %v6537_v31, 0.0  ;;  %v5239_v7 = vpack.c.bf16 %v2671_v28, %v2670_v27  ;;  %v2723_v27 = vld [vmem:[%s7764_s3 + $0x1c8] sm:$0xff] }
 0x107   : > { %1828 = vst [vmem:[#allocation2 + $0x81] sm:$0xff] %v1819_v32  ;;  %5212 = vmatpush3.bf16.msra.mxu0 %v5209_v17  ;;  %v2668_v17 = vld [vmem:[%s7764_s3 + $0x10] sm:$0xff]  ;;  %v2698_v32 = vld [vmem:[%s7764_s3 + $0x100] sm:$0xff] }
 0x108   : > { %5214 = vmatprep.subr.bf16.mxu0 %v5213_v30  ;;  %5617 = vmatmul.mubr.msk.f32.gmra.mrb[24].mxu0 %vm1811_vm8, %v6306_v6 }
 0x109   : > { %2352 = vmatprep.mubr.f32.mxu0 %v6467_v59 }
 0x10b   : > { %5216 = vmatpush3.bf16.msra.mxu0 %v5213_v30  ;;  %v2714_v30 = vld [vmem:[%s7764_s3 + $0x180] sm:$0xff] }
 0x10c   : > { %5218 = vmatprep.subr.bf16.mxu0 %v5217_v33  ;;  %5618 = vmatmul.mubr.msk.f32.gmra.mrb[26].mxu0 %vm1811_vm8, %v6378_v11 }
 0x10d   : > { %2357 = vmatprep.mubr.f32.mxu0 %v1852_v37 }
 0x10e   : > { %v1860_v43 = vld [vmem:[#allocation2 + $0x80] sm:$0xff] }
 0x10f   : > { %2257 = vmatprep.mubr.f32.mxu1 %v1860_v43  ;;  %5220 = vmatpush3.bf16.msra.mxu0 %v5217_v33  ;;  %v1876_v44 = vld [vmem:[#allocation2 + $0x82] sm:$0xff] }
 0x110   : > { %2258 = vmatmul.mubr.f32.gmra.mrb[14].mxu1 %v1852_v37  ;;  %5222 = vmatprep.subr.bf16.mxu0 %v5221_v39  ;;  %v2699_v33 = vld [vmem:[%s7764_s3 + $0x108] sm:$0xff] }
 0x111   : > { %2432 = vmatprep.mubr.f32.mxu1 %v6497_v49  ;;  %5619 = vmatmul.mubr.msk.f32.gmra.mrb[28].mxu0 %vm1811_vm8, %v6450_v21  ;;  %v1880_v49 = vld [vmem:[#allocation2 + $0x40] sm:$0xff]  ;;  %v5263_v34 = vpack.c.bf16 %v2699_v33, %v2698_v32  ;;  %v2696_v32 = vld [vmem:[%s7764_s3 + $0xf0] sm:$0xff]  ;;  %v2697_v33 = vld [vmem:[%s7764_s3 + $0xf8] sm:$0xff] }
 0x112   : > { %2362 = vmatprep.mubr.f32.mxu0 %v1876_v44 }
 0x113   : > { %5224 = vmatpush3.bf16.msra.mxu0 %v5221_v39 }
 0x114   : > { %2433 = vmatmul.mubr.f32.vlgmr.msra.gmra.mrb[16].mxu1 %v1878_v47  ;;  %5226 = vmatprep.subr.bf16.mxu0 %v5225_v46  ;;  %v5243_v47 = vpack.c.bf16 %v2673_v42, %v2672_v41  ;;  %v2725_v41 = vld [vmem:[%s7764_s3 + $0x1d8] sm:$0xff] }
 0x115   : > { %2437 = vmatprep.mubr.f32.mxu1 %v1887_v5  ;;  %5620 = vmatmul.mubr.msk.f32.gmra.mrb[30].mxu0 %vm1811_vm8, %v6537_v31  ;;  %v2682_v5 = vld [vmem:[%s7764_s3 + $0x80] sm:$0xff] }
 0x116   : > { %4969 = vmatprep.mubr.f32.mxu0 %v6482_v24  ;;  %v5229_v10 = vpack.c.bf16 %v2683_v9, %v2682_v5  ;;  %v2676_v5 = vld [vmem:[%s7764_s3 + $0x50] sm:$0xff]  ;;  %v2677_v9 = vld [vmem:[%s7764_s3 + $0x58] sm:$0xff] }
 0x117   : > { %5228 = vmatpush3.bf16.msra.mxu0 %v5225_v46  ;;  %v2717_v46 = vld [vmem:[%s7764_s3 + $0x198] sm:$0xff]  ;;  %v5251_v12 = vpack.c.bf16 %v2677_v9, %v2676_v5  ;;  %v2778_v5 = vld [vmem:[%s7764_s3 + $0x380] sm:$0xff] }
 0x118   : > { %2438 = vmatmul.mubr.f32.gmra.mrb[18].mxu1 %v1879_v48  ;;  %5230 = vmatprep.subr.bf16.mxu1 %v5229_v10  ;;  %v2720_v10 = vld [vmem:[%s7764_s3 + $0x1b0] sm:$0xff] }
 0x119   : > { %2442 = vmatprep.mubr.f32.mxu1 %v1888_v20  ;;  %5232 = vmatpush3.bf16.msra.mxu1 %v5231_v13  ;;  %v2686_v20 = vld [vmem:[%s7764_s3 + $0xa0] sm:$0xff]  ;;  %v5273_v13 = vpack.c.bf16 %v2721_v8, %v2720_v10 }
 0x11a   : > { %4970 = vmatmul.mubr.f32.vlgmr.msra.gmra.mrb[32].mxu0 %v6506_v56  ;;  %v2120_v56 = vadd.f32 %v6526_v18, %v6575_v50  ;;  %v2669_v18 = vld [vmem:[%s7764_s3 + $0x18] sm:$0xff]  ;;  %5234 = vmatprep.subr.bf16.mxu1 %v5233_v16  ;;  %v5237_v26 = vpack.c.bf16 %v2687_v25, %v2686_v20  ;;  %v5275_v16 = vpack.c.bf16 %v2705_v15, %v2704_v14  ;;  %v2678_v20 = vld [vmem:[%s7764_s3 + $0x60] sm:$0xff]  ;;  %v2679_v25 = vld [vmem:[%s7764_s3 + $0x68] sm:$0xff] }
 0x11b   : > { %4972 = vmatprep.mubr.f32.mxu0 %v1896_v45  ;;  %v5235_v19 = vpack.c.bf16 %v2669_v18, %v2668_v17  ;;  %v2694_v17 = vld [vmem:[%s7764_s3 + $0xe0] sm:$0xff]  ;;  %v2695_v18 = vld [vmem:[%s7764_s3 + $0xe8] sm:$0xff]  ;;  %v5255_v28 = vpack.c.bf16 %v2679_v25, %v2678_v20 }
 0x11c   : > { %2443 = vmatmul.mubr.f32.gmra.mrb[20].mxu1 %v1880_v49 }
 0x11d   : > { %v4228_v51 = vpop.f32.mrb[2].mxu0  ;;  %5621 = vmatprep.mubr.msk.f32.mxu1 %vm1811_vm8, %v6306_v6  ;;  %v1901_v6 = vld [vmem:[#allocation2 + $0x92] sm:$0xff]  ;;  %5236 = vmatpush3.bf16.msra.mxu1 %v5235_v19  ;;  %v5253_v19 = vpack.c.bf16 %v2695_v18, %v2694_v17  ;;  %v2751_v17 = vld [vmem:[%s7764_s3 + $0x2a8] sm:$0xff]  ;;  %v2734_v18 = vld [vmem:[%s7764_s3 + $0x220] sm:$0xff] }
 0x11e   : > { %v4281_v52 = vpop.f32.mrb[0].mxu1  ;;  %v4229_v24 = vpop.f32.mrb[3].mxu0  ;;  %4973 = vmatmul.mubr.f32.gmra.mrb[34].mxu0 %v6395_v40  ;;  %5238 = vmatprep.subr.bf16.mxu1 %v5237_v26  ;;  %v2722_v26 = vld [vmem:[%s7764_s3 + $0x1c0] sm:$0xff] }
 0x11f   : > { %v4230_v54 = vadd.f32 %v4229_v24, %v4228_v51  ;;  %v4282_v55 = vpop.f32.mrb[1].mxu1  ;;  %4975 = vmatprep.mubr.f32.mxu0 %v6467_v59  ;;  %v2700_v51 = vld [vmem:[%s7764_s3 + $0x110] sm:$0xff] }
 0x120   : > { %v4283_v58 = vadd.f32 %v4282_v55, %v4281_v52  ;;  %2448 = vmatmul.mubr.f32.gmra.mrb[22].mxu1 %v6326_v35  ;;  %v1893_v35 = vld [vmem:[#allocation2 + $0x91] sm:$0xff] }
 0x121   : > { %5622 = vmatprep.mubr.msk.f32.mxu1 %vm1811_vm8, %v6378_v11  ;;  %v6594_v11 = vld [vmem:[#allocation2] sm:$0xff]  ;;  %5240 = vmatpush3.bf16.msra.mxu1 %v5239_v7  ;;  %v2701_v52 = vld [vmem:[%s7764_s3 + $0x118] sm:$0xff]  ;;  %v2707_v7 = vld [vmem:[%s7764_s3 + $0x148] sm:$0xff] }
 0x122   : > { %v6586_v57 = vadd.f32 %v4283_v58, %v2120_v56  ;;  %4976 = vmatmul.mubr.f32.gmra.mrb[36].mxu0 %v1852_v37  ;;  %v2689_v37 = vld [vmem:[%s7764_s3 + $0xb8] sm:$0xff]  ;;  %v5267_v55 = vpack.c.bf16 %v2701_v52, %v2700_v51  ;;  %v2690_v56 = vld [vmem:[%s7764_s3 + $0xc0] sm:$0xff]  ;;  %v2691_v58 = vld [vmem:[%s7764_s3 + $0xc8] sm:$0xff] }
 0x123   : > { %4978 = vmatprep.mubr.f32.mxu0 %v1876_v44  ;;  %v5241_v39 = vpack.c.bf16 %v2689_v37, %v2688_v36  ;;  %v2716_v44 = vld [vmem:[%s7764_s3 + $0x190] sm:$0xff]  ;;  %v2681_v37 = vld [vmem:[%s7764_s3 + $0x78] sm:$0xff]  ;;  %v2711_v52 = vld [vmem:[%s7764_s3 + $0x168] sm:$0xff] }
 0x124   : > { %2453 = vmatmul.mubr.f32.gmra.mrb[24].mxu1 %v6398_v53  ;;  %v5265_v49 = vpack.c.bf16 %v2717_v46, %v2716_v44  ;;  %v2680_v36 = vld [vmem:[%s7764_s3 + $0x70] sm:$0xff]  ;;  %v2709_v46 = vld [vmem:[%s7764_s3 + $0x158] sm:$0xff] }
 0x125   : > { %5623 = vmatprep.mubr.msk.f32.mxu1 %vm1811_vm8, %v6450_v21  ;;  %v2125_v21 = vadd.f32 %v4230_v54, %v6575_v50  ;;  %5242 = vmatprep.subr.bf16.mxu1 %v5241_v39  ;;  %v2724_v39 = vld [vmem:[%s7764_s3 + $0x1d0] sm:$0xff]  ;;  %v5259_v42 = vpack.c.bf16 %v2681_v37, %v2680_v36  ;;  %v2738_v37 = vld [vmem:[%s7764_s3 + $0x240] sm:$0xff] }
 0x126   : > { %4979 = vmatmul.mubr.f32.gmra.mrb[38].mxu0 %v1901_v6  ;;  %5244 = vmatpush3.bf16.msra.mxu1 %v5243_v47  ;;  %v2708_v44 = vld [vmem:[%s7764_s3 + $0x150] sm:$0xff] }
 0x127   : > { %v5283_v47 = vpack.c.bf16 %v2709_v46, %v2708_v44  ;;  %v2740_v46 = vld [vmem:[%s7764_s3 + $0x250] sm:$0xff] }
 0x128   : > { %2458 = vmatmul.mubr.f32.gmra.mrb[26].mxu1 %v6470_v61 }
 0x129   : > { %5624 = vmatprep.mubr.msk.f32.mxu1 %vm1811_vm8, %v6537_v31  ;;  %v2715_v31 = vld [vmem:[%s7764_s3 + $0x188] sm:$0xff] }
 0x12a   : > { %v5261_v29 = vpack.c.bf16 %v2715_v31, %v2714_v30  ;;  %v5277_v30 = vpack.c.bf16 %v2723_v27, %v2722_v26  ;;  %v2706_v31 = vld [vmem:[%s7764_s3 + $0x140] sm:$0xff]  ;;  %v2735_v26 = vld [vmem:[%s7764_s3 + $0x228] sm:$0xff] }
 0x12b   : > { %v5303_v27 = vpack.c.bf16 %v2735_v26, %v2734_v18 }
 0x12c   : > { %2463 = vmatmul.mubr.f32.gmra.mrb[28].mxu1 %v1860_v43  ;;  %5262 = vmatprep.subr.bf16.mxu0 %v5261_v29  ;;  %v5279_v29 = vpack.c.bf16 %v2707_v7, %v2706_v31  ;;  %v2736_v31 = vld [vmem:[%s7764_s3 + $0x230] sm:$0xff]  ;;  %v2737_v7 = vld [vmem:[%s7764_s3 + $0x238] sm:$0xff] }
 0x12d   : > { %2467 = vmatprep.mubr.f32.mxu1 %v1893_v35  ;;  %5264 = vmatpush3.bf16.msra.mxu0 %v5263_v34  ;;  %v5257_v34 = vpack.c.bf16 %v2697_v33, %v2696_v32  ;;  %v5307_v32 = vpack.c.bf16 %v2737_v7, %v2736_v31  ;;  %v2754_v33 = vld [vmem:[%s7764_s3 + $0x2c0] sm:$0xff] }
 0x12e   : > { %5266 = vmatprep.subr.bf16.mxu0 %v5265_v49  ;;  %v2710_v49 = vld [vmem:[%s7764_s3 + $0x160] sm:$0xff] }
 0x130   : > { %2468 = vmatmul.mubr.f32.gmra.mrb[30].mxu1 %v6594_v11 }
 0x131   : > { %5268 = vmatpush3.bf16.msra.mxu0 %v5267_v55  ;;  %v2746_v55 = vld [vmem:[%s7764_s3 + $0x280] sm:$0xff] }
 0x139   : > { %v4231_v40 = vpop.f32.mrb[4].mxu0 }
 0x13a   : > { %v4284_v59 = vpop.f32.mrb[2].mxu1  ;;  %v4232_v60 = vpop.f32.mrb[5].mxu0 }
 0x13b   : > { %v4233_v53 = vadd.f32 %v4232_v60, %v4231_v40  ;;  %v4285_v63 = vpop.f32.mrb[3].mxu1  ;;  %v5245_v40 = vpack.c.bf16 %v2691_v58, %v2690_v56  ;;  %v2675_v60 = vld [vmem:[%s7764_s3 + $0x48] sm:$0xff]  ;;  %v5287_v56 = vpack.c.bf16 %v2711_v52, %v2710_v49  ;;  %v2742_v52 = vld [vmem:[%s7764_s3 + $0x260] sm:$0xff] }
 0x13c   : > { %v4286_v62 = vadd.f32 %v4285_v63, %v4284_v59  ;;  %v2674_v59 = vld [vmem:[%s7764_s3 + $0x40] sm:$0xff]  ;;  %v2719_v63 = vld [vmem:[%s7764_s3 + $0x1a8] sm:$0xff] }
 0x13d   : > { %v2130_v2 = vadd.f32 %v4233_v53, %v6575_v50  ;;  %v2718_v53 = vld [vmem:[%s7764_s3 + $0x1a0] sm:$0xff]  ;;  %5246 = vmatprep.subr.bf16.mxu1 %v5245_v40  ;;  %v2747_v58 = vld [vmem:[%s7764_s3 + $0x288] sm:$0xff] }
 0x13e   : > { %v6598_v0 = vadd.f32 %v4286_v62, %v2125_v21  ;;  %v5247_v21 = vpack.c.bf16 %v2675_v60, %v2674_v59  ;;  %v5293_v40 = vpack.c.bf16 %v2747_v58, %v2746_v55  ;;  %v2730_v60 = vld [vmem:[%s7764_s3 + $0x200] sm:$0xff]  ;;  %v2760_v55 = vld [vmem:[%s7764_s3 + $0x2f0] sm:$0xff] }
 0x140   : > { %5248 = vmatpush3.bf16.msra.mxu1 %v5247_v21  ;;  %v2712_v21 = vld [vmem:[%s7764_s3 + $0x170] sm:$0xff] }
 0x155   : > { %v4234_v61 = vpop.f32.mrb[6].mxu0 }
 0x156   : > { %v4287_v1 = vpop.f32.mrb[4].mxu1  ;;  %v4235_v22 = vpop.f32.mrb[7].mxu0 }
 0x157   : > { %v4236_v23 = vadd.f32 %v4235_v22, %v4234_v61  ;;  %v4288_v38 = vpop.f32.mrb[5].mxu1  ;;  %v5269_v61 = vpack.c.bf16 %v2719_v63, %v2718_v53  ;;  %v2703_v22 = vld [vmem:[%s7764_s3 + $0x128] sm:$0xff] }
 0x158   : > { %v4289_v3 = vadd.f32 %v4288_v38, %v4287_v1  ;;  %v2702_v1 = vld [vmem:[%s7764_s3 + $0x120] sm:$0xff]  ;;  %v2692_v38 = vld [vmem:[%s7764_s3 + $0xd0] sm:$0xff]  ;;  %v2731_v53 = vld [vmem:[%s7764_s3 + $0x208] sm:$0xff] }
 0x159   : > { %v2135_v6 = vadd.f32 %v4236_v23, %v6575_v50  ;;  %v5271_v23 = vpack.c.bf16 %v2703_v22, %v2702_v1  ;;  %5270 = vmatprep.subr.bf16.mxu0 %v5269_v61  ;;  %v5295_v63 = vpack.c.bf16 %v2731_v53, %v2730_v60  ;;  %v2748_v1 = vld [vmem:[%s7764_s3 + $0x290] sm:$0xff]  ;;  %v2749_v22 = vld [vmem:[%s7764_s3 + $0x298] sm:$0xff]  ;;  %v2795_v60 = vld [vmem:[%s7764_s3 + $0x408] sm:$0xff] }
 0x15a   : > { %v6601_v4 = vadd.f32 %v4289_v3, %v2130_v2  ;;  %v2693_v2 = vld [vmem:[%s7764_s3 + $0xd8] sm:$0xff] }
 0x15b   : > { %v5249_v3 = vpack.c.bf16 %v2693_v2, %v2692_v38  ;;  %5272 = vmatpush3.bf16.msra.mxu0 %v5271_v23  ;;  %v5297_v38 = vpack.c.bf16 %v2749_v22, %v2748_v1  ;;  %v2732_v2 = vld [vmem:[%s7764_s3 + $0x210] sm:$0xff] }
 0x15c   : > { %5274 = vmatprep.subr.bf16.mxu0 %v5273_v13 }
 0x15d   : > { %5250 = vmatprep.subr.bf16.mxu1 %v5249_v3  ;;  %v2733_v3 = vld [vmem:[%s7764_s3 + $0x218] sm:$0xff] }
 0x15e   : > { %5252 = vmatpush3.bf16.msra.mxu1 %v5251_v12  ;;  %v5299_v8 = vpack.c.bf16 %v2733_v3, %v2732_v2  ;;  %v2779_v12 = vld [vmem:[%s7764_s3 + $0x388] sm:$0xff] }
 0x15f   : > { %5276 = vmatpush3.bf16.msra.mxu0 %v5275_v16  ;;  %5254 = vmatprep.subr.bf16.mxu1 %v5253_v19  ;;  %v5325_v15 = vpack.c.bf16 %v2779_v12, %v2778_v5  ;;  %v2750_v16 = vld [vmem:[%s7764_s3 + $0x2a0] sm:$0xff] }
 0x160   : > { %5278 = vmatprep.subr.bf16.mxu0 %v5277_v30  ;;  %v5301_v25 = vpack.c.bf16 %v2751_v17, %v2750_v16 }
 0x162   : > { %5256 = vmatpush3.bf16.msra.mxu1 %v5255_v28  ;;  %v2752_v28 = vld [vmem:[%s7764_s3 + $0x2b0] sm:$0xff] }
 0x163   : > { %5280 = vmatpush3.bf16.msra.mxu0 %v5279_v29  ;;  %5258 = vmatprep.subr.bf16.mxu1 %v5257_v34  ;;  %v2755_v34 = vld [vmem:[%s7764_s3 + $0x2c8] sm:$0xff] }
 0x164   : > { %v5309_v36 = vpack.c.bf16 %v2755_v34, %v2754_v33 }
 0x166   : > { %5260 = vmatpush3.bf16.msra.mxu1 %v5259_v42  ;;  %v2757_v42 = vld [vmem:[%s7764_s3 + $0x2d8] sm:$0xff] }
 0x167   : > { %5294 = vmatprep.subr.bf16.mxu1 %v5293_v40  ;;  %v2745_v40 = vld [vmem:[%s7764_s3 + $0x278] sm:$0xff] }
 0x172   : > { %v4237_v43 = vpop.f32.mrb[8].mxu0 }
 0x173   : > { %v4290_v48 = vpop.f32.mrb[6].mxu1  ;;  %v4238_v45 = vpop.f32.mrb[9].mxu0 }
 0x174   : > { %v6675_v24 = vadd.f32 %v4238_v45, %v4237_v43  ;;  %v4291_v54 = vpop.f32.mrb[7].mxu1  ;;  %v5281_v43 = vpack.c.bf16 %v2725_v41, %v2724_v39  ;;  %v2727_v45 = vld [vmem:[%s7764_s3 + $0x1e8] sm:$0xff]  ;;  %v2756_v41 = vld [vmem:[%s7764_s3 + $0x2d0] sm:$0xff] }
 0x175   : > { %v4292_v35 = vadd.f32 %v4291_v54, %v4290_v48  ;;  %v2726_v48 = vld [vmem:[%s7764_s3 + $0x1e0] sm:$0xff]  ;;  %v2739_v39 = vld [vmem:[%s7764_s3 + $0x248] sm:$0xff]  ;;  %v5313_v44 = vpack.c.bf16 %v2757_v42, %v2756_v41 }
 0x176   : > { %5282 = vmatprep.subr.bf16.mxu0 %v5281_v43  ;;  %v5285_v51 = vpack.c.bf16 %v2727_v45, %v2726_v48  ;;  %v2602_v54 = vld [vmem:[#allocation2 + $0x1] sm:$0xff]  ;;  %v2140_v19 = vadd.f32 %v6675_v24, %v6575_v50  ;;  %v2753_v24 = vld [vmem:[%s7764_s3 + $0x2b8] sm:$0xff]  ;;  %v5311_v43 = vpack.c.bf16 %v2739_v39, %v2738_v37 }
 0x177   : > { %v6696_v62 = vadd.f32 %v4292_v35, %v2135_v6  ;;  %5284 = vmatpush3.bf16.msra.mxu0 %v5283_v47  ;;  %2881 = vmatprep.mubr.f32.mxu1 %v2602_v54  ;;  %v2728_v6 = vld [vmem:[%s7764_s3 + $0x1f0] sm:$0xff]  ;;  %v2729_v35 = vld [vmem:[%s7764_s3 + $0x1f8] sm:$0xff]  ;;  %v5305_v29 = vpack.c.bf16 %v2753_v24, %v2752_v28  ;;  %v2758_v48 = vld [vmem:[%s7764_s3 + $0x2e0] sm:$0xff] }
 0x178   : > { %5286 = vmatprep.subr.bf16.mxu0 %v5285_v51  ;;  %2882 = vmatmul.mubr.f32.vlgmr.msra.gmra.mrb[32].mxu1 %v6594_v11  ;;  %v5289_v59 = vpack.c.bf16 %v2729_v35, %v2728_v6  ;;  %v2713_v11 = vld [vmem:[%s7764_s3 + $0x178] sm:$0xff]  ;;  %v2759_v45 = vld [vmem:[%s7764_s3 + $0x2e8] sm:$0xff]  ;;  %v2744_v35 = vld [vmem:[%s7764_s3 + $0x270] sm:$0xff] }
 0x179   : > { %5296 = vmatpush3.bf16.msra.mxu1 %v5295_v63  ;;  %v5291_v61 = vpack.c.bf16 %v2713_v11, %v2712_v21  ;;  %v2741_v47 = vld [vmem:[%s7764_s3 + $0x258] sm:$0xff]  ;;  %v5317_v51 = vpack.c.bf16 %v2759_v45, %v2758_v48  ;;  %v2743_v54 = vld [vmem:[%s7764_s3 + $0x268] sm:$0xff]  ;;  %v5323_v53 = vpack.c.bf16 %v2745_v40, %v2744_v35 }
 0x17a   : > { %5298 = vmatprep.subr.bf16.mxu1 %v5297_v38  ;;  %v5315_v49 = vpack.c.bf16 %v2741_v47, %v2740_v46  ;;  %v5319_v58 = vpack.c.bf16 %v2743_v54, %v2742_v52 }
 0x17b   : > { %5288 = vmatpush3.bf16.msra.mxu0 %v5287_v56  ;;  %v2761_v56 = vld [vmem:[%s7764_s3 + $0x2f8] sm:$0xff] }
 0x17c   : > { %5290 = vmatprep.subr.bf16.mxu0 %v5289_v59  ;;  %v5321_v6 = vpack.c.bf16 %v2761_v56, %v2760_v55  ;;  %v2794_v59 = vld [vmem:[%s7764_s3 + $0x400] sm:$0xff] }
 0x17d   : > { %5300 = vmatpush3.bf16.msra.mxu1 %v5299_v8  ;;  %v6915_v63 = vpack.c.bf16 %v2795_v60, %v2794_v59 }
 0x17e   : > { %5302 = vmatprep.subr.bf16.mxu1 %v5301_v25 }
 0x17f   : > { %5292 = vmatpush3.bf16.msra.mxu0 %v5291_v61 }
 0x180   : > { %5326 = vmatprep.subr.bf16.mxu0 %v5325_v15 }
 0x181   : > { %5304 = vmatpush3.bf16.msra.mxu1 %v5303_v27 }
 0x182   : > { %5306 = vmatprep.subr.bf16.mxu1 %v5305_v29 }
 0x185   : > { %5308 = vmatpush3.bf16.msra.mxu1 %v5307_v32 }
 0x186   : > { %5310 = vmatprep.subr.bf16.mxu1 %v5309_v36 }
 0x189   : > { %5312 = vmatpush3.bf16.msra.mxu1 %v5311_v43 }
 0x18a   : > { %5314 = vmatprep.subr.bf16.mxu1 %v5313_v44 }
 0x18d   : > { %5316 = vmatpush3.bf16.msra.mxu1 %v5315_v49 }
 0x18e   : > { %v4240_v23 = vpop.f32.mrb[10].mxu0  ;;  %5318 = vmatprep.subr.bf16.mxu1 %v5317_v51 }
 0x18f   : > { %v4293_v9 = vpop.f32.mrb[8].mxu1  ;;  %v4241_v10 = vpop.f32.mrb[11].mxu0 }
 0x190   : > { %v6831_v13 = vadd.f32 %v4241_v10, %v4240_v23  ;;  %v4294_v14 = vpop.f32.mrb[9].mxu1 }
 0x191   : > { %v4295_v20 = vadd.f32 %v4294_v14, %v4293_v9  ;;  %5320 = vmatpush3.bf16.msra.mxu1 %v5319_v58 }
 0x192   : > { %5322 = vmatprep.subr.bf16.mxu1 %v5321_v6  ;;  %v2145_v23 = vadd.f32 %v6831_v13, %v6575_v50 }
 0x193   : > { %v6850_v30 = vadd.f32 %v4295_v20, %v2140_v19 }
 0x195   : > { %5324 = vmatpush3.bf16.msra.mxu1 %v5323_v53 }
 0x196   : > { %5358 = vmatprep.subr.bf16.mxu1 %v6915_v63 }
 0x1aa   : > { %v4243_v21 = vpop.f32.mrb[12].mxu0 }
 0x1ab   : > { %v4296_v11 = vpop.f32.mrb[10].mxu1  ;;  %v4244_v61 = vpop.f32.mrb[13].mxu0 }
 0x1ac   : > { %v4245_v1 = vadd.f32 %v4244_v61, %v4243_v21  ;;  %v4297_v22 = vpop.f32.mrb[11].mxu1 }
 0x1ad   : > { %v4298_v38 = vadd.f32 %v4297_v22, %v4296_v11 }
 0x1ae   : > { %v2150_v12 = vadd.f32 %v4245_v1, %v6575_v50 }
 0x1af   : > { %v2250_v2 = vadd.f32 %v4298_v38, %v2145_v23 }
 0x1c6   : > { %v4246_v3 = vpop.f32.mrb[14].mxu0 }
 0x1c7   : > { %v4299_v5 = vpop.f32.mrb[12].mxu1  ;;  %v4247_v9 = vpop.f32.mrb[15].mxu0 }
 0x1c8   : > { %v4248_v10 = vadd.f32 %v4247_v9, %v4246_v3  ;;  %v4300_v8 = vpop.f32.mrb[13].mxu1 }
 0x1c9   : > { %v4301_v14 = vadd.f32 %v4300_v8, %v4299_v5 }
 0x1ca   : > { %v4337_v15 = vpop.f32.mrb[16].mxu0 }
 0x1cb   : > { %v2255_v16 = vadd.f32 %v4301_v14, %v2150_v12  ;;  %v4338_v17 = vpop.f32.mrb[17].mxu0 }
 0x1cc   : > { %v4339_v18 = vadd.f32 %v4338_v17, %v4337_v15  ;;  %v2763_v17 = vld [vmem:[%s7764_s3 + $0x308] sm:$0xff] }
 0x1ce   : > { %v2330_v19 = vadd.f32 %v4339_v18, %v6586_v57 }
 0x1cf   : > { %v4340_v20 = vpop.f32.mrb[18].mxu0 }
 0x1d0   : > { %v4341_v25 = vpop.f32.mrb[19].mxu0 }
 0x1d1   : > { %v4342_v26 = vadd.f32 %v4341_v25, %v4340_v20  ;;  %v2780_v25 = vld [vmem:[%s7764_s3 + $0x390] sm:$0xff] }
 0x1d3   : > { %v2335_v13 = vadd.f32 %v4342_v26, %v6598_v0  ;;  %v4343_v27 = vpop.f32.mrb[20].mxu0  ;;  %v2781_v26 = vld [vmem:[%s7764_s3 + $0x398] sm:$0xff] }
 0x1d4   : > { %v4344_v28 = vpop.f32.mrb[21].mxu0 }
 0x1d5   : > { %v4345_v24 = vadd.f32 %v4344_v28, %v4343_v27 }
 0x1d7   : > { %v2340_v31 = vadd.f32 %v4345_v24, %v6601_v4  ;;  %v4346_v7 = vpop.f32.mrb[22].mxu0  ;;  %v2155_v4 = vadd.f32 %v4248_v10, %v6575_v50 }
 0x1d8   : > { %v4347_v29 = vpop.f32.mrb[23].mxu0 }
 0x1d9   : > { %v4348_v32 = vadd.f32 %v4347_v29, %v4346_v7 }
 0x1db   : > { %v2345_v33 = vadd.f32 %v4348_v32, %v6696_v62  ;;  %v4349_v34 = vpop.f32.mrb[24].mxu0 }
 0x1dc   : > { %v4350_v36 = vpop.f32.mrb[25].mxu0 }
 0x1dd   : > { %v4351_v37 = vadd.f32 %v4350_v36, %v4349_v34  ;;  %v2764_v34 = vld [vmem:[%s7764_s3 + $0x310] sm:$0xff]  ;;  %v2765_v36 = vld [vmem:[%s7764_s3 + $0x318] sm:$0xff] }
 0x1df   : > { %v6926_v57 = vadd.f32 %v4351_v37, %v6850_v30  ;;  %v4352_v39 = vpop.f32.mrb[26].mxu0 }
 0x1e0   : > { %v4353_v41 = vpop.f32.mrb[27].mxu0 }
 0x1e1   : > { %v4354_v42 = vadd.f32 %v4353_v41, %v4352_v39 }
 0x1e3   : > { %v4302_v0 = vpop.f32.mrb[14].mxu1  ;;  %v6928_v43 = vadd.f32 %v4354_v42, %v2250_v2  ;;  %v2782_v42 = vld [vmem:[%s7764_s3 + $0x3a0] sm:$0xff] }
 0x1e4   : > { %v4303_v44 = vpop.f32.mrb[15].mxu1  ;;  %v4355_v46 = vpop.f32.mrb[28].mxu0 }
 0x1e5   : > { %v4304_v47 = vadd.f32 %v4303_v44, %v4302_v0  ;;  %v4356_v48 = vpop.f32.mrb[29].mxu0  ;;  %v2783_v0 = vld [vmem:[%s7764_s3 + $0x3a8] sm:$0xff] }
 0x1e6   : > { %v4357_v45 = vadd.f32 %v4356_v48, %v4355_v46  ;;  %v5333_v48 = vpack.c.bf16 %v2783_v0, %v2782_v42  ;;  %v2792_v42 = vld [vmem:[%s7764_s3 + $0x3f0] sm:$0xff]  ;;  %v2793_v0 = vld [vmem:[%s7764_s3 + $0x3f8] sm:$0xff] }
 0x1e7   : > { %v2260_v62 = vadd.f32 %v4304_v47, %v2155_v4  ;;  %v4393_v49 = vpop.f32.mrb[16].mxu1  ;;  %v5331_v47 = vpack.c.bf16 %v2765_v36, %v2764_v34  ;;  %v2774_v36 = vld [vmem:[%s7764_s3 + $0x360] sm:$0xff] }
 0x1e8   : > { %v4394_v51 = vpop.f32.mrb[17].mxu1  ;;  %v6931_v52 = vadd.f32 %v4357_v45, %v2255_v16  ;;  %v4358_v30 = vpop.f32.mrb[30].mxu0  ;;  %v2762_v16 = vld [vmem:[%s7764_s3 + $0x300] sm:$0xff] }
 0x1e9   : > { %v4395_v54 = vadd.f32 %v4394_v51, %v4393_v49  ;;  %v4359_v55 = vpop.f32.mrb[31].mxu0  ;;  %v5327_v7 = vpack.c.bf16 %v2763_v17, %v2762_v16  ;;  %v2766_v45 = vld [vmem:[%s7764_s3 + $0x320] sm:$0xff] }
 0x1ea   : > { %v4360_v56 = vadd.f32 %v4359_v55, %v4358_v30  ;;  %v2784_v55 = vld [vmem:[%s7764_s3 + $0x3b0] sm:$0xff] }
 0x1eb   : > { %v4396_v58 = vpop.f32.mrb[18].mxu1  ;;  %v2435_v6 = vadd.f32 %v4395_v54, %v2330_v19 }
 0x1ec   : > { %v4397_v35 = vpop.f32.mrb[19].mxu1  ;;  %v6933_v40 = vadd.f32 %v4360_v56, %v2260_v62  ;;  %v2767_v62 = vld [vmem:[%s7764_s3 + $0x328] sm:$0xff]  ;;  %v2785_v56 = vld [vmem:[%s7764_s3 + $0x3b8] sm:$0xff] }
 0x1ed   : > { %v4398_v59 = vadd.f32 %v4397_v35, %v4396_v58  ;;  %v4971_v60 = vpop.f32.mrb[32].mxu0 }
 0x1ee   : > { %v2539_v50 = vpop.f32.mrb[33].mxu0 }
 0x1ef   : > { %v4399_v53 = vpop.f32.mrb[20].mxu1  ;;  %v2440_v21 = vadd.f32 %v4398_v59, %v2335_v13  ;;  %v2540_v11 = vadd.f32 %v2539_v50, %v2435_v6  ;;  %v5335_v59 = vpack.c.bf16 %v2767_v62, %v2766_v45  ;;  %v2768_v50 = vld [vmem:[%s7764_s3 + $0x330] sm:$0xff] }
 0x1f0   : > { %v4400_v61 = vpop.f32.mrb[21].mxu1  ;;  %v2796_v62 = vld [vmem:[%s7764_s3 + $0x410] sm:$0xff] }
 0x1f1   : > { %v4401_v1 = vadd.f32 %v4400_v61, %v4399_v53  ;;  %v2545_v22 = vadd.f32 %v4971_v60, %v2440_v21  ;;  %v6935_v23 = vmax.f32 %v2540_v11, 0.0  ;;  %v4974_v38 = vpop.f32.mrb[34].mxu0  ;;  %v5337_v60 = vpack.c.bf16 %v2785_v56, %v2784_v55  ;;  %v2769_v53 = vld [vmem:[%s7764_s3 + $0x338] sm:$0xff] }
 0x1f2   : > { %v2549_v2 = vpop.f32.mrb[35].mxu0 }
 0x1f3   : > { %v4402_v3 = vpop.f32.mrb[22].mxu1  ;;  %v6937_v5 = vmax.f32 %v2545_v22, 0.0  ;;  %2586 = vst [vmem:[#allocation2 + $0x11] sm:$0xff] %v6935_v23  ;;  %v2445_v9 = vadd.f32 %v4401_v1, %v2340_v31  ;;  %2886 = vmatprep.mubr.f32.mxu1 %v6935_v23  ;;  %v2610_v31 = vld [vmem:[#allocation2 + $0x2] sm:$0xff] }
 0x1f4   : > { %v4403_v10 = vpop.f32.mrb[23].mxu1  ;;  %v2786_v22 = vld [vmem:[%s7764_s3 + $0x3c0] sm:$0xff] }
 0x1f5   : > { %v4404_v8 = vadd.f32 %v4403_v10, %v4402_v3  ;;  %2587 = vst [vmem:[#allocation2 + $0x21] sm:$0xff] %v6937_v5  ;;  %v2550_v12 = vadd.f32 %v2549_v2, %v2445_v9  ;;  %v4977_v14 = vpop.f32.mrb[36].mxu0  ;;  %v5339_v10 = vpack.c.bf16 %v2769_v53, %v2768_v50  ;;  %v2805_v50 = vld [vmem:[%s7764_s3 + $0x458] sm:$0xff]  ;;  %v2807_v53 = vld [vmem:[%s7764_s3 + $0x468] sm:$0xff] }
 0x1f6   : > { %v2559_v15 = vpop.f32.mrb[37].mxu0 }
 0x1f7   : > { %v4405_v18 = vpop.f32.mrb[24].mxu1  ;;  %v2450_v19 = vadd.f32 %v4404_v8, %v2345_v33  ;;  %v6948_v20 = vmax.f32 %v2550_v12, 0.0  ;;  %v5329_v33 = vpack.c.bf16 %v2781_v26, %v2780_v25  ;;  %v2770_v12 = vld [vmem:[%s7764_s3 + $0x340] sm:$0xff] }
 0x1f8   : > { %v4406_v13 = vpop.f32.mrb[25].mxu1 }
 0x1f9   : > { %v4407_v27 = vadd.f32 %v4406_v13, %v4405_v18  ;;  %v2555_v28 = vadd.f32 %v4974_v38, %v2450_v19  ;;  %2588 = vst [vmem:[#allocation2 + $0x31] sm:$0xff] %v6948_v20  ;;  %v6957_v24 = vpop.f32.mrb[38].mxu0  ;;  %v2787_v38 = vld [vmem:[%s7764_s3 + $0x3c8] sm:$0xff]  ;;  %v2788_v18 = vld [vmem:[%s7764_s3 + $0x3d0] sm:$0xff]  ;;  %v2789_v19 = vld [vmem:[%s7764_s3 + $0x3d8] sm:$0xff] }
 0x1fa   : > { %v2569_v29 = vpop.f32.mrb[39].mxu0  ;;  %v2618_v32 = vld [vmem:[#allocation2 + $0x10] sm:$0xff]  ;;  %v5341_v8 = vpack.c.bf16 %v2787_v38, %v2786_v22  ;;  %v5345_v13 = vpack.c.bf16 %v2789_v19, %v2788_v18  ;;  %v3479_v18 = vld [vmem:[%s7766_s5 + $0x188] sm:$0xff] }
 0x1fb   : > { %v4408_v37 = vpop.f32.mrb[26].mxu1  ;;  %v6965_v39 = vmax.f32 %v2555_v28, 0.0  ;;  %v2455_v41 = vadd.f32 %v4407_v27, %v6926_v57  ;;  %2986 = vmatprep.mubr.f32.mxu0 %v2618_v32  ;;  %2887 = vmatmul.mubr.f32.gmra.mrb[34].mxu1 %v2618_v32  ;;  %v6989_v54 = vld [vmem:[#allocation2 + $0x12] sm:$0xff] }
 0x1fc   : > { %v4409_v44 = vpop.f32.mrb[27].mxu1  ;;  %2987 = vmatmul.mubr.f32.vlgmr.msra.gmra.mrb[40].mxu0 %v2610_v31  ;;  %2891 = vmatprep.mubr.f32.mxu1 %v6937_v5  ;;  %v6975_v46 = vld [vmem:[#allocation2 + $0x20] sm:$0xff]  ;;  %v2772_v27 = vld [vmem:[%s7764_s3 + $0x350] sm:$0xff]  ;;  %v2773_v28 = vld [vmem:[%s7764_s3 + $0x358] sm:$0xff] }
 0x1fd   : > { %v4410_v4 = vadd.f32 %v4409_v44, %v4408_v37  ;;  %2589 = vst [vmem:[#allocation2 + $0x41] sm:$0xff] %v6965_v39  ;;  %v2560_v57 = vadd.f32 %v2559_v15, %v2455_v41  ;;  %2991 = vmatprep.mubr.f32.mxu0 %v6975_v46  ;;  %5328 = vmatpush3.bf16.msra.mxu0 %v5327_v7  ;;  %v7013_v1 = vld [vmem:[#allocation2 + $0x22] sm:$0xff]  ;;  %v2657_v38 = vld [vmem:[#allocation2 + $0x91] sm:$0xff] }
 0x1fe   : > { %5330 = vmatprep.subr.bf16.mxu0 %v5329_v33  ;;  %v2790_v7 = vld [vmem:[%s7764_s3 + $0x3e0] sm:$0xff]  ;;  %v5347_v33 = vpack.c.bf16 %v2773_v28, %v2772_v27  ;;  %v2775_v37 = vld [vmem:[%s7764_s3 + $0x368] sm:$0xff]  ;;  %v3448_v19 = vld [vmem:[%s7766_s5 + $0x90] sm:$0xff] }
 0x1ff   : > { %v4411_v49 = vpop.f32.mrb[28].mxu1  ;;  %v2460_v51 = vadd.f32 %v4410_v4, %v6928_v43  ;;  %v6986_v30 = vmax.f32 %v2560_v57, 0.0  ;;  %2892 = vmatmul.mubr.f32.gmra.mrb[36].mxu1 %v6975_v46  ;;  %v5351_v4 = vpack.c.bf16 %v2775_v37, %v2774_v36  ;;  %v5353_v57 = vpack.c.bf16 %v2793_v0, %v2792_v42  ;;  %v3451_v36 = vld [vmem:[%s7766_s5 + $0xa8] sm:$0xff]  ;;  %v3464_v37 = vld [vmem:[%s7766_s5 + $0x110] sm:$0xff] }
 0x200   : > { %v4412_v58 = vpop.f32.mrb[29].mxu1  ;;  %2992 = vmatmul.mubr.f32.gmra.mrb[42].mxu0 %v6989_v54  ;;  %2896 = vmatprep.mubr.f32.mxu1 %v6948_v20  ;;  %v6999_v43 = vld [vmem:[#allocation2 + $0x30] sm:$0xff] }
 0x201   : > { %v4413_v6 = vadd.f32 %v4412_v58, %v4411_v49  ;;  %v2565_v35 = vadd.f32 %v4977_v14, %v2460_v51  ;;  %2590 = vst [vmem:[#allocation2 + $0x51] sm:$0xff] %v6986_v30  ;;  %2996 = vmatprep.mubr.f32.mxu0 %v6999_v43  ;;  %5332 = vmatpush3.bf16.msra.mxu0 %v5331_v47  ;;  %v2771_v14 = vld [vmem:[%s7764_s3 + $0x348] sm:$0xff]  ;;  %v7037_v17 = vld [vmem:[#allocation2 + $0x32] sm:$0xff] }
 0x202   : > { %5334 = vmatprep.subr.bf16.mxu0 %v5333_v48  ;;  %v5343_v26 = vpack.c.bf16 %v2771_v14, %v2770_v12  ;;  %v2776_v47 = vld [vmem:[%s7764_s3 + $0x370] sm:$0xff]  ;;  %v2777_v48 = vld [vmem:[%s7764_s3 + $0x378] sm:$0xff]  ;;  %v3430_v14 = vld [vmem:[%s7766_s5] sm:$0xff] }
 0x203   : > { %v4414_v21 = vpop.f32.mrb[30].mxu1  ;;  %v7009_v11 = vmax.f32 %v2565_v35, 0.0  ;;  %v2465_v61 = vadd.f32 %v4413_v6, %v6931_v52  ;;  %2897 = vmatmul.mubr.f32.gmra.mrb[38].mxu1 %v6999_v43  ;;  %v2797_v49 = vld [vmem:[%s7764_s3 + $0x418] sm:$0xff]  ;;  %v5355_v55 = vpack.c.bf16 %v2777_v48, %v2776_v47  ;;  %v2798_v6 = vld [vmem:[%s7764_s3 + $0x420] sm:$0xff]  ;;  %v2799_v35 = vld [vmem:[%s7764_s3 + $0x428] sm:$0xff] }
 0x204   : > { %v4415_v2 = vpop.f32.mrb[31].mxu1  ;;  %2997 = vmatmul.mubr.f32.gmra.mrb[44].mxu0 %v7013_v1  ;;  %2901 = vmatprep.mubr.f32.mxu1 %v6965_v39  ;;  %v7023_v3 = vld [vmem:[#allocation2 + $0x40] sm:$0xff]  ;;  %v5361_v56 = vpack.c.bf16 %v2797_v49, %v2796_v62  ;;  %v3483_v48 = vld [vmem:[%s7766_s5 + $0x1a8] sm:$0xff]  ;;  %v3453_v49 = vld [vmem:[%s7766_s5 + $0xb8] sm:$0xff] }
 0x205   : > { %v4416_v52 = vadd.f32 %v4415_v2, %v4414_v21  ;;  %2591 = vst [vmem:[#allocation2 + $0x61] sm:$0xff] %v7009_v11  ;;  %v2570_v9 = vadd.f32 %v2569_v29, %v2465_v61  ;;  %3001 = vmatprep.mubr.f32.mxu0 %v7023_v3  ;;  %5336 = vmatpush3.bf16.msra.mxu0 %v5335_v59  ;;  %v2791_v29 = vld [vmem:[%s7764_s3 + $0x3e8] sm:$0xff]  ;;  %v2801_v59 = vld [vmem:[%s7764_s3 + $0x438] sm:$0xff]  ;;  %v7185_v2 = vld [vmem:[#allocation2] sm:$0xff] }
 0x206   : > { %5338 = vmatprep.subr.bf16.mxu0 %v5337_v60  ;;  %v5349_v34 = vpack.c.bf16 %v2791_v29, %v2790_v7  ;;  %v2803_v60 = vld [vmem:[%s7764_s3 + $0x448] sm:$0xff]  ;;  %v2809_v61 = vld [vmem:[%s7764_s3 + $0x478] sm:$0xff]  ;;  %v3480_v29 = vld [vmem:[%s7766_s5 + $0x190] sm:$0xff] }
 0x207   : > { %v2470_v15 = vadd.f32 %v4416_v52, %v6933_v40  ;;  %v7034_v16 = vmax.f32 %v2570_v9, 0.0  ;;  %2902 = vmatmul.mubr.f32.gmra.mrb[40].mxu1 %v7023_v3  ;;  %v3482_v47 = vld [vmem:[%s7766_s5 + $0x1a0] sm:$0xff] }
 0x208   : > { %3002 = vmatmul.mubr.f32.gmra.mrb[46].mxu0 %v7037_v17  ;;  %2906 = vmatprep.mubr.f32.mxu1 %v6986_v30  ;;  %v7047_v25 = vld [vmem:[#allocation2 + $0x50] sm:$0xff]  ;;  %v5429_v62 = vpack.c.bf16 %v3483_v48, %v3482_v47  ;;  %v3493_v47 = vld [vmem:[%s7766_s5 + $0x1f8] sm:$0xff] }
 0x209   : > { %v2575_v40 = vadd.f32 %v6957_v24, %v2470_v15  ;;  %2592 = vst [vmem:[#allocation2 + $0x71] sm:$0xff] %v7034_v16  ;;  %3006 = vmatprep.mubr.f32.mxu0 %v7047_v25  ;;  %5340 = vmatpush3.bf16.msra.mxu0 %v5339_v10  ;;  %v7061_v24 = vld [vmem:[#allocation2 + $0x42] sm:$0xff]  ;;  %v7082_v41 = vld [vmem:[#allocation2 + $0x52] sm:$0xff] }
 0x20a   : > { %5342 = vmatprep.subr.bf16.mxu0 %v5341_v8  ;;  %v3446_v10 = vld [vmem:[%s7766_s5 + $0x80] sm:$0xff]  ;;  %v3447_v8 = vld [vmem:[%s7766_s5 + $0x88] sm:$0xff] }
 0x20b   : > { %v7058_v31 = vmax.f32 %v2575_v40, 0.0  ;;  %2907 = vmatmul.mubr.f32.gmra.mrb[42].mxu1 %v7047_v25  ;;  %v5389_v12 = vpack.c.bf16 %v3447_v8, %v3446_v10  ;;  %v3431_v15 = vld [vmem:[%s7766_s5 + $0x8] sm:$0xff]  ;;  %v3449_v40 = vld [vmem:[%s7766_s5 + $0x98] sm:$0xff]  ;;  %v3440_v8 = vld [vmem:[%s7766_s5 + $0x50] sm:$0xff] }
 0x20c   : > { %3007 = vmatmul.mubr.f32.gmra.mrb[48].mxu0 %v7061_v24  ;;  %2911 = vmatprep.mubr.f32.mxu1 %v7009_v11  ;;  %v7071_v32 = vld [vmem:[#allocation2 + $0x60] sm:$0xff]  ;;  %v5393_v27 = vpack.c.bf16 %v3449_v40, %v3448_v19  ;;  %v3459_v19 = vld [vmem:[%s7766_s5 + $0xe8] sm:$0xff]  ;;  %v3473_v40 = vld [vmem:[%s7766_s5 + $0x158] sm:$0xff] }
 0x20d   : > { %2593 = vst [vmem:[#allocation2 + $0x81] sm:$0xff] %v7058_v31  ;;  %3011 = vmatprep.mubr.f32.mxu0 %v7071_v32  ;;  %5344 = vmatpush3.bf16.msra.mxu0 %v5343_v26  ;;  %v7102_v45 = vld [vmem:[#allocation2 + $0x62] sm:$0xff] }
 0x20e   : > { %5346 = vmatprep.subr.bf16.mxu0 %v5345_v13  ;;  %v3462_v26 = vld [vmem:[%s7766_s5 + $0x100] sm:$0xff]  ;;  %v3463_v13 = vld [vmem:[%s7766_s5 + $0x108] sm:$0xff] }
 0x20f   : > { %2912 = vmatmul.mubr.f32.gmra.mrb[44].mxu1 %v7071_v32  ;;  %v5423_v28 = vpack.c.bf16 %v3463_v13, %v3462_v26 }
 0x210   : > { %3012 = vmatmul.mubr.f32.gmra.mrb[50].mxu0 %v7082_v41  ;;  %2916 = vmatprep.mubr.f32.mxu1 %v7034_v16  ;;  %v7092_v44 = vld [vmem:[#allocation2 + $0x70] sm:$0xff] }
 0x211   : > { %3016 = vmatprep.mubr.f32.mxu0 %v7092_v44  ;;  %5348 = vmatpush3.bf16.msra.mxu0 %v5347_v33  ;;  %v7115_v58 = vld [vmem:[#allocation2 + $0x72] sm:$0xff]  ;;  %v3450_v33 = vld [vmem:[%s7766_s5 + $0xa0] sm:$0xff] }
 0x212   : > { %5350 = vmatprep.subr.bf16.mxu0 %v5349_v34  ;;  %v5397_v42 = vpack.c.bf16 %v3451_v36, %v3450_v33  ;;  %v3461_v33 = vld [vmem:[%s7766_s5 + $0xf8] sm:$0xff]  ;;  %v3475_v36 = vld [vmem:[%s7766_s5 + $0x168] sm:$0xff] }
 0x213   : > { %2917 = vmatmul.mubr.f32.gmra.mrb[46].mxu1 %v7092_v44 }
 0x214   : > { %3017 = vmatmul.mubr.f32.gmra.mrb[52].mxu0 %v7102_v45  ;;  %v7111_v51 = vld [vmem:[#allocation2 + $0x80] sm:$0xff]  ;;  %3091 = vmatprep.mubr.f32.mxu1 %v6989_v54  ;;  %v5365_v54 = vpack.c.bf16 %v2799_v35, %v2798_v6  ;;  %v3436_v6 = vld [vmem:[%s7766_s5 + $0x30] sm:$0xff]  ;;  %v3437_v35 = vld [vmem:[%s7766_s5 + $0x38] sm:$0xff] }
 0x215   : > { %3021 = vmatprep.mubr.f32.mxu0 %v7111_v51  ;;  %5352 = vmatpush3.bf16.msra.mxu0 %v5351_v4  ;;  %v3435_v4 = vld [vmem:[%s7766_s5 + $0x28] sm:$0xff] }
 0x216   : > { %5354 = vmatprep.subr.bf16.mxu0 %v5353_v57 }
 0x217   : > { %3092 = vmatmul.mubr.f32.vlgmr.msra.gmra.mrb[48].mxu1 %v6935_v23  ;;  %v2800_v23 = vld [vmem:[%s7764_s3 + $0x430] sm:$0xff] }
 0x218   : > { %3022 = vmatmul.mubr.f32.gmra.mrb[54].mxu0 %v7115_v58  ;;  %5360 = vmatpush3.bf16.msra.mxu1 %v6915_v63  ;;  %v5369_v63 = vpack.c.bf16 %v2801_v59, %v2800_v23  ;;  %v3484_v23 = vld [vmem:[%s7766_s5 + $0x1b0] sm:$0xff]  ;;  %v3485_v59 = vld [vmem:[%s7766_s5 + $0x1b8] sm:$0xff] }
 0x219   : > { %3096 = vmatprep.mubr.f32.mxu1 %v7013_v1  ;;  %5356 = vmatpush3.bf16.msra.mxu0 %v5355_v55  ;;  %v3467_v55 = vld [vmem:[%s7766_s5 + $0x128] sm:$0xff] }
 0x21a   : > { %3196 = vmatprep.mubr.f32.mxu0 %v6937_v5  ;;  %5362 = vmatprep.subr.bf16.mxu1 %v5361_v56 }
 0x21b   : > { %3097 = vmatmul.mubr.f32.gmra.mrb[50].mxu1 %v6937_v5  ;;  %v2802_v5 = vld [vmem:[%s7764_s3 + $0x440] sm:$0xff]  ;;  %5390 = vmatprep.subr.bf16.mxu0 %v5389_v12  ;;  %v3441_v12 = vld [vmem:[%s7766_s5 + $0x58] sm:$0xff] }
 0x21c   : > { %3197 = vmatmul.mubr.f32.vlgmr.msra.gmra.mrb[56].mxu0 %v6975_v46  ;;  %5364 = vmatpush3.bf16.msra.mxu1 %v5361_v56  ;;  %v5373_v46 = vpack.c.bf16 %v2803_v60, %v2802_v5  ;;  %v5433_v5 = vpack.c.bf16 %v3485_v59, %v3484_v23  ;;  %v3455_v60 = vld [vmem:[%s7766_s5 + $0xc8] sm:$0xff] }
 0x21d   : > { %3101 = vmatprep.mubr.f32.mxu1 %v7037_v17  ;;  %3201 = vmatprep.mubr.f32.mxu0 %v6948_v20  ;;  %v3543_v23 = vld [vmem:[%s7766_s5 + $0x388] sm:$0xff] }
 0x21e   : > { %5366 = vmatprep.subr.bf16.mxu1 %v5365_v54 }
 0x21f   : > { %3102 = vmatmul.mubr.f32.gmra.mrb[52].mxu1 %v6948_v20  ;;  %v2804_v20 = vld [vmem:[%s7764_s3 + $0x450] sm:$0xff] }
 0x220   : > { %3202 = vmatmul.mubr.f32.gmra.mrb[58].mxu0 %v6999_v43  ;;  %5368 = vmatpush3.bf16.msra.mxu1 %v5365_v54  ;;  %v5377_v43 = vpack.c.bf16 %v2805_v50, %v2804_v20  ;;  %v5403_v54 = vpack.c.bf16 %v3437_v35, %v3436_v6  ;;  %v3469_v20 = vld [vmem:[%s7766_s5 + $0x138] sm:$0xff]  ;;  %v3495_v6 = vld [vmem:[%s7766_s5 + $0x208] sm:$0xff] }
 0x221   : > { %3106 = vmatprep.mubr.f32.mxu1 %v7061_v24  ;;  %3206 = vmatprep.mubr.f32.mxu0 %v6965_v39 }
 0x222   : > { %5370 = vmatprep.subr.bf16.mxu1 %v5369_v63 }
 0x223   : > { %3107 = vmatmul.mubr.f32.gmra.mrb[54].mxu1 %v6965_v39  ;;  %v2806_v39 = vld [vmem:[%s7764_s3 + $0x460] sm:$0xff] }
 0x224   : > { %3207 = vmatmul.mubr.f32.gmra.mrb[60].mxu0 %v7023_v3  ;;  %5372 = vmatpush3.bf16.msra.mxu1 %v5369_v63  ;;  %v5381_v21 = vpack.c.bf16 %v2807_v53, %v2806_v39  ;;  %v2665_v3 = vld [vmem:[#allocation2 + $0x92] sm:$0xff]  ;;  %v3454_v63 = vld [vmem:[%s7766_s5 + $0xc0] sm:$0xff]  ;;  %v3439_v53 = vld [vmem:[%s7766_s5 + $0x48] sm:$0xff] }
 0x225   : > { %3111 = vmatprep.mubr.f32.mxu1 %v7082_v41  ;;  %3211 = vmatprep.mubr.f32.mxu0 %v6986_v30  ;;  %v5405_v50 = vpack.c.bf16 %v3455_v60, %v3454_v63  ;;  %v3438_v39 = vld [vmem:[%s7766_s5 + $0x40] sm:$0xff]  ;;  %v3512_v63 = vld [vmem:[%s7766_s5 + $0x290] sm:$0xff] }
 0x226   : > { %5374 = vmatprep.subr.bf16.mxu1 %v5373_v46 }
 0x227   : > { %3112 = vmatmul.mubr.f32.gmra.mrb[56].mxu1 %v6986_v30  ;;  %v2808_v30 = vld [vmem:[%s7764_s3 + $0x470] sm:$0xff] }
 0x228   : > { %3212 = vmatmul.mubr.f32.gmra.mrb[62].mxu0 %v7047_v25  ;;  %5376 = vmatpush3.bf16.msra.mxu1 %v5373_v46  ;;  %v5385_v22 = vpack.c.bf16 %v2809_v61, %v2808_v30  ;;  %v3468_v46 = vld [vmem:[%s7766_s5 + $0x130] sm:$0xff]  ;;  %v3486_v30 = vld [vmem:[%s7766_s5 + $0x1c0] sm:$0xff]  ;;  %v3487_v61 = vld [vmem:[%s7766_s5 + $0x1c8] sm:$0xff] }
 0x229   : > { %3116 = vmatprep.mubr.f32.mxu1 %v7102_v45  ;;  %3216 = vmatprep.mubr.f32.mxu0 %v7009_v11 }
 0x22a   : > { %5378 = vmatprep.subr.bf16.mxu1 %v5377_v43 }
 0x22b   : > { %3117 = vmatmul.mubr.f32.gmra.mrb[58].mxu1 %v7009_v11  ;;  %v2641_v11 = vld [vmem:[#allocation2 + $0x82] sm:$0xff] }
 0x22c   : > { %3217 = vmatmul.mubr.f32.gmra.mrb[64].mxu0 %v7071_v32  ;;  %5380 = vmatpush3.bf16.msra.mxu1 %v5377_v43  ;;  %v3481_v32 = vld [vmem:[%s7766_s5 + $0x198] sm:$0xff]  ;;  %v5435_v43 = vpack.c.bf16 %v3469_v20, %v3468_v46  ;;  %v3496_v46 = vld [vmem:[%s7766_s5 + $0x210] sm:$0xff] }
 0x22d   : > { %3121 = vmatprep.mubr.f32.mxu1 %v7115_v58  ;;  %3221 = vmatprep.mubr.f32.mxu0 %v7034_v16  ;;  %v5425_v34 = vpack.c.bf16 %v3481_v32, %v3480_v29  ;;  %v3460_v29 = vld [vmem:[%s7766_s5 + $0xf0] sm:$0xff] }
 0x22e   : > { %5382 = vmatprep.subr.bf16.mxu1 %v5381_v21 }
 0x22f   : > { %3122 = vmatmul.mubr.f32.gmra.mrb[60].mxu1 %v7034_v16  ;;  %v5391_v16 = vpack.c.bf16 %v3431_v15, %v3430_v14  ;;  %v5411_v14 = vpack.c.bf16 %v3441_v12, %v3440_v8  ;;  %v3488_v15 = vld [vmem:[%s7766_s5 + $0x1d0] sm:$0xff]  ;;  %v3502_v12 = vld [vmem:[%s7766_s5 + $0x240] sm:$0xff] }
 0x230   : > { %3222 = vmatmul.mubr.f32.gmra.mrb[66].mxu0 %v7092_v44  ;;  %5384 = vmatpush3.bf16.msra.mxu1 %v5381_v21  ;;  %v3434_v44 = vld [vmem:[%s7766_s5 + $0x20] sm:$0xff]  ;;  %v5407_v21 = vpack.c.bf16 %v3439_v53, %v3438_v39 }
 0x231   : > { %3126 = vmatprep.mubr.f32.mxu1 %v2641_v11  ;;  %3226 = vmatprep.mubr.f32.mxu0 %v7058_v31  ;;  %v5399_v57 = vpack.c.bf16 %v3435_v4, %v3434_v44  ;;  %v3366_v4 = vld [vmem:[#allocation2 + $0x1] sm:$0xff] }
 0x232   : > { %5386 = vmatprep.subr.bf16.mxu1 %v5385_v22  ;;  %5392 = vmatpush3.bf16.msra.mxu0 %v5391_v16  ;;  %v3489_v16 = vld [vmem:[%s7766_s5 + $0x1d8] sm:$0xff]  ;;  %v3498_v53 = vld [vmem:[%s7766_s5 + $0x220] sm:$0xff] }
 0x233   : > { %3127 = vmatmul.mubr.f32.gmra.mrb[62].mxu1 %v7058_v31  ;;  %v3432_v31 = vld [vmem:[%s7766_s5 + $0x10] sm:$0xff]  ;;  %5394 = vmatprep.subr.bf16.mxu0 %v5393_v27  ;;  %v3442_v27 = vld [vmem:[%s7766_s5 + $0x60] sm:$0xff] }
 0x234   : > { %3227 = vmatmul.mubr.f32.gmra.mrb[68].mxu0 %v7111_v51  ;;  %5388 = vmatpush3.bf16.msra.mxu1 %v5385_v22  ;;  %v3466_v51 = vld [vmem:[%s7766_s5 + $0x120] sm:$0xff]  ;;  %v3456_v22 = vld [vmem:[%s7766_s5 + $0xd0] sm:$0xff] }
 0x235   : > { %5013 = vmatprep.mubr.f32.mxu1 %v7013_v1  ;;  %3231 = vmatprep.mubr.f32.mxu0 %v2657_v38  ;;  %v3457_v38 = vld [vmem:[%s7766_s5 + $0xd8] sm:$0xff] }
 0x237   : > { %5014 = vmatmul.mubr.f32.vlgmr.msra.gmra.mrb[64].mxu1 %v7037_v17  ;;  %v3478_v17 = vld [vmem:[%s7766_s5 + $0x180] sm:$0xff] }
 0x238   : > { %3232 = vmatmul.mubr.f32.gmra.mrb[70].mxu0 %v7185_v2  ;;  %5016 = vmatprep.mubr.f32.mxu1 %v7061_v24  ;;  %v5421_v25 = vpack.c.bf16 %v3479_v18, %v3478_v17  ;;  %v3433_v24 = vld [vmem:[%s7766_s5 + $0x18] sm:$0xff]  ;;  %v3458_v17 = vld [vmem:[%s7766_s5 + $0xe0] sm:$0xff]  ;;  %v5441_v18 = vpack.c.bf16 %v3489_v16, %v3488_v15  ;;  %v3520_v15 = vld [vmem:[%s7766_s5 + $0x2d0] sm:$0xff] }
 0x239   : > { %v5395_v7 = vpack.c.bf16 %v3433_v24, %v3432_v31  ;;  %v5413_v26 = vpack.c.bf16 %v3459_v19, %v3458_v17  ;;  %v3490_v24 = vld [vmem:[%s7766_s5 + $0x1e0] sm:$0xff]  ;;  %3645 = vmatprep.mubr.f32.mxu0 %v3366_v4  ;;  %v3521_v16 = vld [vmem:[%s7766_s5 + $0x2d8] sm:$0xff]  ;;  %v3504_v19 = vld [vmem:[%s7766_s5 + $0x250] sm:$0xff] }
 0x23a   : > { %5422 = vmatprep.subr.bf16.mxu1 %v5421_v25  ;;  %v3472_v25 = vld [vmem:[%s7766_s5 + $0x150] sm:$0xff] }
 0x23b   : > { %5017 = vmatmul.mubr.f32.gmra.mrb[66].mxu1 %v7082_v41  ;;  %5396 = vmatpush3.bf16.msra.mxu0 %v5395_v7  ;;  %v3465_v41 = vld [vmem:[%s7766_s5 + $0x118] sm:$0xff]  ;;  %v5443_v13 = vpack.c.bf16 %v3473_v40, %v3472_v25  ;;  %v3491_v7 = vld [vmem:[%s7766_s5 + $0x1e8] sm:$0xff]  ;;  %v3522_v40 = vld [vmem:[%s7766_s5 + $0x2e0] sm:$0xff] }
 0x23c   : > { %5019 = vmatprep.mubr.f32.mxu1 %v7102_v45  ;;  %5424 = vmatpush3.bf16.msra.mxu1 %v5423_v28  ;;  %v5427_v0 = vpack.c.bf16 %v3465_v41, %v3464_v37  ;;  %v3452_v45 = vld [vmem:[%s7766_s5 + $0xb0] sm:$0xff]  ;;  %v3443_v28 = vld [vmem:[%s7766_s5 + $0x68] sm:$0xff]  ;;  %v5445_v32 = vpack.c.bf16 %v3491_v7, %v3490_v24  ;;  %v5417_v37 = vpack.c.bf16 %v3461_v33, %v3460_v29  ;;  %v3505_v25 = vld [vmem:[%s7766_s5 + $0x258] sm:$0xff] }
 0x23d   : > { %5426 = vmatprep.subr.bf16.mxu1 %v5425_v34  ;;  %5398 = vmatprep.subr.bf16.mxu0 %v5397_v42  ;;  %v5401_v56 = vpack.c.bf16 %v3453_v49, %v3452_v45  ;;  %v5415_v31 = vpack.c.bf16 %v3443_v28, %v3442_v27  ;;  %v3474_v34 = vld [vmem:[%s7766_s5 + $0x160] sm:$0xff]  ;;  %v3444_v42 = vld [vmem:[%s7766_s5 + $0x70] sm:$0xff]  ;;  %v3525_v7 = vld [vmem:[%s7766_s5 + $0x2f8] sm:$0xff] }
 0x23e   : > { %v5447_v41 = vpack.c.bf16 %v3475_v36, %v3474_v34  ;;  %v3476_v45 = vld [vmem:[%s7766_s5 + $0x170] sm:$0xff]  ;;  %v3510_v49 = vld [vmem:[%s7766_s5 + $0x280] sm:$0xff]  ;;  %v3509_v34 = vld [vmem:[%s7766_s5 + $0x278] sm:$0xff] }
 0x23f   : > { %5020 = vmatmul.mubr.f32.gmra.mrb[68].mxu1 %v7115_v58  ;;  %5400 = vmatpush3.bf16.msra.mxu0 %v5399_v57  ;;  %v5431_v58 = vpack.c.bf16 %v3467_v55, %v3466_v51  ;;  %v3492_v57 = vld [vmem:[%s7766_s5 + $0x1f0] sm:$0xff]  ;;  %v3511_v55 = vld [vmem:[%s7766_s5 + $0x288] sm:$0xff]  ;;  %v3506_v28 = vld [vmem:[%s7766_s5 + $0x260] sm:$0xff] }
 0x240   : > { %5022 = vmatprep.mubr.f32.mxu1 %v2641_v11  ;;  %5428 = vmatpush3.bf16.msra.mxu1 %v5427_v0  ;;  %v5437_v11 = vpack.c.bf16 %v3487_v61, %v3486_v30  ;;  %v3445_v0 = vld [vmem:[%s7766_s5 + $0x78] sm:$0xff]  ;;  %v5449_v48 = vpack.c.bf16 %v3493_v47, %v3492_v57  ;;  %v3516_v61 = vld [vmem:[%s7766_s5 + $0x2b0] sm:$0xff] }
 0x241   : > { %5430 = vmatprep.subr.bf16.mxu1 %v5429_v62  ;;  %5402 = vmatprep.subr.bf16.mxu0 %v5401_v56  ;;  %v5419_v44 = vpack.c.bf16 %v3445_v0, %v3444_v42  ;;  %v3477_v62 = vld [vmem:[%s7766_s5 + $0x178] sm:$0xff]  ;;  %v5453_v56 = vpack.c.bf16 %v3511_v55, %v3510_v49  ;;  %v3524_v24 = vld [vmem:[%s7766_s5 + $0x2f0] sm:$0xff]  ;;  %v4187_v0 = vld [vmem:[%s7765_s4] ss:$0 sm:$0xff] }
 0x242   : > { %v5451_v51 = vpack.c.bf16 %v3477_v62, %v3476_v45  ;;  %v3508_v33 = vld [vmem:[%s7766_s5 + $0x270] sm:$0xff] }
 0x243   : > { %5023 = vmatmul.mubr.f32.gmra.mrb[70].mxu1 %v2665_v3  ;;  %5404 = vmatpush3.bf16.msra.mxu0 %v5403_v54  ;;  %v3470_v3 = vld [vmem:[%s7766_s5 + $0x140] sm:$0xff]  ;;  %v5483_v36 = vpack.c.bf16 %v3509_v34, %v3508_v33 }
 0x244   : > { %5432 = vmatpush3.bf16.msra.mxu1 %v5431_v58  ;;  %5406 = vmatprep.subr.bf16.mxu0 %v5405_v50  ;;  %v3494_v58 = vld [vmem:[%s7766_s5 + $0x200] sm:$0xff] }
 0x245   : > { %5434 = vmatprep.subr.bf16.mxu1 %v5433_v5  ;;  %v5455_v35 = vpack.c.bf16 %v3495_v6, %v3494_v58  ;;  %v3542_v54 = vld [vmem:[%s7766_s5 + $0x380] sm:$0xff]  ;;  %v3513_v5 = vld [vmem:[%s7766_s5 + $0x298] sm:$0xff] }
 0x246   : > { %v5485_v59 = vpack.c.bf16 %v3543_v23, %v3542_v54  ;;  %v5457_v60 = vpack.c.bf16 %v3513_v5, %v3512_v63  ;;  %v3514_v50 = vld [vmem:[%s7766_s5 + $0x2a0] sm:$0xff] }
 0x247   : > { %5408 = vmatpush3.bf16.msra.mxu0 %v5407_v21  ;;  %v3499_v21 = vld [vmem:[%s7766_s5 + $0x228] sm:$0xff] }
 0x248   : > { %5436 = vmatpush3.bf16.msra.mxu1 %v5435_v43  ;;  %v3515_v43 = vld [vmem:[%s7766_s5 + $0x2a8] sm:$0xff]  ;;  %v5463_v30 = vpack.c.bf16 %v3499_v21, %v3498_v53 }
 0x249   : > { %5438 = vmatprep.subr.bf16.mxu1 %v5437_v11  ;;  %v5461_v39 = vpack.c.bf16 %v3515_v43, %v3514_v50 }
 0x24b   : > { %v4473_v52 = vpop.f32.mrb[32].mxu1 }
 0x24c   : > { %v4474_v1 = vpop.f32.mrb[33].mxu1 }
 0x24d   : > { %v7192_v9 = vadd.f32 %v4474_v1, %v4473_v52  ;;  %v3471_v52 = vld [vmem:[%s7766_s5 + $0x148] sm:$0xff]  ;;  %v5409_v1 = vpack.c.bf16 %v3457_v38, %v3456_v22  ;;  %v3517_v22 = vld [vmem:[%s7766_s5 + $0x2b8] sm:$0xff]  ;;  %v3500_v38 = vld [vmem:[%s7766_s5 + $0x230] sm:$0xff] }
 0x24e   : > { %v5439_v10 = vpack.c.bf16 %v3471_v52, %v3470_v3  ;;  %v5465_v11 = vpack.c.bf16 %v3517_v22, %v3516_v61  ;;  %v3501_v3 = vld [vmem:[%s7766_s5 + $0x238] sm:$0xff]  ;;  %v3518_v52 = vld [vmem:[%s7766_s5 + $0x2c0] sm:$0xff] }
 0x24f   : > { %5410 = vmatprep.subr.bf16.mxu0 %v5409_v1  ;;  %v3519_v1 = vld [vmem:[%s7766_s5 + $0x2c8] sm:$0xff]  ;;  %v2884_v45 = vadd.f32 %v7192_v9, %v4187_v0 }
 0x250   : > { %5440 = vmatpush3.bf16.msra.mxu1 %v5439_v10  ;;  %5412 = vmatpush3.bf16.msra.mxu0 %v5411_v14  ;;  %v5467_v10 = vpack.c.bf16 %v3501_v3, %v3500_v38  ;;  %v5469_v8 = vpack.c.bf16 %v3519_v1, %v3518_v52  ;;  %v3503_v14 = vld [vmem:[%s7766_s5 + $0x248] sm:$0xff] }
 0x251   : > { %5442 = vmatprep.subr.bf16.mxu1 %v5441_v18  ;;  %5414 = vmatprep.subr.bf16.mxu0 %v5413_v26  ;;  %v5471_v17 = vpack.c.bf16 %v3503_v14, %v3502_v12  ;;  %v5473_v18 = vpack.c.bf16 %v3521_v16, %v3520_v15  ;;  %v3523_v26 = vld [vmem:[%s7766_s5 + $0x2e8] sm:$0xff] }
 0x252   : > { %v5477_v27 = vpack.c.bf16 %v3523_v26, %v3522_v40 }
 0x254   : > { %5444 = vmatpush3.bf16.msra.mxu1 %v5443_v13  ;;  %5416 = vmatpush3.bf16.msra.mxu0 %v5415_v31  ;;  %v5475_v13 = vpack.c.bf16 %v3505_v25, %v3504_v19  ;;  %v3507_v31 = vld [vmem:[%s7766_s5 + $0x268] sm:$0xff] }
 0x255   : > { %5446 = vmatprep.subr.bf16.mxu1 %v5445_v32  ;;  %5418 = vmatprep.subr.bf16.mxu0 %v5417_v37  ;;  %v5479_v29 = vpack.c.bf16 %v3507_v31, %v3506_v28  ;;  %v5481_v32 = vpack.c.bf16 %v3525_v7, %v3524_v24  ;;  %v3558_v37 = vld [vmem:[%s7766_s5 + $0x400] sm:$0xff] }
 0x258   : > { %5448 = vmatpush3.bf16.msra.mxu1 %v5447_v41  ;;  %5420 = vmatpush3.bf16.msra.mxu0 %v5419_v44  ;;  %v3559_v41 = vld [vmem:[%s7766_s5 + $0x408] sm:$0xff] }
 0x259   : > { %5450 = vmatprep.subr.bf16.mxu1 %v5449_v48  ;;  %5454 = vmatprep.subr.bf16.mxu0 %v5453_v56  ;;  %v7495_v42 = vpack.c.bf16 %v3559_v41, %v3558_v37 }
 0x25b   : > { %3646 = vmatmul.mubr.f32.vlgmr.msra.gmra.mrb[72].mxu0 %v7185_v2  ;;  %v3497_v2 = vld [vmem:[%s7766_s5 + $0x218] sm:$0xff] }
 0x25c   : > { %5452 = vmatpush3.bf16.msra.mxu1 %v5451_v51  ;;  %5456 = vmatpush3.bf16.msra.mxu0 %v5455_v35  ;;  %v5459_v20 = vpack.c.bf16 %v3497_v2, %v3496_v46 }
 0x25d   : > { %5486 = vmatprep.subr.bf16.mxu1 %v5485_v59  ;;  %5458 = vmatprep.subr.bf16.mxu0 %v5457_v60 }
 0x260   : > { %5460 = vmatpush3.bf16.msra.mxu0 %v5459_v20 }
 0x261   : > { %5462 = vmatprep.subr.bf16.mxu0 %v5461_v39 }
 0x264   : > { %5464 = vmatpush3.bf16.msra.mxu0 %v5463_v30 }
 0x265   : > { %5466 = vmatprep.subr.bf16.mxu0 %v5465_v11 }
 0x268   : > { %5468 = vmatpush3.bf16.msra.mxu0 %v5467_v10 }
 0x269   : > { %5470 = vmatprep.subr.bf16.mxu0 %v5469_v8 }
 0x26c   : > { %5472 = vmatpush3.bf16.msra.mxu0 %v5471_v17 }
 0x26d   : > { %5474 = vmatprep.subr.bf16.mxu0 %v5473_v18 }
 0x270   : > { %5476 = vmatpush3.bf16.msra.mxu0 %v5475_v13 }
 0x271   : > { %5478 = vmatprep.subr.bf16.mxu0 %v5477_v27 }
 0x274   : > { %5480 = vmatpush3.bf16.msra.mxu0 %v5479_v29 }
 0x275   : > { %5482 = vmatprep.subr.bf16.mxu0 %v5481_v32 }
 0x278   : > { %5484 = vmatpush3.bf16.msra.mxu0 %v5483_v36 }
 0x279   : > { %5518 = vmatprep.subr.bf16.mxu0 %v7495_v42 }
 0x2ce   : > { %v4476_v44 = vpop.f32.mrb[34].mxu1 }
 0x2cf   : > { %v4529_v4 = vpop.f32.mrb[40].mxu0  ;;  %v4477_v57 = vpop.f32.mrb[35].mxu1 }
 0x2d0   : > { %v4478_v47 = vadd.f32 %v4477_v57, %v4476_v44  ;;  %v4530_v48 = vpop.f32.mrb[41].mxu0 }
 0x2d1   : > { %v4531_v62 = vadd.f32 %v4530_v48, %v4529_v4 }
 0x2d2   : > { %v4479_v49 = vpop.f32.mrb[36].mxu1  ;;  %v2889_v35 = vadd.f32 %v4478_v47, %v4187_v0 }
 0x2d3   : > { %v2989_v51 = vadd.f32 %v4531_v62, %v2884_v45  ;;  %v4532_v55 = vpop.f32.mrb[42].mxu0  ;;  %v4480_v56 = vpop.f32.mrb[37].mxu1 }
 0x2d4   : > { %v4481_v58 = vadd.f32 %v4480_v56, %v4479_v49  ;;  %v4533_v6 = vpop.f32.mrb[43].mxu0 }
 0x2d5   : > { %v4534_v54 = vadd.f32 %v4533_v6, %v4532_v55 }
 0x2d6   : > { %v4482_v23 = vpop.f32.mrb[38].mxu1  ;;  %v2894_v2 = vadd.f32 %v4481_v58, %v4187_v0 }
 0x2d7   : > { %v2994_v59 = vadd.f32 %v4534_v54, %v2889_v35  ;;  %v4535_v63 = vpop.f32.mrb[44].mxu0  ;;  %v4483_v5 = vpop.f32.mrb[39].mxu1 }
 0x2d8   : > { %v4484_v60 = vadd.f32 %v4483_v5, %v4482_v23  ;;  %v4536_v46 = vpop.f32.mrb[45].mxu0 }
 0x2d9   : > { %v4537_v20 = vadd.f32 %v4536_v46, %v4535_v63 }
 0x2da   : > { %v4485_v50 = vpop.f32.mrb[40].mxu1  ;;  %v2899_v30 = vadd.f32 %v4484_v60, %v4187_v0 }
 0x2db   : > { %v2999_v43 = vadd.f32 %v4537_v20, %v2894_v2  ;;  %v4538_v9 = vpop.f32.mrb[46].mxu0  ;;  %v4486_v39 = vpop.f32.mrb[41].mxu1 }
 0x2dc   : > { %v4487_v53 = vadd.f32 %v4486_v39, %v4485_v50  ;;  %v4539_v21 = vpop.f32.mrb[47].mxu0 }
 0x2dd   : > { %v4540_v61 = vadd.f32 %v4539_v21, %v4538_v9 }
 0x2de   : > { %v4488_v22 = vpop.f32.mrb[42].mxu1  ;;  %v2904_v10 = vadd.f32 %v4487_v53, %v4187_v0 }
 0x2df   : > { %v3004_v11 = vadd.f32 %v4540_v61, %v2899_v30  ;;  %v4541_v38 = vpop.f32.mrb[48].mxu0  ;;  %v4489_v3 = vpop.f32.mrb[43].mxu1 }
 0x2e0   : > { %v4490_v52 = vadd.f32 %v4489_v3, %v4488_v22  ;;  %v4542_v1 = vpop.f32.mrb[49].mxu0 }
 0x2e1   : > { %v4543_v8 = vadd.f32 %v4542_v1, %v4541_v38 }
 0x2e2   : > { %v4491_v12 = vpop.f32.mrb[44].mxu1  ;;  %v2909_v19 = vadd.f32 %v4490_v52, %v4187_v0 }
 0x2e3   : > { %v3009_v14 = vadd.f32 %v4543_v8, %v2904_v10  ;;  %v4544_v15 = vpop.f32.mrb[50].mxu0  ;;  %v4492_v16 = vpop.f32.mrb[45].mxu1 }
 0x2e4   : > { %v4493_v17 = vadd.f32 %v4492_v16, %v4491_v12  ;;  %v4545_v18 = vpop.f32.mrb[51].mxu0 }
 0x2e5   : > { %v4546_v25 = vadd.f32 %v4545_v18, %v4544_v15 }
 0x2e6   : > { %v4494_v40 = vpop.f32.mrb[46].mxu1  ;;  %v2914_v24 = vadd.f32 %v4493_v17, %v4187_v0 }
 0x2e7   : > { %v3014_v26 = vadd.f32 %v4546_v25, %v2909_v19  ;;  %v4547_v13 = vpop.f32.mrb[52].mxu0  ;;  %v4495_v27 = vpop.f32.mrb[47].mxu1 }
 0x2e8   : > { %v4496_v28 = vadd.f32 %v4495_v27, %v4494_v40  ;;  %v4548_v31 = vpop.f32.mrb[53].mxu0 }
 0x2e9   : > { %v4549_v7 = vadd.f32 %v4548_v31, %v4547_v13 }
 0x2ea   : > { %v4585_v29 = vpop.f32.mrb[48].mxu1  ;;  %v2919_v41 = vadd.f32 %v4496_v28, %v4187_v0 }
 0x2eb   : > { %v3019_v32 = vadd.f32 %v4549_v7, %v2914_v24  ;;  %v4550_v33 = vpop.f32.mrb[54].mxu0  ;;  %v4586_v34 = vpop.f32.mrb[49].mxu1 }
 0x2ec   : > { %v4551_v36 = vpop.f32.mrb[55].mxu0  ;;  %v4587_v37 = vadd.f32 %v4586_v34, %v4585_v29 }
 0x2ed   : > { %v4552_v44 = vadd.f32 %v4551_v36, %v4550_v33 }
 0x2ee   : > { %v3094_v4 = vadd.f32 %v4587_v37, %v2989_v51  ;;  %v4588_v57 = vpop.f32.mrb[50].mxu1 }
 0x2ef   : > { %v3024_v47 = vadd.f32 %v4552_v44, %v2919_v41  ;;  %v4641_v48 = vpop.f32.mrb[56].mxu0  ;;  %v4589_v45 = vpop.f32.mrb[51].mxu1 }
 0x2f0   : > { %v4590_v62 = vadd.f32 %v4589_v45, %v4588_v57  ;;  %v4642_v49 = vpop.f32.mrb[57].mxu0 }
 0x2f1   : > { %v4643_v55 = vadd.f32 %v4642_v49, %v4641_v48 }
 0x2f2   : > { %v3099_v56 = vadd.f32 %v4590_v62, %v2994_v59  ;;  %v4591_v58 = vpop.f32.mrb[52].mxu1 }
 0x2f3   : > { %v4644_v6 = vpop.f32.mrb[58].mxu0  ;;  %v4592_v35 = vpop.f32.mrb[53].mxu1  ;;  %v3199_v54 = vadd.f32 %v4643_v55, %v3094_v4 }
 0x2f4   : > { %v4593_v23 = vadd.f32 %v4592_v35, %v4591_v58  ;;  %v4645_v63 = vpop.f32.mrb[59].mxu0 }
 0x2f5   : > { %v4646_v5 = vadd.f32 %v4645_v63, %v4644_v6  ;;  %v3526_v63 = vld [vmem:[%s7766_s5 + $0x300] sm:$0xff] }
 0x2f6   : > { %v3104_v60 = vadd.f32 %v4593_v23, %v2999_v43  ;;  %v4594_v46 = vpop.f32.mrb[54].mxu1 }
 0x2f7   : > { %v4647_v0 = vpop.f32.mrb[60].mxu0  ;;  %v4595_v2 = vpop.f32.mrb[55].mxu1  ;;  %v3204_v51 = vadd.f32 %v4646_v5, %v3099_v56  ;;  %v3527_v5 = vld [vmem:[%s7766_s5 + $0x308] sm:$0xff] }
 0x2f8   : > { %v4596_v20 = vadd.f32 %v4595_v2, %v4594_v46  ;;  %v4648_v50 = vpop.f32.mrb[61].mxu0  ;;  %v3544_v46 = vld [vmem:[%s7766_s5 + $0x390] sm:$0xff] }
 0x2f9   : > { %v4649_v9 = vadd.f32 %v4648_v50, %v4647_v0  ;;  %v3545_v0 = vld [vmem:[%s7766_s5 + $0x398] sm:$0xff]  ;;  %v3374_v50 = vld [vmem:[#allocation2 + $0x2] sm:$0xff] }
 0x2fa   : > { %v3109_v39 = vadd.f32 %v4596_v20, %v3004_v11  ;;  %v4597_v53 = vpop.f32.mrb[56].mxu1 }
 0x2fb   : > { %v4650_v21 = vpop.f32.mrb[62].mxu0  ;;  %v4598_v30 = vpop.f32.mrb[57].mxu1  ;;  %v3209_v59 = vadd.f32 %v4649_v9, %v3104_v60  ;;  %v5487_v9 = vpack.c.bf16 %v3527_v5, %v3526_v63  ;;  %v3556_v63 = vld [vmem:[%s7766_s5 + $0x3f0] sm:$0xff]  ;;  %v3557_v5 = vld [vmem:[%s7766_s5 + $0x3f8] sm:$0xff] }
 0x2fc   : > { %v4599_v61 = vadd.f32 %v4598_v30, %v4597_v53  ;;  %v4651_v22 = vpop.f32.mrb[63].mxu0  ;;  %v5489_v30 = vpack.c.bf16 %v3545_v0, %v3544_v46  ;;  %v5513_v0 = vpack.c.bf16 %v3557_v5, %v3556_v63 }
 0x2fd   : > { %v4652_v38 = vadd.f32 %v4651_v22, %v4650_v21 }
 0x2fe   : > { %v3114_v3 = vadd.f32 %v4599_v61, %v3009_v14  ;;  %v4600_v52 = vpop.f32.mrb[58].mxu1  ;;  %v3529_v61 = vld [vmem:[%s7766_s5 + $0x318] sm:$0xff] }
 0x2ff   : > { %v4653_v1 = vpop.f32.mrb[64].mxu0  ;;  %v4601_v10 = vpop.f32.mrb[59].mxu1  ;;  %v3214_v43 = vadd.f32 %v4652_v38, %v3109_v39  ;;  %v3546_v38 = vld [vmem:[%s7766_s5 + $0x3a0] sm:$0xff] }
 0x300   : > { %v4602_v8 = vadd.f32 %v4601_v10, %v4600_v52  ;;  %v4654_v12 = vpop.f32.mrb[65].mxu0 }
 0x301   : > { %v4655_v15 = vadd.f32 %v4654_v12, %v4653_v1  ;;  %v3530_v12 = vld [vmem:[%s7766_s5 + $0x320] sm:$0xff] }
 0x302   : > { %v3119_v16 = vadd.f32 %v4602_v8, %v3014_v26  ;;  %v4603_v17 = vpop.f32.mrb[60].mxu1 }
 0x303   : > { %v4656_v18 = vpop.f32.mrb[66].mxu0  ;;  %v4604_v19 = vpop.f32.mrb[61].mxu1  ;;  %v3219_v11 = vadd.f32 %v4655_v15, %v3114_v3  ;;  %v3547_v3 = vld [vmem:[%s7766_s5 + $0x3a8] sm:$0xff] }
 0x304   : > { %v4605_v25 = vadd.f32 %v4604_v19, %v4603_v17  ;;  %v4657_v40 = vpop.f32.mrb[67].mxu0  ;;  %v5493_v8 = vpack.c.bf16 %v3547_v3, %v3546_v38  ;;  %v3531_v15 = vld [vmem:[%s7766_s5 + $0x328] sm:$0xff]  ;;  %v3548_v17 = vld [vmem:[%s7766_s5 + $0x3b0] sm:$0xff] }
 0x305   : > { %v4658_v13 = vadd.f32 %v4657_v40, %v4656_v18  ;;  %v3549_v18 = vld [vmem:[%s7766_s5 + $0x3b8] sm:$0xff]  ;;  %v3532_v40 = vld [vmem:[%s7766_s5 + $0x330] sm:$0xff]  ;;  %v3563_v38 = vld [vmem:[%s7766_s5 + $0x428] sm:$0xff] }
 0x306   : > { %v3124_v27 = vadd.f32 %v4605_v25, %v3019_v32  ;;  %v4606_v28 = vpop.f32.mrb[62].mxu1  ;;  %v5497_v25 = vpack.c.bf16 %v3549_v18, %v3548_v17  ;;  %v3564_v3 = vld [vmem:[%s7766_s5 + $0x430] sm:$0xff]  ;;  %v3573_v18 = vld [vmem:[%s7766_s5 + $0x478] sm:$0xff] }
 0x307   : > { %v4659_v31 = vpop.f32.mrb[68].mxu0  ;;  %v4607_v24 = vpop.f32.mrb[63].mxu1  ;;  %v3224_v14 = vadd.f32 %v4658_v13, %v3119_v16  ;;  %v3533_v13 = vld [vmem:[%s7766_s5 + $0x338] sm:$0xff]  ;;  %v3572_v17 = vld [vmem:[%s7766_s5 + $0x470] sm:$0xff] }
 0x308   : > { %v4608_v7 = vadd.f32 %v4607_v24, %v4606_v28  ;;  %v4660_v29 = vpop.f32.mrb[69].mxu0  ;;  %v3550_v28 = vld [vmem:[%s7766_s5 + $0x3c0] sm:$0xff] }
 0x309   : > { %v4661_v33 = vadd.f32 %v4660_v29, %v4659_v31  ;;  %v3551_v31 = vld [vmem:[%s7766_s5 + $0x3c8] sm:$0xff]  ;;  %v3534_v29 = vld [vmem:[%s7766_s5 + $0x340] sm:$0xff] }
 0x30a   : > { %v3129_v34 = vadd.f32 %v4608_v7, %v3024_v47  ;;  %v5015_v36 = vpop.f32.mrb[64].mxu1  ;;  %v5501_v7 = vpack.c.bf16 %v3551_v31, %v3550_v28 }
 0x30b   : > { %v4662_v37 = vpop.f32.mrb[70].mxu0  ;;  %v3309_v41 = vadd.f32 %v5015_v36, %v3204_v51  ;;  %v3303_v26 = vpop.f32.mrb[65].mxu1  ;;  %v3229_v44 = vadd.f32 %v4661_v33, %v3124_v27  ;;  %v3535_v33 = vld [vmem:[%s7766_s5 + $0x348] sm:$0xff]  ;;  %v3552_v36 = vld [vmem:[%s7766_s5 + $0x3d0] sm:$0xff] }
 0x30c   : > { %v4663_v4 = vpop.f32.mrb[71].mxu0  ;;  %v3304_v57 = vadd.f32 %v3303_v26, %v3199_v54  ;;  %v5503_v26 = vpack.c.bf16 %v3535_v33, %v3534_v29 }
 0x30d   : > { %v7502_v48 = vmax.f32 %v3309_v41, 0.0  ;;  %v4664_v45 = vadd.f32 %v4663_v4, %v4662_v37  ;;  %v3553_v37 = vld [vmem:[%s7766_s5 + $0x3d8] sm:$0xff]  ;;  %v3536_v4 = vld [vmem:[%s7766_s5 + $0x350] sm:$0xff] }
 0x30e   : > { %v7504_v62 = vmax.f32 %v3304_v57, 0.0  ;;  %v5018_v32 = vpop.f32.mrb[66].mxu1  ;;  %v3537_v57 = vld [vmem:[%s7766_s5 + $0x358] sm:$0xff] }
 0x30f   : > { %3351 = vst [vmem:[#allocation2 + $0x21] sm:$0xff] %v7502_v48  ;;  %v3319_v49 = vadd.f32 %v5018_v32, %v3214_v43  ;;  %v3313_v55 = vpop.f32.mrb[67].mxu1  ;;  %v3234_v56 = vadd.f32 %v4664_v45, %v3129_v34  ;;  %v3554_v32 = vld [vmem:[%s7766_s5 + $0x3e0] sm:$0xff] }
 0x310   : > { %3350 = vst [vmem:[#allocation2 + $0x11] sm:$0xff] %v7504_v62  ;;  %v3314_v47 = vadd.f32 %v3313_v55, %v3209_v59  ;;  %3650 = vmatprep.mubr.f32.mxu0 %v7504_v62  ;;  %v3528_v59 = vld [vmem:[%s7766_s5 + $0x310] sm:$0xff] }
 0x311   : > { %v7509_v58 = vmax.f32 %v3319_v49, 0.0  ;;  %v5491_v43 = vpack.c.bf16 %v3529_v61, %v3528_v59  ;;  %v3555_v49 = vld [vmem:[%s7766_s5 + $0x3e8] sm:$0xff] }
 0x312   : > { %v7511_v6 = vmax.f32 %v3314_v47, 0.0  ;;  %v5021_v35 = vpop.f32.mrb[68].mxu1  ;;  %v5509_v47 = vpack.c.bf16 %v3555_v49, %v3554_v32 }
 0x313   : > { %3353 = vst [vmem:[#allocation2 + $0x41] sm:$0xff] %v7509_v58  ;;  %v3329_v54 = vadd.f32 %v5021_v35, %v3224_v14  ;;  %v3323_v23 = vpop.f32.mrb[69].mxu1  ;;  %v5499_v14 = vpack.c.bf16 %v3533_v13, %v3532_v40  ;;  %v3538_v35 = vld [vmem:[%s7766_s5 + $0x360] sm:$0xff] }
 0x314   : > { %3352 = vst [vmem:[#allocation2 + $0x31] sm:$0xff] %v7511_v6  ;;  %v3324_v60 = vadd.f32 %v3323_v23, %v3219_v11  ;;  %v5495_v11 = vpack.c.bf16 %v3531_v15, %v3530_v12  ;;  %v3569_v12 = vld [vmem:[%s7766_s5 + $0x458] sm:$0xff]  ;;  %v3570_v15 = vld [vmem:[%s7766_s5 + $0x460] sm:$0xff] }
 0x315   : > { %v7527_v2 = vmax.f32 %v3329_v54, 0.0  ;;  %v3539_v54 = vld [vmem:[%s7766_s5 + $0x368] sm:$0xff] }
 0x316   : > { %v7529_v51 = vmax.f32 %v3324_v60, 0.0  ;;  %v5024_v20 = vpop.f32.mrb[70].mxu1  ;;  %v7548_v1 = vld [vmem:[#allocation2 + $0x20] sm:$0xff]  ;;  %v5511_v46 = vpack.c.bf16 %v3539_v54, %v3538_v35 }
 0x317   : > { %3355 = vst [vmem:[#allocation2 + $0x61] sm:$0xff] %v7527_v2  ;;  %v3339_v39 = vadd.f32 %v5024_v20, %v3234_v56  ;;  %v3333_v53 = vpop.f32.mrb[71].mxu1  ;;  %v3382_v21 = vld [vmem:[#allocation2 + $0x10] sm:$0xff]  ;;  %v7582_v27 = vld [vmem:[#allocation2 + $0x22] sm:$0xff]  ;;  %v5507_v56 = vpack.c.bf16 %v3537_v57, %v3536_v4 }
 0x318   : > { %3354 = vst [vmem:[#allocation2 + $0x51] sm:$0xff] %v7529_v51  ;;  %v3334_v22 = vadd.f32 %v3333_v53, %v3229_v44  ;;  %3750 = vmatprep.mubr.f32.mxu1 %v3382_v21  ;;  %3651 = vmatmul.mubr.f32.gmra.mrb[74].mxu0 %v3382_v21  ;;  %v7562_v16 = vld [vmem:[#allocation2 + $0x12] sm:$0xff]  ;;  %v5505_v44 = vpack.c.bf16 %v3553_v37, %v3552_v36 }
 0x319   : > { %v7545_v52 = vmax.f32 %v3339_v39, 0.0  ;;  %3751 = vmatmul.mubr.f32.vlgmr.msra.gmra.mrb[72].mxu1 %v3374_v50  ;;  %3655 = vmatprep.mubr.f32.mxu0 %v7502_v48  ;;  %v3540_v20 = vld [vmem:[%s7766_s5 + $0x370] sm:$0xff]  ;;  %v3541_v50 = vld [vmem:[%s7766_s5 + $0x378] sm:$0xff] }
 0x31a   : > { %v7550_v10 = vmax.f32 %v3334_v22, 0.0  ;;  %5488 = vmatpush3.bf16.msra.mxu1 %v5487_v9  ;;  %3755 = vmatprep.mubr.f32.mxu1 %v7548_v1  ;;  %v7592_v24 = vld [vmem:[#allocation2 + $0x40] sm:$0xff]  ;;  %v3560_v53 = vld [vmem:[%s7766_s5 + $0x410] sm:$0xff]  ;;  %v3561_v21 = vld [vmem:[%s7766_s5 + $0x418] sm:$0xff] }
 0x31b   : > { %3357 = vst [vmem:[#allocation2 + $0x81] sm:$0xff] %v7545_v52  ;;  %5490 = vmatprep.subr.bf16.mxu1 %v5489_v30  ;;  %v7572_v19 = vld [vmem:[#allocation2 + $0x30] sm:$0xff]  ;;  %v7622_v45 = vld [vmem:[#allocation2 + $0x42] sm:$0xff]  ;;  %v5515_v30 = vpack.c.bf16 %v3541_v50, %v3540_v20  ;;  %v5521_v61 = vpack.c.bf16 %v3561_v21, %v3560_v53 }
 0x31c   : > { %3356 = vst [vmem:[#allocation2 + $0x71] sm:$0xff] %v7550_v10  ;;  %3656 = vmatmul.mubr.f32.gmra.mrb[76].mxu0 %v7548_v1  ;;  %v7602_v34 = vld [vmem:[#allocation2 + $0x32] sm:$0xff]  ;;  %v3562_v22 = vld [vmem:[%s7766_s5 + $0x420] sm:$0xff] }
 0x31d   : > { %3756 = vmatmul.mubr.f32.gmra.mrb[74].mxu1 %v7562_v16  ;;  %3660 = vmatprep.mubr.f32.mxu0 %v7511_v6 }
 0x31e   : > { %5492 = vmatpush3.bf16.msra.mxu1 %v5491_v43  ;;  %3760 = vmatprep.mubr.f32.mxu1 %v7572_v19  ;;  %v7632_v55 = vld [vmem:[#allocation2 + $0x60] sm:$0xff]  ;;  %v3565_v43 = vld [vmem:[%s7766_s5 + $0x438] sm:$0xff] }
 0x31f   : > { %5494 = vmatprep.subr.bf16.mxu1 %v5493_v8  ;;  %v7612_v41 = vld [vmem:[#allocation2 + $0x50] sm:$0xff]  ;;  %v7662_v9 = vld [vmem:[#allocation2 + $0x62] sm:$0xff] }
 0x320   : > { %3661 = vmatmul.mubr.f32.gmra.mrb[78].mxu0 %v7572_v19  ;;  %v7642_v23 = vld [vmem:[#allocation2 + $0x52] sm:$0xff] }
 0x321   : > { %3761 = vmatmul.mubr.f32.gmra.mrb[76].mxu1 %v7582_v27  ;;  %3665 = vmatprep.mubr.f32.mxu0 %v7509_v58  ;;  %v3568_v8 = vld [vmem:[%s7766_s5 + $0x450] sm:$0xff] }
 0x322   : > { %5496 = vmatpush3.bf16.msra.mxu1 %v5495_v11  ;;  %3765 = vmatprep.mubr.f32.mxu1 %v7592_v24  ;;  %v7665_v39 = vld [vmem:[#allocation2 + $0x80] sm:$0xff]  ;;  %v3421_v11 = vld [vmem:[#allocation2 + $0x91] sm:$0xff] }
 0x323   : > { %5498 = vmatprep.subr.bf16.mxu1 %v5497_v25  ;;  %v7652_v60 = vld [vmem:[#allocation2 + $0x70] sm:$0xff] }
 0x324   : > { %3666 = vmatmul.mubr.f32.gmra.mrb[80].mxu0 %v7592_v24  ;;  %v7675_v59 = vld [vmem:[#allocation2 + $0x72] sm:$0xff] }
 0x325   : > { %3766 = vmatmul.mubr.f32.gmra.mrb[78].mxu1 %v7602_v34  ;;  %3670 = vmatprep.mubr.f32.mxu0 %v7529_v51 }
 0x326   : > { %5500 = vmatpush3.bf16.msra.mxu1 %v5499_v14  ;;  %3770 = vmatprep.mubr.f32.mxu1 %v7612_v41 }
 0x327   : > { %5502 = vmatprep.subr.bf16.mxu1 %v5501_v7 }
 0x328   : > { %3671 = vmatmul.mubr.f32.gmra.mrb[82].mxu0 %v7612_v41 }
 0x329   : > { %3771 = vmatmul.mubr.f32.gmra.mrb[80].mxu1 %v7622_v45  ;;  %3675 = vmatprep.mubr.f32.mxu0 %v7527_v2 }
 0x32a   : > { %5504 = vmatpush3.bf16.msra.mxu1 %v5503_v26  ;;  %3775 = vmatprep.mubr.f32.mxu1 %v7632_v55 }
 0x32b   : > { %5506 = vmatprep.subr.bf16.mxu1 %v5505_v44 }
 0x32c   : > { %3676 = vmatmul.mubr.f32.gmra.mrb[84].mxu0 %v7632_v55 }
 0x32d   : > { %3776 = vmatmul.mubr.f32.gmra.mrb[82].mxu1 %v7642_v23  ;;  %3680 = vmatprep.mubr.f32.mxu0 %v7550_v10 }
 0x32e   : > { %5508 = vmatpush3.bf16.msra.mxu1 %v5507_v56  ;;  %3780 = vmatprep.mubr.f32.mxu1 %v7652_v60  ;;  %v4721_v25 = vpop.f32.mrb[72].mxu0 }
 0x32f   : > { %5510 = vmatprep.subr.bf16.mxu1 %v5509_v47  ;;  %v4722_v40 = vpop.f32.mrb[73].mxu0 }
 0x330   : > { %3681 = vmatmul.mubr.f32.gmra.mrb[86].mxu0 %v7652_v60  ;;  %v4723_v13 = vadd.f32 %v4722_v40, %v4721_v25 }
 0x331   : > { %3781 = vmatmul.mubr.f32.gmra.mrb[84].mxu1 %v7662_v9  ;;  %3855 = vmatprep.mubr.f32.mxu0 %v7562_v16  ;;  %v3571_v16 = vld [vmem:[%s7766_s5 + $0x468] sm:$0xff] }
 0x332   : > { %5512 = vmatpush3.bf16.msra.mxu1 %v5511_v46  ;;  %3785 = vmatprep.mubr.f32.mxu1 %v7665_v39 }
 0x333   : > { %5514 = vmatprep.subr.bf16.mxu1 %v5513_v0 }
 0x334   : > { %3856 = vmatmul.mubr.f32.vlgmr.msra.gmra.mrb[88].mxu0 %v7504_v62  ;;  %v5525_v62 = vpack.c.bf16 %v3563_v38, %v3562_v22 }
 0x335   : > { %3786 = vmatmul.mubr.f32.gmra.mrb[86].mxu1 %v7675_v59  ;;  %3860 = vmatprep.mubr.f32.mxu0 %v7582_v27 }
 0x336   : > { %5516 = vmatpush3.bf16.msra.mxu1 %v5515_v30  ;;  %3960 = vmatprep.mubr.f32.mxu1 %v7502_v48 }
 0x337   : > { %5520 = vmatpush3.bf16.msra.mxu0 %v7495_v42  ;;  %5549 = vmatprep.subr.bf16.mxu1 %v7495_v42 }
 0x338   : > { %3861 = vmatmul.mubr.f32.gmra.mrb[90].mxu0 %v7502_v48  ;;  %5522 = vmatprep.subr.bf16.mxu0 %v5521_v61  ;;  %v5529_v48 = vpack.c.bf16 %v3565_v43, %v3564_v3 }
 0x339   : > { %3961 = vmatmul.mubr.f32.vlgmr.msra.gmra.mrb[88].mxu1 %v7548_v1  ;;  %3865 = vmatprep.mubr.f32.mxu0 %v7602_v34  ;;  %v3566_v1 = vld [vmem:[%s7766_s5 + $0x440] sm:$0xff] }
 0x33a   : > { %5557 = vmatpush3.bf16.msra.mxu1 %v7495_v42  ;;  %3965 = vmatprep.mubr.f32.mxu1 %v7511_v6  ;;  %v3567_v42 = vld [vmem:[%s7766_s5 + $0x448] sm:$0xff] }
 0x33b   : > { %5524 = vmatpush3.bf16.msra.mxu0 %v5521_v61  ;;  %5550 = vmatprep.subr.bf16.mxu1 %v5521_v61 }
 0x33c   : > { %3866 = vmatmul.mubr.f32.gmra.mrb[92].mxu0 %v7511_v6  ;;  %5526 = vmatprep.subr.bf16.mxu0 %v5525_v62  ;;  %v5533_v6 = vpack.c.bf16 %v3567_v42, %v3566_v1 }
 0x33d   : > { %3966 = vmatmul.mubr.f32.gmra.mrb[90].mxu1 %v7572_v19  ;;  %3870 = vmatprep.mubr.f32.mxu0 %v7622_v45  ;;  %v5545_v19 = vpack.c.bf16 %v3573_v18, %v3572_v17 }
 0x33e   : > { %5558 = vmatpush3.bf16.msra.mxu1 %v5521_v61  ;;  %3970 = vmatprep.mubr.f32.mxu1 %v7509_v58 }
 0x33f   : > { %5528 = vmatpush3.bf16.msra.mxu0 %v5525_v62  ;;  %5551 = vmatprep.subr.bf16.mxu1 %v5525_v62 }
 0x340   : > { %3871 = vmatmul.mubr.f32.gmra.mrb[94].mxu0 %v7509_v58  ;;  %5530 = vmatprep.subr.bf16.mxu0 %v5529_v48  ;;  %v5537_v58 = vpack.c.bf16 %v3569_v12, %v3568_v8 }
 0x341   : > { %3971 = vmatmul.mubr.f32.gmra.mrb[92].mxu1 %v7592_v24  ;;  %3875 = vmatprep.mubr.f32.mxu0 %v7642_v23 }
 0x342   : > { %5559 = vmatpush3.bf16.msra.mxu1 %v5525_v62  ;;  %3975 = vmatprep.mubr.f32.mxu1 %v7529_v51 }
 0x343   : > { %5532 = vmatpush3.bf16.msra.mxu0 %v5529_v48  ;;  %5552 = vmatprep.subr.bf16.mxu1 %v5529_v48 }
 0x344   : > { %3876 = vmatmul.mubr.f32.gmra.mrb[96].mxu0 %v7529_v51  ;;  %5534 = vmatprep.subr.bf16.mxu0 %v5533_v6  ;;  %v5541_v51 = vpack.c.bf16 %v3571_v16, %v3570_v15 }
 0x345   : > { %3976 = vmatmul.mubr.f32.gmra.mrb[94].mxu1 %v7612_v41  ;;  %3880 = vmatprep.mubr.f32.mxu0 %v7662_v9 }
 0x346   : > { %5560 = vmatpush3.bf16.msra.mxu1 %v5529_v48  ;;  %3980 = vmatprep.mubr.f32.mxu1 %v7527_v2 }
 0x347   : > { %5536 = vmatpush3.bf16.msra.mxu0 %v5533_v6  ;;  %5553 = vmatprep.subr.bf16.mxu1 %v5533_v6 }
 0x348   : > { %3881 = vmatmul.mubr.f32.gmra.mrb[98].mxu0 %v7527_v2  ;;  %5538 = vmatprep.subr.bf16.mxu0 %v5537_v58  ;;  %v3405_v2 = vld [vmem:[#allocation2 + $0x82] sm:$0xff] }
 0x349   : > { %3981 = vmatmul.mubr.f32.gmra.mrb[96].mxu1 %v7632_v55  ;;  %3885 = vmatprep.mubr.f32.mxu0 %v7675_v59 }
 0x34a   : > { %5561 = vmatpush3.bf16.msra.mxu1 %v5533_v6  ;;  %3985 = vmatprep.mubr.f32.mxu1 %v7550_v10 }
 0x34b   : > { %5540 = vmatpush3.bf16.msra.mxu0 %v5537_v58  ;;  %5554 = vmatprep.subr.bf16.mxu1 %v5537_v58 }
 0x34c   : > { %3886 = vmatmul.mubr.f32.gmra.mrb[100].mxu0 %v7550_v10  ;;  %5542 = vmatprep.subr.bf16.mxu0 %v5541_v51  ;;  %v5609_v10 = vld [vmem:[#allocation2] sm:$0xff] }
 0x34d   : > { %3986 = vmatmul.mubr.f32.gmra.mrb[98].mxu1 %v7652_v60  ;;  %3890 = vmatprep.mubr.f32.mxu0 %v3405_v2 }
 0x34e   : > { %5562 = vmatpush3.bf16.msra.mxu1 %v5537_v58  ;;  %3990 = vmatprep.mubr.f32.mxu1 %v7545_v52 }
 0x34f   : > { %5544 = vmatpush3.bf16.msra.mxu0 %v5541_v51  ;;  %5555 = vmatprep.subr.bf16.mxu1 %v5541_v51 }
 0x350   : > { %3891 = vmatmul.mubr.f32.gmra.mrb[102].mxu0 %v7545_v52  ;;  %5546 = vmatprep.subr.bf16.mxu0 %v5545_v19  ;;  %v3429_v52 = vld [vmem:[#allocation2 + $0x92] sm:$0xff] }
 0x351   : > { %3991 = vmatmul.mubr.f32.gmra.mrb[100].mxu1 %v7665_v39  ;;  %5057 = vmatprep.mubr.f32.mxu0 %v7582_v27  ;;  %v4188_v27 = vld [vmem:[%s7767_s6] ss:$0 sm:$0xff] }
 0x352   : > { %5563 = vmatpush3.bf16.msra.mxu1 %v5541_v51  ;;  %3995 = vmatprep.mubr.f32.mxu1 %v3421_v11  ;;  %v3648_v31 = vadd.f32 %v4723_v13, %v4188_v27 }
 0x353   : > { %5548 = vmatpush3.bf16.msra.mxu0 %v5545_v19  ;;  %5556 = vmatprep.subr.bf16.mxu1 %v5545_v19 }
 0x355   : > { %3996 = vmatmul.mubr.f32.gmra.mrb[102].mxu1 %v5609_v10 }
 0x356   : > { %5564 = vmatpush3.bf16.msra.mxu1 %v5545_v19  ;;  %5058 = vmatmul.mubr.f32.vlgmr.msra.gmra.mrb[104].mxu0 %v7602_v34 }
 0x357   : > { %5060 = vmatprep.mubr.f32.mxu0 %v7622_v45  ;;  %5063 = vmatprep.mubr.f32.mxu1 %v7662_v9 }
 0x359   : > { %5064 = vmatmul.mubr.f32.vlgmr.msra.gmra.mrb[104].mxu1 %v7675_v59 }
 0x35a   : > { %5061 = vmatmul.mubr.f32.gmra.mrb[106].mxu0 %v7642_v23  ;;  %5066 = vmatprep.mubr.f32.mxu1 %v3405_v2 }
 0x35d   : > { %5067 = vmatmul.mubr.f32.gmra.mrb[106].mxu1 %v3429_v52 }
 0x3eb   : > { %v4724_v28 = vpop.f32.mrb[74].mxu0 }
 0x3ec   : > { %v4777_v24 = vpop.f32.mrb[72].mxu1  ;;  %v4725_v14 = vpop.f32.mrb[75].mxu0 }
 0x3ed   : > { %v4726_v7 = vadd.f32 %v4725_v14, %v4724_v28  ;;  %v4778_v29 = vpop.f32.mrb[73].mxu1 }
 0x3ee   : > { %v4779_v33 = vadd.f32 %v4778_v29, %v4777_v24 }
 0x3ef   : > { %v4727_v34 = vpop.f32.mrb[76].mxu0  ;;  %v3653_v4 = vadd.f32 %v4726_v7, %v4188_v27 }
 0x3f0   : > { %v3753_v36 = vadd.f32 %v4779_v33, %v3648_v31  ;;  %v4780_v37 = vpop.f32.mrb[74].mxu1  ;;  %v4728_v41 = vpop.f32.mrb[77].mxu0 }
 0x3f1   : > { %v4729_v26 = vadd.f32 %v4728_v41, %v4727_v34  ;;  %v4781_v44 = vpop.f32.mrb[75].mxu1 }
 0x3f2   : > { %v4782_v57 = vadd.f32 %v4781_v44, %v4780_v37 }
 0x3f3   : > { %v4730_v45 = vpop.f32.mrb[78].mxu0  ;;  %v3658_v35 = vadd.f32 %v4729_v26, %v4188_v27 }
 0x3f4   : > { %v3758_v32 = vadd.f32 %v4782_v57, %v3653_v4  ;;  %v4783_v49 = vpop.f32.mrb[76].mxu1  ;;  %v4731_v55 = vpop.f32.mrb[79].mxu0 }
 0x3f5   : > { %v4732_v56 = vadd.f32 %v4731_v55, %v4730_v45  ;;  %v4784_v47 = vpop.f32.mrb[77].mxu1 }
 0x3f6   : > { %v4785_v54 = vadd.f32 %v4784_v47, %v4783_v49 }
 0x3f7   : > { %v4733_v23 = vpop.f32.mrb[80].mxu0  ;;  %v3663_v20 = vadd.f32 %v4732_v56, %v4188_v27 }
 0x3f8   : > { %v3763_v63 = vadd.f32 %v4785_v54, %v3658_v35  ;;  %v4786_v5 = vpop.f32.mrb[78].mxu1  ;;  %v4734_v60 = vpop.f32.mrb[81].mxu0 }
 0x3f9   : > { %v4735_v46 = vadd.f32 %v4734_v60, %v4733_v23  ;;  %v4787_v0 = vpop.f32.mrb[79].mxu1 }
 0x3fa   : > { %v4788_v50 = vadd.f32 %v4787_v0, %v4786_v5 }
 0x3fb   : > { %v4736_v9 = vpop.f32.mrb[82].mxu0  ;;  %v3668_v61 = vadd.f32 %v4735_v46, %v4188_v27 }
 0x3fc   : > { %v3768_v39 = vadd.f32 %v4788_v50, %v3663_v20  ;;  %v4789_v53 = vpop.f32.mrb[80].mxu1  ;;  %v4737_v21 = vpop.f32.mrb[83].mxu0 }
 0x3fd   : > { %v4738_v30 = vadd.f32 %v4737_v21, %v4736_v9  ;;  %v4790_v59 = vpop.f32.mrb[81].mxu1 }
 0x3fe   : > { %v4791_v22 = vadd.f32 %v4790_v59, %v4789_v53 }
 0x3ff   : > { %v4739_v38 = vpop.f32.mrb[84].mxu0  ;;  %v3673_v42 = vadd.f32 %v4738_v30, %v4188_v27 }
 0x400   : > { %v3773_v62 = vadd.f32 %v4791_v22, %v3668_v61  ;;  %v4792_v3 = vpop.f32.mrb[82].mxu1  ;;  %v4740_v43 = vpop.f32.mrb[85].mxu0 }
 0x401   : > { %v4741_v48 = vadd.f32 %v4740_v43, %v4739_v38  ;;  %v4793_v1 = vpop.f32.mrb[83].mxu1 }
 0x402   : > { %v4794_v6 = vadd.f32 %v4793_v1, %v4792_v3 }
 0x403   : > { %v4742_v8 = vpop.f32.mrb[86].mxu0  ;;  %v3678_v17 = vadd.f32 %v4741_v48, %v4188_v27 }
 0x404   : > { %v3778_v12 = vadd.f32 %v4794_v6, %v3673_v42  ;;  %v4795_v58 = vpop.f32.mrb[84].mxu1  ;;  %v4743_v15 = vpop.f32.mrb[87].mxu0 }
 0x405   : > { %v4744_v16 = vadd.f32 %v4743_v15, %v4742_v8  ;;  %v4796_v51 = vpop.f32.mrb[85].mxu1 }
 0x406   : > { %v4797_v18 = vadd.f32 %v4796_v51, %v4795_v58 }
 0x407   : > { %v4833_v2 = vpop.f32.mrb[88].mxu0  ;;  %v3683_v40 = vadd.f32 %v4744_v16, %v4188_v27 }
 0x408   : > { %v3783_v19 = vadd.f32 %v4797_v18, %v3678_v17  ;;  %v4798_v11 = vpop.f32.mrb[86].mxu1  ;;  %v4834_v10 = vpop.f32.mrb[89].mxu0 }
 0x409   : > { %v4799_v52 = vpop.f32.mrb[87].mxu1  ;;  %v4835_v25 = vadd.f32 %v4834_v10, %v4833_v2 }
 0x40a   : > { %v4800_v13 = vadd.f32 %v4799_v52, %v4798_v11 }
 0x40b   : > { %v3858_v28 = vadd.f32 %v4835_v25, %v3753_v36  ;;  %v4836_v31 = vpop.f32.mrb[90].mxu0 }
 0x40c   : > { %v3788_v24 = vadd.f32 %v4800_v13, %v3683_v40  ;;  %v4889_v14 = vpop.f32.mrb[88].mxu1  ;;  %v4837_v7 = vpop.f32.mrb[91].mxu0 }
 0x40d   : > { %v4838_v29 = vadd.f32 %v4837_v7, %v4836_v31  ;;  %v4890_v33 = vpop.f32.mrb[89].mxu1 }
 0x40e   : > { %v4891_v34 = vadd.f32 %v4890_v33, %v4889_v14 }
 0x40f   : > { %v3863_v37 = vadd.f32 %v4838_v29, %v3758_v32  ;;  %v4839_v41 = vpop.f32.mrb[92].mxu0 }
 0x410   : > { %v4892_v26 = vpop.f32.mrb[90].mxu1  ;;  %v4840_v44 = vpop.f32.mrb[93].mxu0  ;;  %v3963_v4 = vadd.f32 %v4891_v34, %v3858_v28 }
 0x411   : > { %v4841_v57 = vadd.f32 %v4840_v44, %v4839_v41  ;;  %v4893_v45 = vpop.f32.mrb[91].mxu1 }
 0x412   : > { %v4894_v49 = vadd.f32 %v4893_v45, %v4892_v26 }
 0x413   : > { %v3868_v55 = vadd.f32 %v4841_v57, %v3763_v63  ;;  %v4842_v56 = vpop.f32.mrb[94].mxu0 }
 0x414   : > { %v4895_v27 = vpop.f32.mrb[92].mxu1  ;;  %v4843_v47 = vpop.f32.mrb[95].mxu0  ;;  %v3968_v36 = vadd.f32 %v4894_v49, %v3863_v37 }
 0x415   : > { %v4844_v35 = vadd.f32 %v4843_v47, %v4842_v56  ;;  %v4896_v54 = vpop.f32.mrb[93].mxu1 }
 0x416   : > { %v4897_v23 = vadd.f32 %v4896_v54, %v4895_v27 }
 0x417   : > { %v3873_v5 = vadd.f32 %v4844_v35, %v3768_v39  ;;  %v4845_v60 = vpop.f32.mrb[96].mxu0 }
 0x418   : > { %v4898_v46 = vpop.f32.mrb[94].mxu1  ;;  %v4846_v0 = vpop.f32.mrb[97].mxu0  ;;  %v3973_v32 = vadd.f32 %v4897_v23, %v3868_v55 }
 0x419   : > { %v4847_v20 = vadd.f32 %v4846_v0, %v4845_v60  ;;  %v4899_v50 = vpop.f32.mrb[95].mxu1 }
 0x41a   : > { %v4900_v9 = vadd.f32 %v4899_v50, %v4898_v46 }
 0x41b   : > { %v3878_v53 = vadd.f32 %v4847_v20, %v3773_v62  ;;  %v4848_v21 = vpop.f32.mrb[98].mxu0 }
 0x41c   : > { %v4901_v30 = vpop.f32.mrb[96].mxu1  ;;  %v4849_v59 = vpop.f32.mrb[99].mxu0  ;;  %v3978_v63 = vadd.f32 %v4900_v9, %v3873_v5 }
 0x41d   : > { %v4850_v61 = vadd.f32 %v4849_v59, %v4848_v21  ;;  %v4902_v22 = vpop.f32.mrb[97].mxu1 }
 0x41e   : > { %v4903_v38 = vadd.f32 %v4902_v22, %v4901_v30 }
 0x41f   : > { %v3883_v3 = vadd.f32 %v4850_v61, %v3778_v12  ;;  %v4851_v43 = vpop.f32.mrb[100].mxu0 }
 0x420   : > { %v4904_v48 = vpop.f32.mrb[98].mxu1  ;;  %v4852_v39 = vpop.f32.mrb[101].mxu0  ;;  %v3983_v1 = vadd.f32 %v4903_v38, %v3878_v53 }
 0x421   : > { %v4853_v42 = vadd.f32 %v4852_v39, %v4851_v43  ;;  %v4905_v6 = vpop.f32.mrb[99].mxu1 }
 0x422   : > { %v4906_v8 = vadd.f32 %v4905_v6, %v4904_v48 }
 0x423   : > { %v3888_v58 = vadd.f32 %v4853_v42, %v3783_v19  ;;  %v4854_v15 = vpop.f32.mrb[102].mxu0 }
 0x424   : > { %v4907_v16 = vpop.f32.mrb[100].mxu1  ;;  %v4855_v62 = vpop.f32.mrb[103].mxu0  ;;  %v3988_v51 = vadd.f32 %v4906_v8, %v3883_v3 }
 0x425   : > { %v4856_v17 = vadd.f32 %v4855_v62, %v4854_v15  ;;  %v4908_v18 = vpop.f32.mrb[101].mxu1 }
 0x426   : > { %v4909_v2 = vadd.f32 %v4908_v18, %v4907_v16 }
 0x427   : > { %v3893_v11 = vadd.f32 %v4856_v17, %v3788_v24 }
 0x428   : > { %v4910_v10 = vpop.f32.mrb[102].mxu1  ;;  %v3993_v12 = vadd.f32 %v4909_v2, %v3888_v58 }
 0x429   : > { %v5059_v52 = vpop.f32.mrb[104].mxu0  ;;  %v4911_v25 = vpop.f32.mrb[103].mxu1 }
 0x42a   : > { %v4073_v40 = vadd.f32 %v5059_v52, %v3968_v36  ;;  %v4912_v13 = vadd.f32 %v4911_v25, %v4910_v10  ;;  %v4067_v28 = vpop.f32.mrb[105].mxu0 }
 0x42b   : > { %v4068_v19 = vadd.f32 %v4067_v28, %v3963_v4 }
 0x42c   : > { %v4107_v31 = vmax.f32 %v4073_v40, 0.0  ;;  %v5065_v14 = vpop.f32.mrb[104].mxu1  ;;  %v3998_v7 = vadd.f32 %v4912_v13, %v3893_v11 }
 0x42d   : > { %v4106_v29 = vmax.f32 %v4068_v19, 0.0  ;;  %v5062_v33 = vpop.f32.mrb[106].mxu0  ;;  %v4093_v34 = vadd.f32 %v5065_v14, %v3988_v51  ;;  %v4087_v24 = vpop.f32.mrb[105].mxu1 }
 0x42e   : > { %4115 = vst [vmem:[%s278_s17 + $0x8] sm:$0xff] %v4107_v31  ;;  %v4083_v37 = vadd.f32 %v5062_v33, %v3978_v63  ;;  %v4077_v41 = vpop.f32.mrb[107].mxu0  ;;  %v4088_v26 = vadd.f32 %v4087_v24, %v3983_v1 }
 0x42f   : > { %4114 = vst [vmem:[%s278_s17] sm:$0xff] %v4106_v29  ;;  %v4111_v44 = vmax.f32 %v4093_v34, 0.0  ;;  %v4078_v57 = vadd.f32 %v4077_v41, %v3973_v32 }
 0x430   : > { %v4109_v45 = vmax.f32 %v4083_v37, 0.0  ;;  %v4110_v49 = vmax.f32 %v4088_v26, 0.0  ;;  %v5068_v55 = vpop.f32.mrb[106].mxu1 }
 0x431   : > { %4119 = vst [vmem:[%s278_s17 + $0x28] sm:$0xff] %v4111_v44  ;;  %v4108_v56 = vmax.f32 %v4078_v57, 0.0  ;;  %v4103_v4 = vadd.f32 %v5068_v55, %v3998_v7  ;;  %v4097_v27 = vpop.f32.mrb[107].mxu1 }
 0x432   : > { %4117 = vst [vmem:[%s278_s17 + $0x18] sm:$0xff] %v4109_v45  ;;  %4118 = vst [vmem:[%s278_s17 + $0x20] sm:$0xff] %v4110_v49  ;;  %v4098_v47 = vadd.f32 %v4097_v27, %v3993_v12 }
 0x433   : > { %4116 = vst [vmem:[%s278_s17 + $0x10] sm:$0xff] %v4108_v56  ;;  %v4113_v36 = vmax.f32 %v4103_v4, 0.0 }
 0x434   : > { %v4112_v35 = vmax.f32 %v4098_v47, 0.0 }
 0x435   : > { %4121 = vst [vmem:[%s278_s17 + $0x38] sm:$0xff] %v4113_v36 }
 0x436   : > { %4120 = vst [vmem:[%s278_s17 + $0x30] sm:$0xff] %v4112_v35 }
 0x437 PF: > { %s17_s24 = sadd.s32 1, %s5631_s24  }
 0x438   : > { %p14_p4 = scmp.ge.s32.totalorder %s17_s24, 4  }
 0x43a   :  { %16 = sbr.rel (!%p14_p4) target bundleno = 1 (0x1), region = 80 }

</bundles_post_ra>
